<compile_context>
chip_gen: v7x
topology: tpu7x:2x2x1
jax: 0.10.0
libtpu: 0.0.40
codegen_flags: <defaults>
</compile_context>

<pallas_src>
import jax
import jax.numpy as jnp
import numpy as np
from jax.experimental import pallas as pl
from jax.experimental.pallas import tpu as pltpu


def _down_kernel(x_ref, w1_ref, b1_ref, w2_ref, b2_ref, o_ref,
                 pad1, pad2, col1, col2):
    # x_ref  : (1, Hp, 2, Wp, 2*Cin) bf16   (free row-major view of NHWC input)
    # w1_ref : (9*Cin, Cout)         bf16   BN-scale folded, k-major (k=dy*3+dx)
    # w2_ref : (9*Cout, Cout)        bf16
    # b*_ref : (1, Cout)             f32    folded BN bias
    # o_ref  : (1, Hp*Wp, Cout)      f32    flat output slab (contiguous store)
    # pad1   : (Hp+2, Wp+2, Cin)     bf16   conv1 input with 1-wide zero halo
    # pad2   : (Hp+2, Wp+2, Cout)    bf16   conv2 input with 1-wide zero halo
    # col1   : (Hp, Wp, 9*Cin)       bf16   im2col buffer for conv1
    # col2   : (Hp, Wp, 9*Cout)      bf16   im2col buffer for conv2
    Hp = pad1.shape[0] - 2
    Wp = pad1.shape[1] - 2
    Cin = pad1.shape[2]
    Cout = pad2.shape[2]

    # ---- MaxPool2d(2): only int / contiguous-slice indexing. ----
    r_even = x_ref[0, :, 0, :, :]          # even input rows   (Hp, Wp, 2*Cin)
    r_odd = x_ref[0, :, 1, :, :]           # odd  input rows
    rmax = jnp.maximum(r_even, r_odd)      # max over H window
    # W window is folded into the lane axis: lanes [0:Cin] = even W, [Cin:2Cin] = odd W.
    pooled = jnp.maximum(rmax[:, :, :Cin], rmax[:, :, Cin:])   # (Hp, Wp, Cin)

    # ---- conv1 halo pad: zero only the 1-wide border, write pooled interior. ----
    pad1[0:1, :, :] = jnp.zeros((1, Wp + 2, Cin), pad1.dtype)
    pad1[Hp + 1:Hp + 2, :, :] = jnp.zeros((1, Wp + 2, Cin), pad1.dtype)
    pad1[:, 0:1, :] = jnp.zeros((Hp + 2, 1, Cin), pad1.dtype)
    pad1[:, Wp + 1:Wp + 2, :] = jnp.zeros((Hp + 2, 1, Cin), pad1.dtype)
    pad1[1:Hp + 1, 1:Wp + 1, :] = pooled

    # ---- Conv1 (3x3, pad=1): build im2col buffer once, ONE matmul (K=9*Cin). ----
    for dy in range(3):
        for dx in range(3):
            k = dy * 3 + dx
            col1[:, :, k * Cin:(k + 1) * Cin] = pad1[dy:dy + Hp, dx:dx + Wp, :]
    patches1 = col1[...].reshape(Hp * Wp, 9 * Cin)
    h1 = jnp.dot(patches1, w1_ref[...], preferred_element_type=jnp.float32)
    h1 = jnp.maximum(h1 + b1_ref[...], 0.0)            # (Hp*Wp, Cout) f32

    # ---- conv2 halo pad ----
    pad2[0:1, :, :] = jnp.zeros((1, Wp + 2, Cout), pad2.dtype)
    pad2[Hp + 1:Hp + 2, :, :] = jnp.zeros((1, Wp + 2, Cout), pad2.dtype)
    pad2[:, 0:1, :] = jnp.zeros((Hp + 2, 1, Cout), pad2.dtype)
    pad2[:, Wp + 1:Wp + 2, :] = jnp.zeros((Hp + 2, 1, Cout), pad2.dtype)
    pad2[1:Hp + 1, 1:Wp + 1, :] = h1.reshape(Hp, Wp, Cout).astype(pad2.dtype)

    # ---- Conv2 (3x3, pad=1): ONE matmul (K=9*Cout). ----
    for dy in range(3):
        for dx in range(3):
            k = dy * 3 + dx
            col2[:, :, k * Cout:(k + 1) * Cout] = pad2[dy:dy + Hp, dx:dx + Wp, :]
    patches2 = col2[...].reshape(Hp * Wp, 9 * Cout)
    h2 = jnp.dot(patches2, w2_ref[...], preferred_element_type=jnp.float32)
    h2 = jnp.maximum(h2 + b2_ref[...], 0.0)            # (Hp*Wp, Cout) f32

    o_ref[0] = h2                                       # single contiguous store


def _padded_vmem_bytes(shape, dtype):
    """Conservative VMEM footprint: minor dim padded to 128 lanes, 2nd-minor to 8."""
    s = list(shape)
    s[-1] = ((s[-1] + 127) // 128) * 128
    if len(s) >= 2:
        s[-2] = ((s[-2] + 7) // 8) * 8
    return int(np.prod(s)) * np.dtype(dtype).itemsize


def down_forward(x_nchw, w1, b1, w2, b2):
    """x_nchw: (N, Cin, H, W) f32; w1: (9*Cin, Cout) bf16, w2: (9*Cout, Cout) bf16
    (BN scale folded); b*: (1, Cout) f32 folded bias.
    Returns (N, Cout, H//2, W//2) f32."""
    N, Cin, H, W = x_nchw.shape
    assert H % 2 == 0 and W % 2 == 0
    Hp, Wp = H // 2, W // 2
    Cout = w1.shape[-1]

    # NCHW -> NHWC (+ bf16 cast), then a FREE row-major view splitting H into
    # (Hp, 2) and folding the W-parity into the lane axis: (N, Hp, 2, Wp, 2*Cin).
    x = jnp.transpose(x_nchw, (0, 2, 3, 1)).astype(jnp.bfloat16)
    x = x.reshape(N, Hp, 2, Wp, 2 * Cin)

    blocks = [
        ((1, Hp, 2, Wp, 2 * Cin), jnp.bfloat16),
        ((9 * Cin, Cout), jnp.bfloat16),
        ((1, Cout), jnp.float32),
        ((9 * Cout, Cout), jnp.bfloat16),
        ((1, Cout), jnp.float32),
        ((Hp * Wp, Cout), jnp.float32),
    ]
    scratch = [
        ((Hp + 2, Wp + 2, Cin), jnp.bfloat16),
        ((Hp + 2, Wp + 2, Cout), jnp.bfloat16),
        ((Hp, Wp, 9 * Cin), jnp.bfloat16),
        ((Hp, Wp, 9 * Cout), jnp.bfloat16),
    ]
    need = (2 * sum(_padded_vmem_bytes(s, d) for s, d in blocks)      # double-buffered
            + sum(_padded_vmem_bytes(s, d) for s, d in scratch))
    vmem_limit = int(min(64 * 1024 * 1024, max(8 * 1024 * 1024, 2 * need)))

    out_flat = pl.pallas_call(
        _down_kernel,
        out_shape=jax.ShapeDtypeStruct((N, Hp * Wp, Cout), jnp.float32),
        grid=(N,),
        in_specs=[
            pl.BlockSpec((1, Hp, 2, Wp, 2 * Cin), lambda b: (b, 0, 0, 0, 0)),
            pl.BlockSpec((9 * Cin, Cout), lambda b: (0, 0)),
            pl.BlockSpec((1, Cout), lambda b: (0, 0)),
            pl.BlockSpec((9 * Cout, Cout), lambda b: (0, 0)),
            pl.BlockSpec((1, Cout), lambda b: (0, 0)),
        ],
        out_specs=pl.BlockSpec((1, Hp * Wp, Cout), lambda b: (b, 0, 0)),
        scratch_shapes=[
            pltpu.VMEM((Hp + 2, Wp + 2, Cin), jnp.bfloat16),
            pltpu.VMEM((Hp + 2, Wp + 2, Cout), jnp.bfloat16),
            pltpu.VMEM((Hp, Wp, 9 * Cin), jnp.bfloat16),
            pltpu.VMEM((Hp, Wp, 9 * Cout), jnp.bfloat16),
        ],
        compiler_params=pltpu.CompilerParams(
            dimension_semantics=("parallel",),
            vmem_limit_bytes=vmem_limit),
    )(x, w1, b1, w2, b2)

    out = out_flat.reshape(N, Hp, Wp, Cout)          # free row-major view
    return jnp.transpose(out, (0, 3, 1, 2))          # back to NCHW


def _bn_scale(gamma, running_var, eps=1e-5):
    return gamma / jnp.sqrt(running_var + eps)


def _repack_conv_weight(w_pt, scale):
    """PyTorch (Cout, Cin, 3, 3) -> (9*Cin, Cout) bf16 with BN scale folded into
    the output-channel columns; row index = (dy*3 + dx)*Cin + cin."""
    co, ci = w_pt.shape[0], w_pt.shape[1]
    w = jnp.transpose(w_pt, (2, 3, 1, 0)).reshape(9 * ci, co)
    return (w * scale.reshape(1, co)).astype(jnp.bfloat16)


def _fold_bn_bias(conv_bias, beta, running_mean, scale):
    """Folded bias: scale*(conv_bias - mean) + beta, shape (1, Cout) f32."""
    return (scale * (conv_bias - running_mean) + beta).reshape(1, -1).astype(jnp.float32)


def _reference(x_nchw, w1_pt, b1_pt, g1, be1, rm1, rv1,
               w2_pt, b2_pt, g2, be2, rm2, rv2, eps=1e-5):
    """Pure-JAX f32 reference of MaxPool2d(2) + Double_conv (inference BN)."""
    x = jnp.transpose(x_nchw, (0, 2, 3, 1))
    N, H, W, C = x.shape
    x = x.reshape(N, H // 2, 2, W // 2, 2, C).max(axis=(2, 4))

    def conv_bn_relu(x, w_pt, b_pt, g, be, rm, rv):
        w = jnp.transpose(w_pt, (2, 3, 1, 0))  # HWIO
        y = jax.lax.conv_general_dilated(
            x, w, (1, 1), "SAME",
            dimension_numbers=("NHWC", "HWIO", "NHWC")) + b_pt
        y = (y - rm) / jnp.sqrt(rv + eps) * g + be
        return jnp.maximum(y, 0.0)

    x = conv_bn_relu(x, w1_pt, b1_pt, g1, be1, rm1, rv1)
    x = conv_bn_relu(x, w2_pt, b2_pt, g2, be2, rm2, rv2)
    return jnp.transpose(x, (0, 3, 1, 2))


if __name__ == "__main__":
    N, Cin, H, W, Cout = 2, 4, 16, 16, 8

    key = jax.random.PRNGKey(0)
    ks = jax.random.split(key, 13)

    x = jax.random.normal(ks[0], (N, Cin, H, W), jnp.float32)

    # synthetic parameters in PyTorch layouts
    w1_pt = 0.1 * jax.random.normal(ks[1], (Cout, Cin, 3, 3), jnp.float32)
    b1_pt = 0.1 * jax.random.normal(ks[2], (Cout,), jnp.float32)
    w2_pt = 0.1 * jax.random.normal(ks[3], (Cout, Cout, 3, 3), jnp.float32)
    b2_pt = 0.1 * jax.random.normal(ks[4], (Cout,), jnp.float32)
    g1 = 1.0 + 0.1 * jax.random.normal(ks[5], (Cout,), jnp.float32)
    be1 = 0.1 * jax.random.normal(ks[6], (Cout,), jnp.float32)
    g2 = 1.0 + 0.1 * jax.random.normal(ks[7], (Cout,), jnp.float32)
    be2 = 0.1 * jax.random.normal(ks[8], (Cout,), jnp.float32)
    rm1 = 0.1 * jax.random.normal(ks[9], (Cout,), jnp.float32)
    rv1 = 1.0 + 0.1 * jnp.abs(jax.random.normal(ks[10], (Cout,), jnp.float32))
    rm2 = 0.1 * jax.random.normal(ks[11], (Cout,), jnp.float32)
    rv2 = 1.0 + 0.1 * jnp.abs(jax.random.normal(ks[12], (Cout,), jnp.float32))

    # fold BN into conv weights / biases (inference-mode semantics)
    s1 = _bn_scale(g1, rv1)
    s2 = _bn_scale(g2, rv2)
    w1 = _repack_conv_weight(w1_pt, s1)
    w2 = _repack_conv_weight(w2_pt, s2)
    b1 = _fold_bn_bias(b1_pt, be1, rm1, s1)
    b2 = _fold_bn_bias(b2_pt, be2, rm2, s2)

    out = down_forward(x, w1, b1, w2, b2)
    out = jax.block_until_ready(out)

    ref = jax.block_until_ready(
        _reference(x, w1_pt, b1_pt, g1, be1, rm1, rv1,
                   w2_pt, b2_pt, g2, be2, rm2, rv2))

    assert out.shape == (N, Cout, H // 2, W // 2), out.shape
    # bf16 operands with f32 accumulation -> compare against the f32 reference
    # with a bf16-appropriate tolerance.
    np.testing.assert_allclose(np.asarray(out), np.asarray(ref),
                               rtol=2e-2, atol=2e-2)
    print("KERNEL_OK")
</pallas_src>

<mosaic_0001>
module attributes {stable_mosaic.version = 11 : i64} {
  func.func @_down_kernel(%arg0: i32, %arg1: memref<1x8x2x8x8xbf16, #tpu.memory_space<vmem>>, %arg2: memref<36x8xbf16, #tpu.memory_space<vmem>>, %arg3: memref<1x8xf32, #tpu.memory_space<vmem>>, %arg4: memref<72x8xbf16, #tpu.memory_space<vmem>>, %arg5: memref<1x8xf32, #tpu.memory_space<vmem>>, %arg6: memref<1x64x8xf32, #tpu.memory_space<vmem>>, %arg7: memref<10x10x4xbf16, #tpu.memory_space<vmem>>, %arg8: memref<10x10x8xbf16, #tpu.memory_space<vmem>>, %arg9: memref<8x8x36xbf16, #tpu.memory_space<vmem>>, %arg10: memref<8x8x72xbf16, #tpu.memory_space<vmem>>) attributes {dimension_semantics = [#tpu.dimension_semantics<parallel>], iteration_bounds = array<i64: 2>, scalar_prefetch = 0 : i64, scratch_operands = 4 : i64, tpu.core_type = #tpu.core_type<tc>, window_params = [{transform_indices = @transform_0, window_bounds = array<i64: 1, 8, 2, 8, 8>}, {pipeline_mode = #tpu.pipeline_mode<synchronous>, transform_indices = @transform_1, window_bounds = array<i64: 36, 8>}, {pipeline_mode = #tpu.pipeline_mode<synchronous>, transform_indices = @transform_2, window_bounds = array<i64: 1, 8>}, {pipeline_mode = #tpu.pipeline_mode<synchronous>, transform_indices = @transform_3, window_bounds = array<i64: 72, 8>}, {pipeline_mode = #tpu.pipeline_mode<synchronous>, transform_indices = @transform_4, window_bounds = array<i64: 1, 8>}, {transform_indices = @transform_5, window_bounds = array<i64: 1, 64, 8>}]} {
    %c0 = arith.constant 0 : index
    %c0_0 = arith.constant 0 : index
    %c0_1 = arith.constant 0 : index
    %c0_2 = arith.constant 0 : index
    %c0_3 = arith.constant 0 : index
    %0 = vector.load %arg1[%c0, %c0_0, %c0_1, %c0_2, %c0_3] : memref<1x8x2x8x8xbf16, #tpu.memory_space<vmem>>, vector<1x8x1x8x8xbf16>
    %1 = vector.shape_cast %0 : vector<1x8x1x8x8xbf16> to vector<8x8x8xbf16>
    %c0_4 = arith.constant 0 : index
    %c0_5 = arith.constant 0 : index
    %c1 = arith.constant 1 : index
    %c0_6 = arith.constant 0 : index
    %c0_7 = arith.constant 0 : index
    %2 = vector.load %arg1[%c0_4, %c0_5, %c1, %c0_6, %c0_7] : memref<1x8x2x8x8xbf16, #tpu.memory_space<vmem>>, vector<1x8x1x8x8xbf16>
    %3 = vector.shape_cast %2 : vector<1x8x1x8x8xbf16> to vector<8x8x8xbf16>
    %4 = arith.maximumf %1, %3 : vector<8x8x8xbf16>
    %5 = vector.extract_strided_slice %4 {offsets = [0, 0, 0], sizes = [8, 8, 4], strides = [1, 1, 1]} : vector<8x8x8xbf16> to vector<8x8x4xbf16>
    %6 = vector.extract_strided_slice %4 {offsets = [0, 0, 4], sizes = [8, 8, 4], strides = [1, 1, 1]} : vector<8x8x8xbf16> to vector<8x8x4xbf16>
    %7 = arith.maximumf %5, %6 : vector<8x8x4xbf16>
    %cst = arith.constant 0.000000e+00 : bf16
    %8 = vector.broadcast %cst : bf16 to vector<1x10x4xbf16>
    %c0_8 = arith.constant 0 : index
    %c0_9 = arith.constant 0 : index
    %c0_10 = arith.constant 0 : index
    %9 = vector.load %arg7[%c0_8, %c0_9, %c0_10] : memref<10x10x4xbf16, #tpu.memory_space<vmem>>, vector<1x10x4xbf16>
    tpu.vector_store %arg7[%c0_8, %c0_9, %c0_10], %8 {strides = array<i32>} : memref<10x10x4xbf16, #tpu.memory_space<vmem>>, vector<1x10x4xbf16>,
    %cst_11 = arith.constant 0.000000e+00 : bf16
    %10 = vector.broadcast %cst_11 : bf16 to vector<1x10x4xbf16>
    %c9 = arith.constant 9 : index
    %c0_12 = arith.constant 0 : index
    %c0_13 = arith.constant 0 : index
    %11 = vector.load %arg7[%c9, %c0_12, %c0_13] : memref<10x10x4xbf16, #tpu.memory_space<vmem>>, vector<1x10x4xbf16>
    tpu.vector_store %arg7[%c9, %c0_12, %c0_13], %10 {strides = array<i32>} : memref<10x10x4xbf16, #tpu.memory_space<vmem>>, vector<1x10x4xbf16>,
    %cst_14 = arith.constant 0.000000e+00 : bf16
    %12 = vector.broadcast %cst_14 : bf16 to vector<10x1x4xbf16>
    %c0_15 = arith.constant 0 : index
    %c0_16 = arith.constant 0 : index
    %c0_17 = arith.constant 0 : index
    %13 = vector.load %arg7[%c0_15, %c0_16, %c0_17] : memref<10x10x4xbf16, #tpu.memory_space<vmem>>, vector<10x1x4xbf16>
    tpu.vector_store %arg7[%c0_15, %c0_16, %c0_17], %12 {strides = array<i32>} : memref<10x10x4xbf16, #tpu.memory_space<vmem>>, vector<10x1x4xbf16>,
    %cst_18 = arith.constant 0.000000e+00 : bf16
    %14 = vector.broadcast %cst_18 : bf16 to vector<10x1x4xbf16>
    %c0_19 = arith.constant 0 : index
    %c9_20 = arith.constant 9 : index
    %c0_21 = arith.constant 0 : index
    %15 = vector.load %arg7[%c0_19, %c9_20, %c0_21] : memref<10x10x4xbf16, #tpu.memory_space<vmem>>, vector<10x1x4xbf16>
    tpu.vector_store %arg7[%c0_19, %c9_20, %c0_21], %14 {strides = array<i32>} : memref<10x10x4xbf16, #tpu.memory_space<vmem>>, vector<10x1x4xbf16>,
    %c1_22 = arith.constant 1 : index
    %c1_23 = arith.constant 1 : index
    %c0_24 = arith.constant 0 : index
    %16 = vector.load %arg7[%c1_22, %c1_23, %c0_24] : memref<10x10x4xbf16, #tpu.memory_space<vmem>>, vector<8x8x4xbf16>
    tpu.vector_store %arg7[%c1_22, %c1_23, %c0_24], %7 {strides = array<i32>} : memref<10x10x4xbf16, #tpu.memory_space<vmem>>, vector<8x8x4xbf16>,
    %c0_25 = arith.constant 0 : index
    %c0_26 = arith.constant 0 : index
    %c0_27 = arith.constant 0 : index
    %17 = vector.load %arg7[%c0_25, %c0_26, %c0_27] : memref<10x10x4xbf16, #tpu.memory_space<vmem>>, vector<8x8x4xbf16>
    %c0_28 = arith.constant 0 : index
    %c0_29 = arith.constant 0 : index
    %c0_30 = arith.constant 0 : index
    %18 = vector.load %arg9[%c0_28, %c0_29, %c0_30] : memref<8x8x36xbf16, #tpu.memory_space<vmem>>, vector<8x8x4xbf16>
    tpu.vector_store %arg9[%c0_28, %c0_29, %c0_30], %17 {strides = array<i32>} : memref<8x8x36xbf16, #tpu.memory_space<vmem>>, vector<8x8x4xbf16>,
    %c0_31 = arith.constant 0 : index
    %c1_32 = arith.constant 1 : index
    %c0_33 = arith.constant 0 : index
    %19 = vector.load %arg7[%c0_31, %c1_32, %c0_33] : memref<10x10x4xbf16, #tpu.memory_space<vmem>>, vector<8x8x4xbf16>
    %c0_34 = arith.constant 0 : index
    %c0_35 = arith.constant 0 : index
    %c4 = arith.constant 4 : index
    %20 = vector.load %arg9[%c0_34, %c0_35, %c4] : memref<8x8x36xbf16, #tpu.memory_space<vmem>>, vector<8x8x4xbf16>
    tpu.vector_store %arg9[%c0_34, %c0_35, %c4], %19 {strides = array<i32>} : memref<8x8x36xbf16, #tpu.memory_space<vmem>>, vector<8x8x4xbf16>,
    %c0_36 = arith.constant 0 : index
    %c2 = arith.constant 2 : index
    %c0_37 = arith.constant 0 : index
    %21 = vector.load %arg7[%c0_36, %c2, %c0_37] : memref<10x10x4xbf16, #tpu.memory_space<vmem>>, vector<8x8x4xbf16>
    %c0_38 = arith.constant 0 : index
    %c0_39 = arith.constant 0 : index
    %c8 = arith.constant 8 : index
    %22 = vector.load %arg9[%c0_38, %c0_39, %c8] : memref<8x8x36xbf16, #tpu.memory_space<vmem>>, vector<8x8x4xbf16>
    tpu.vector_store %arg9[%c0_38, %c0_39, %c8], %21 {strides = array<i32>} : memref<8x8x36xbf16, #tpu.memory_space<vmem>>, vector<8x8x4xbf16>,
    %c1_40 = arith.constant 1 : index
    %c0_41 = arith.constant 0 : index
    %c0_42 = arith.constant 0 : index
    %23 = vector.load %arg7[%c1_40, %c0_41, %c0_42] : memref<10x10x4xbf16, #tpu.memory_space<vmem>>, vector<8x8x4xbf16>
    %c0_43 = arith.constant 0 : index
    %c0_44 = arith.constant 0 : index
    %c12 = arith.constant 12 : index
    %24 = vector.load %arg9[%c0_43, %c0_44, %c12] : memref<8x8x36xbf16, #tpu.memory_space<vmem>>, vector<8x8x4xbf16>
    tpu.vector_store %arg9[%c0_43, %c0_44, %c12], %23 {strides = array<i32>} : memref<8x8x36xbf16, #tpu.memory_space<vmem>>, vector<8x8x4xbf16>,
    %c1_45 = arith.constant 1 : index
    %c1_46 = arith.constant 1 : index
    %c0_47 = arith.constant 0 : index
    %25 = vector.load %arg7[%c1_45, %c1_46, %c0_47] : memref<10x10x4xbf16, #tpu.memory_space<vmem>>, vector<8x8x4xbf16>
    %c0_48 = arith.constant 0 : index
    %c0_49 = arith.constant 0 : index
    %c16 = arith.constant 16 : index
    %26 = vector.load %arg9[%c0_48, %c0_49, %c16] : memref<8x8x36xbf16, #tpu.memory_space<vmem>>, vector<8x8x4xbf16>
    tpu.vector_store %arg9[%c0_48, %c0_49, %c16], %25 {strides = array<i32>} : memref<8x8x36xbf16, #tpu.memory_space<vmem>>, vector<8x8x4xbf16>,
    %c1_50 = arith.constant 1 : index
    %c2_51 = arith.constant 2 : index
    %c0_52 = arith.constant 0 : index
    %27 = vector.load %arg7[%c1_50, %c2_51, %c0_52] : memref<10x10x4xbf16, #tpu.memory_space<vmem>>, vector<8x8x4xbf16>
    %c0_53 = arith.constant 0 : index
    %c0_54 = arith.constant 0 : index
    %c20 = arith.constant 20 : index
    %28 = vector.load %arg9[%c0_53, %c0_54, %c20] : memref<8x8x36xbf16, #tpu.memory_space<vmem>>, vector<8x8x4xbf16>
    tpu.vector_store %arg9[%c0_53, %c0_54, %c20], %27 {strides = array<i32>} : memref<8x8x36xbf16, #tpu.memory_space<vmem>>, vector<8x8x4xbf16>,
    %c2_55 = arith.constant 2 : index
    %c0_56 = arith.constant 0 : index
    %c0_57 = arith.constant 0 : index
    %29 = vector.load %arg7[%c2_55, %c0_56, %c0_57] : memref<10x10x4xbf16, #tpu.memory_space<vmem>>, vector<8x8x4xbf16>
    %c0_58 = arith.constant 0 : index
    %c0_59 = arith.constant 0 : index
    %c24 = arith.constant 24 : index
    %30 = vector.load %arg9[%c0_58, %c0_59, %c24] : memref<8x8x36xbf16, #tpu.memory_space<vmem>>, vector<8x8x4xbf16>
    tpu.vector_store %arg9[%c0_58, %c0_59, %c24], %29 {strides = array<i32>} : memref<8x8x36xbf16, #tpu.memory_space<vmem>>, vector<8x8x4xbf16>,
    %c2_60 = arith.constant 2 : index
    %c1_61 = arith.constant 1 : index
    %c0_62 = arith.constant 0 : index
    %31 = vector.load %arg7[%c2_60, %c1_61, %c0_62] : memref<10x10x4xbf16, #tpu.memory_space<vmem>>, vector<8x8x4xbf16>
    %c0_63 = arith.constant 0 : index
    %c0_64 = arith.constant 0 : index
    %c28 = arith.constant 28 : index
    %32 = vector.load %arg9[%c0_63, %c0_64, %c28] : memref<8x8x36xbf16, #tpu.memory_space<vmem>>, vector<8x8x4xbf16>
    tpu.vector_store %arg9[%c0_63, %c0_64, %c28], %31 {strides = array<i32>} : memref<8x8x36xbf16, #tpu.memory_space<vmem>>, vector<8x8x4xbf16>,
    %c2_65 = arith.constant 2 : index
    %c2_66 = arith.constant 2 : index
    %c0_67 = arith.constant 0 : index
    %33 = vector.load %arg7[%c2_65, %c2_66, %c0_67] : memref<10x10x4xbf16, #tpu.memory_space<vmem>>, vector<8x8x4xbf16>
    %c0_68 = arith.constant 0 : index
    %c0_69 = arith.constant 0 : index
    %c32 = arith.constant 32 : index
    %34 = vector.load %arg9[%c0_68, %c0_69, %c32] : memref<8x8x36xbf16, #tpu.memory_space<vmem>>, vector<8x8x4xbf16>
    tpu.vector_store %arg9[%c0_68, %c0_69, %c32], %33 {strides = array<i32>} : memref<8x8x36xbf16, #tpu.memory_space<vmem>>, vector<8x8x4xbf16>,
    %c0_70 = arith.constant 0 : index
    %c0_71 = arith.constant 0 : index
    %c0_72 = arith.constant 0 : index
    %35 = vector.load %arg9[%c0_70, %c0_71, %c0_72] : memref<8x8x36xbf16, #tpu.memory_space<vmem>>, vector<8x8x36xbf16>
    %36 = vector.shape_cast %35 : vector<8x8x36xbf16> to vector<64x36xbf16>
    %c0_73 = arith.constant 0 : index
    %c0_74 = arith.constant 0 : index
    %37 = vector.load %arg2[%c0_73, %c0_74] : memref<36x8xbf16, #tpu.memory_space<vmem>>, vector<36x8xbf16>
    %cst_75 = arith.constant dense<0.000000e+00> : vector<64x8xf32>
    %38 = tpu.matmul %36, %37, %cst_75 {dimension_numbers = #tpu.dot_dimension_numbers<[1], [0], [0], [1], [0, 0, 1, 1], [], []>} : vector<64x36xbf16>, vector<36x8xbf16>, vector<64x8xf32> -> vector<64x8xf32>
    %c0_76 = arith.constant 0 : index
    %c0_77 = arith.constant 0 : index
    %39 = vector.load %arg3[%c0_76, %c0_77] : memref<1x8xf32, #tpu.memory_space<vmem>>, vector<1x8xf32>
    %40 = vector.broadcast %39 : vector<1x8xf32> to vector<64x8xf32>
    %41 = arith.addf %38, %40 : vector<64x8xf32>
    %cst_78 = arith.constant 0.000000e+00 : f32
    %42 = vector.broadcast %cst_78 : f32 to vector<64x8xf32>
    %43 = arith.maximumf %41, %42 : vector<64x8xf32>
    %cst_79 = arith.constant 0.000000e+00 : bf16
    %44 = vector.broadcast %cst_79 : bf16 to vector<1x10x8xbf16>
    %c0_80 = arith.constant 0 : index
    %c0_81 = arith.constant 0 : index
    %c0_82 = arith.constant 0 : index
    %45 = vector.load %arg8[%c0_80, %c0_81, %c0_82] : memref<10x10x8xbf16, #tpu.memory_space<vmem>>, vector<1x10x8xbf16>
    tpu.vector_store %arg8[%c0_80, %c0_81, %c0_82], %44 {strides = array<i32>} : memref<10x10x8xbf16, #tpu.memory_space<vmem>>, vector<1x10x8xbf16>,
    %cst_83 = arith.constant 0.000000e+00 : bf16
    %46 = vector.broadcast %cst_83 : bf16 to vector<1x10x8xbf16>
    %c9_84 = arith.constant 9 : index
    %c0_85 = arith.constant 0 : index
    %c0_86 = arith.constant 0 : index
    %47 = vector.load %arg8[%c9_84, %c0_85, %c0_86] : memref<10x10x8xbf16, #tpu.memory_space<vmem>>, vector<1x10x8xbf16>
    tpu.vector_store %arg8[%c9_84, %c0_85, %c0_86], %46 {strides = array<i32>} : memref<10x10x8xbf16, #tpu.memory_space<vmem>>, vector<1x10x8xbf16>,
    %cst_87 = arith.constant 0.000000e+00 : bf16
    %48 = vector.broadcast %cst_87 : bf16 to vector<10x1x8xbf16>
    %c0_88 = arith.constant 0 : index
    %c0_89 = arith.constant 0 : index
    %c0_90 = arith.constant 0 : index
    %49 = vector.load %arg8[%c0_88, %c0_89, %c0_90] : memref<10x10x8xbf16, #tpu.memory_space<vmem>>, vector<10x1x8xbf16>
    tpu.vector_store %arg8[%c0_88, %c0_89, %c0_90], %48 {strides = array<i32>} : memref<10x10x8xbf16, #tpu.memory_space<vmem>>, vector<10x1x8xbf16>,
    %cst_91 = arith.constant 0.000000e+00 : bf16
    %50 = vector.broadcast %cst_91 : bf16 to vector<10x1x8xbf16>
    %c0_92 = arith.constant 0 : index
    %c9_93 = arith.constant 9 : index
    %c0_94 = arith.constant 0 : index
    %51 = vector.load %arg8[%c0_92, %c9_93, %c0_94] : memref<10x10x8xbf16, #tpu.memory_space<vmem>>, vector<10x1x8xbf16>
    tpu.vector_store %arg8[%c0_92, %c9_93, %c0_94], %50 {strides = array<i32>} : memref<10x10x8xbf16, #tpu.memory_space<vmem>>, vector<10x1x8xbf16>,
    %52 = vector.shape_cast %43 : vector<64x8xf32> to vector<8x8x8xf32>
    %53 = arith.truncf %52 : vector<8x8x8xf32> to vector<8x8x8xbf16>
    %c1_95 = arith.constant 1 : index
    %c1_96 = arith.constant 1 : index
    %c0_97 = arith.constant 0 : index
    %54 = vector.load %arg8[%c1_95, %c1_96, %c0_97] : memref<10x10x8xbf16, #tpu.memory_space<vmem>>, vector<8x8x8xbf16>
    tpu.vector_store %arg8[%c1_95, %c1_96, %c0_97], %53 {strides = array<i32>} : memref<10x10x8xbf16, #tpu.memory_space<vmem>>, vector<8x8x8xbf16>,
    %c0_98 = arith.constant 0 : index
    %c0_99 = arith.constant 0 : index
    %c0_100 = arith.constant 0 : index
    %55 = vector.load %arg8[%c0_98, %c0_99, %c0_100] : memref<10x10x8xbf16, #tpu.memory_space<vmem>>, vector<8x8x8xbf16>
    %c0_101 = arith.constant 0 : index
    %c0_102 = arith.constant 0 : index
    %c0_103 = arith.constant 0 : index
    %56 = vector.load %arg10[%c0_101, %c0_102, %c0_103] : memref<8x8x72xbf16, #tpu.memory_space<vmem>>, vector<8x8x8xbf16>
    tpu.vector_store %arg10[%c0_101, %c0_102, %c0_103], %55 {strides = array<i32>} : memref<8x8x72xbf16, #tpu.memory_space<vmem>>, vector<8x8x8xbf16>,
    %c0_104 = arith.constant 0 : index
    %c1_105 = arith.constant 1 : index
    %c0_106 = arith.constant 0 : index
    %57 = vector.load %arg8[%c0_104, %c1_105, %c0_106] : memref<10x10x8xbf16, #tpu.memory_space<vmem>>, vector<8x8x8xbf16>
    %c0_107 = arith.constant 0 : index
    %c0_108 = arith.constant 0 : index
    %c8_109 = arith.constant 8 : index
    %58 = vector.load %arg10[%c0_107, %c0_108, %c8_109] : memref<8x8x72xbf16, #tpu.memory_space<vmem>>, vector<8x8x8xbf16>
    tpu.vector_store %arg10[%c0_107, %c0_108, %c8_109], %57 {strides = array<i32>} : memref<8x8x72xbf16, #tpu.memory_space<vmem>>, vector<8x8x8xbf16>,
    %c0_110 = arith.constant 0 : index
    %c2_111 = arith.constant 2 : index
    %c0_112 = arith.constant 0 : index
    %59 = vector.load %arg8[%c0_110, %c2_111, %c0_112] : memref<10x10x8xbf16, #tpu.memory_space<vmem>>, vector<8x8x8xbf16>
    %c0_113 = arith.constant 0 : index
    %c0_114 = arith.constant 0 : index
    %c16_115 = arith.constant 16 : index
    %60 = vector.load %arg10[%c0_113, %c0_114, %c16_115] : memref<8x8x72xbf16, #tpu.memory_space<vmem>>, vector<8x8x8xbf16>
    tpu.vector_store %arg10[%c0_113, %c0_114, %c16_115], %59 {strides = array<i32>} : memref<8x8x72xbf16, #tpu.memory_space<vmem>>, vector<8x8x8xbf16>,
    %c1_116 = arith.constant 1 : index
    %c0_117 = arith.constant 0 : index
    %c0_118 = arith.constant 0 : index
    %61 = vector.load %arg8[%c1_116, %c0_117, %c0_118] : memref<10x10x8xbf16, #tpu.memory_space<vmem>>, vector<8x8x8xbf16>
    %c0_119 = arith.constant 0 : index
    %c0_120 = arith.constant 0 : index
    %c24_121 = arith.constant 24 : index
    %62 = vector.load %arg10[%c0_119, %c0_120, %c24_121] : memref<8x8x72xbf16, #tpu.memory_space<vmem>>, vector<8x8x8xbf16>
    tpu.vector_store %arg10[%c0_119, %c0_120, %c24_121], %61 {strides = array<i32>} : memref<8x8x72xbf16, #tpu.memory_space<vmem>>, vector<8x8x8xbf16>,
    %c1_122 = arith.constant 1 : index
    %c1_123 = arith.constant 1 : index
    %c0_124 = arith.constant 0 : index
    %63 = vector.load %arg8[%c1_122, %c1_123, %c0_124] : memref<10x10x8xbf16, #tpu.memory_space<vmem>>, vector<8x8x8xbf16>
    %c0_125 = arith.constant 0 : index
    %c0_126 = arith.constant 0 : index
    %c32_127 = arith.constant 32 : index
    %64 = vector.load %arg10[%c0_125, %c0_126, %c32_127] : memref<8x8x72xbf16, #tpu.memory_space<vmem>>, vector<8x8x8xbf16>
    tpu.vector_store %arg10[%c0_125, %c0_126, %c32_127], %63 {strides = array<i32>} : memref<8x8x72xbf16, #tpu.memory_space<vmem>>, vector<8x8x8xbf16>,
    %c1_128 = arith.constant 1 : index
    %c2_129 = arith.constant 2 : index
    %c0_130 = arith.constant 0 : index
    %65 = vector.load %arg8[%c1_128, %c2_129, %c0_130] : memref<10x10x8xbf16, #tpu.memory_space<vmem>>, vector<8x8x8xbf16>
    %c0_131 = arith.constant 0 : index
    %c0_132 = arith.constant 0 : index
    %c40 = arith.constant 40 : index
    %66 = vector.load %arg10[%c0_131, %c0_132, %c40] : memref<8x8x72xbf16, #tpu.memory_space<vmem>>, vector<8x8x8xbf16>
    tpu.vector_store %arg10[%c0_131, %c0_132, %c40], %65 {strides = array<i32>} : memref<8x8x72xbf16, #tpu.memory_space<vmem>>, vector<8x8x8xbf16>,
    %c2_133 = arith.constant 2 : index
    %c0_134 = arith.constant 0 : index
    %c0_135 = arith.constant 0 : index
    %67 = vector.load %arg8[%c2_133, %c0_134, %c0_135] : memref<10x10x8xbf16, #tpu.memory_space<vmem>>, vector<8x8x8xbf16>
    %c0_136 = arith.constant 0 : index
    %c0_137 = arith.constant 0 : index
    %c48 = arith.constant 48 : index
    %68 = vector.load %arg10[%c0_136, %c0_137, %c48] : memref<8x8x72xbf16, #tpu.memory_space<vmem>>, vector<8x8x8xbf16>
    tpu.vector_store %arg10[%c0_136, %c0_137, %c48], %67 {strides = array<i32>} : memref<8x8x72xbf16, #tpu.memory_space<vmem>>, vector<8x8x8xbf16>,
    %c2_138 = arith.constant 2 : index
    %c1_139 = arith.constant 1 : index
    %c0_140 = arith.constant 0 : index
    %69 = vector.load %arg8[%c2_138, %c1_139, %c0_140] : memref<10x10x8xbf16, #tpu.memory_space<vmem>>, vector<8x8x8xbf16>
    %c0_141 = arith.constant 0 : index
    %c0_142 = arith.constant 0 : index
    %c56 = arith.constant 56 : index
    %70 = vector.load %arg10[%c0_141, %c0_142, %c56] : memref<8x8x72xbf16, #tpu.memory_space<vmem>>, vector<8x8x8xbf16>
    tpu.vector_store %arg10[%c0_141, %c0_142, %c56], %69 {strides = array<i32>} : memref<8x8x72xbf16, #tpu.memory_space<vmem>>, vector<8x8x8xbf16>,
    %c2_143 = arith.constant 2 : index
    %c2_144 = arith.constant 2 : index
    %c0_145 = arith.constant 0 : index
    %71 = vector.load %arg8[%c2_143, %c2_144, %c0_145] : memref<10x10x8xbf16, #tpu.memory_space<vmem>>, vector<8x8x8xbf16>
    %c0_146 = arith.constant 0 : index
    %c0_147 = arith.constant 0 : index
    %c64 = arith.constant 64 : index
    %72 = vector.load %arg10[%c0_146, %c0_147, %c64] : memref<8x8x72xbf16, #tpu.memory_space<vmem>>, vector<8x8x8xbf16>
    tpu.vector_store %arg10[%c0_146, %c0_147, %c64], %71 {strides = array<i32>} : memref<8x8x72xbf16, #tpu.memory_space<vmem>>, vector<8x8x8xbf16>,
    %c0_148 = arith.constant 0 : index
    %c0_149 = arith.constant 0 : index
    %c0_150 = arith.constant 0 : index
    %73 = vector.load %arg10[%c0_148, %c0_149, %c0_150] : memref<8x8x72xbf16, #tpu.memory_space<vmem>>, vector<8x8x72xbf16>
    %74 = vector.shape_cast %73 : vector<8x8x72xbf16> to vector<64x72xbf16>
    %c0_151 = arith.constant 0 : index
    %c0_152 = arith.constant 0 : index
    %75 = vector.load %arg4[%c0_151, %c0_152] : memref<72x8xbf16, #tpu.memory_space<vmem>>, vector<72x8xbf16>
    %cst_153 = arith.constant dense<0.000000e+00> : vector<64x8xf32>
    %76 = tpu.matmul %74, %75, %cst_153 {dimension_numbers = #tpu.dot_dimension_numbers<[1], [0], [0], [1], [0, 0, 1, 1], [], []>} : vector<64x72xbf16>, vector<72x8xbf16>, vector<64x8xf32> -> vector<64x8xf32>
    %c0_154 = arith.constant 0 : index
    %c0_155 = arith.constant 0 : index
    %77 = vector.load %arg5[%c0_154, %c0_155] : memref<1x8xf32, #tpu.memory_space<vmem>>, vector<1x8xf32>
    %78 = vector.broadcast %77 : vector<1x8xf32> to vector<64x8xf32>
    %79 = arith.addf %76, %78 : vector<64x8xf32>
    %cst_156 = arith.constant 0.000000e+00 : f32
    %80 = vector.broadcast %cst_156 : f32 to vector<64x8xf32>
    %81 = arith.maximumf %79, %80 : vector<64x8xf32>
    %c0_157 = arith.constant 0 : index
    %c0_158 = arith.constant 0 : index
    %c0_159 = arith.constant 0 : index
    %82 = vector.load %arg6[%c0_157, %c0_158, %c0_159] : memref<1x64x8xf32, #tpu.memory_space<vmem>>, vector<1x64x8xf32>
    %83 = vector.shape_cast %82 : vector<1x64x8xf32> to vector<64x8xf32>
    %84 = vector.shape_cast %81 : vector<64x8xf32> to vector<1x64x8xf32>
    tpu.vector_store %arg6[%c0_157, %c0_158, %c0_159], %84 {strides = array<i32>} : memref<1x64x8xf32, #tpu.memory_space<vmem>>, vector<1x64x8xf32>,
    return
  }
  func.func @transform_0(%arg0: i32) -> (i32, i32, i32, i32, i32) {
    %c0_i32 = arith.constant 0 : i32
    %c0_i32_0 = arith.constant 0 : i32
    %c0_i32_1 = arith.constant 0 : i32
    %c0_i32_2 = arith.constant 0 : i32
    %c0_i32_3 = arith.constant 0 : i32
    return %arg0, %c0_i32, %c0_i32_0, %c0_i32_1, %c0_i32_2 : i32, i32, i32, i32, i32
  }
  func.func @transform_1(%arg0: i32) -> (i32, i32) {
    %c0_i32 = arith.constant 0 : i32
    %c0_i32_0 = arith.constant 0 : i32
    %c0_i32_1 = arith.constant 0 : i32
    return %c0_i32, %c0_i32_0 : i32, i32
  }
  func.func @transform_2(%arg0: i32) -> (i32, i32) {
    %c0_i32 = arith.constant 0 : i32
    %c0_i32_0 = arith.constant 0 : i32
    %c0_i32_1 = arith.constant 0 : i32
    return %c0_i32, %c0_i32_0 : i32, i32
  }
  func.func @transform_3(%arg0: i32) -> (i32, i32) {
    %c0_i32 = arith.constant 0 : i32
    %c0_i32_0 = arith.constant 0 : i32
    %c0_i32_1 = arith.constant 0 : i32
    return %c0_i32, %c0_i32_0 : i32, i32
  }
  func.func @transform_4(%arg0: i32) -> (i32, i32) {
    %c0_i32 = arith.constant 0 : i32
    %c0_i32_0 = arith.constant 0 : i32
    %c0_i32_1 = arith.constant 0 : i32
    return %c0_i32, %c0_i32_0 : i32, i32
  }
  func.func @transform_5(%arg0: i32) -> (i32, i32, i32) {
    %c0_i32 = arith.constant 0 : i32
    %c0_i32_0 = arith.constant 0 : i32
    %c0_i32_1 = arith.constant 0 : i32
    return %arg0, %c0_i32, %c0_i32_0 : i32, i32, i32
  }
}

</mosaic_0001>

<bundles_post_ra>
// kernel: tpu_custom_call.1
= control target key start
LH: loop header
LB: loop body
LE: loop exit
PB: predicated region body
PF: predicated region fallthrough
CT: control target
= control target key end

     0   :  { %10 = vsyncpa [#allocation7], 0  ;;  %s4344_s0 = inlined_call_operand.hbm [shape: bf16[2,8,2,8,8], index: 0, kind: input, shape index: {}]   ;;  %s4345_s1 = inlined_call_operand.vmem [shape: bf16[36,8], index: 1, kind: input, shape index: {}]   ;;  %s4346_s2 = inlined_call_operand.vmem [shape: f32[1,8], index: 2, kind: input, shape index: {}]   ;;  %s4347_s3 = inlined_call_operand.vmem [shape: bf16[72,8], index: 3, kind: input, shape index: {}]   ;;  %s4348_s4 = inlined_call_operand.vmem [shape: f32[1,8], index: 4, kind: input, shape index: {}]   ;;  %s4349_s5 = inlined_call_operand.vmem [shape: f32[2,64,8], index: 5, kind: output, shape index: {}]  }
   0x1   :  { %12 = vsyncpa [#allocation7 + $0x1], 0  ;;  %s3259_s18 = smov 0   ;;  %s3261_s19 = smov 0  }
   0x2   :  { %s3263_s20 = smov 0   ;;  %s3265_s21 = smov 0  }
   0x3 LB: > { %s3278_s22 = sadd.s32 4294967295, %s3210_s21   ;;  %s3281_s23 = sadd.s32 1, %s3210_s21   ;;  %s3210_s21 = sphi %s3265_s21, %s4372_s21   ;;  %s3206_s20 = sphi %s3263_s20, %s4371_s20   ;;  %s3202_s19 = sphi %s3261_s19, %s4370_s19   ;;  %s3198_s18 = sphi %s3259_s18, %s4369_s18  }
   0x4   : > { %s22_s24 = ssub.s32 %s3210_s21, %s3281_s23  ;;  %s25_s25 = sadd.s32 1, %s3206_s20 }
   0x5   : > { %p23_p0 = scmp.eq.s32.totalorder %s22_s24, 0  ;;  %p32_p1 = scmp.ne.s32.totalorder %s3206_s20, %s3202_s19 }
   0x6   : > { %p33_p2 = scmp.eq.s32.totalorder %s3210_s21, 0  ;;  %p38_p3 = scmp.ne.s32.totalorder %s3202_s19, %s3198_s18 }
   0x7   : > { %s3291_s26 = scalar_select %p23_p0, %s3206_s20, %s25_s25  }
   0x8   : > { %p34_p4 = por %p33_p2, %p32_p1  ;;  %p39_p5 = scmp.eq.s32.totalorder %s3278_s22, 0 }
   0x9   : > { %p3081_p6 = scmp.lt.s32.totalorder %s3210_s21, 2  ;;  %s184_s28 = sand.u32 1, %s3206_s20  }
   0xa   : > { %p3295_p7 = por %p39_p5, %p38_p3  ;;  %s2916_s29 = sshll.u32 %s184_s28, 6 }
   0xb   : > { %s3015_s30 = sshll.u32 %s3210_s21, 10  ;;  %s188_s9 = scalar_lea.vmem [#allocation6], %s2916_s29 }
   0xc   : > { %s3304_s8 = scalar_lea.hbm %s4344_s0, %s3015_s30  ;;  %s195_s10 = sshll.u32 %s188_s9, 4  ;;  %s3306_s10 = int_to_ptr.vmem [resolvable:$true] %s195_s10 }
   0xd   : > { %p3308_p8 = pnand %p3081_p6, %p34_p4  ;;  %s3313_s12 = scalar_lea.sflag [#allocation7], %s184_s28 }
   0xe   : > { %s3146_s13 = scalar_lea.hbm %s3304_s8, 1024  ;;  %s3151_s16 = scalar_lea.hbm %s4344_s0, 2048 }
   0xf   : > { %p3147_p10 = scmp.ne.s32.totalorder %s3304_s8, %s3146_s13  ;;  %p3148_p11 = pneg %p3308_p8 }
  0x10   : > { %p3152_p0 = scmp.lt.u32.totalorder %s3304_s8, %s4344_s0  ;;  %p3153_p1 = scmp.lt.u32.totalorder %s3151_s16, %s3146_s13 }
  0x11   : > { %p3149_p12 = pnand %p3148_p11, %p3147_p10  ;;  %p3155_p3 = scmp.lt.u32.totalorder %s3146_s13, %s3304_s8 }
  0x12   : > { %p3154_p2 = por %p3153_p1, %p3152_p0 }
  0x13   : > { %p3150_p13 = pneg %p3149_p12 }
  0x14   : > { %p3156_p4 = por %p3155_p3, %p3154_p2 }
  0x16   : > { %p3157_p5 = pnand %p3156_p4, %p3150_p13 }
  0x18   : > { %3160 = shalt.err (!%p3157_p5)
}
  0x19   : > { %s3161_s24 = scalar_lea.vmem %s3306_s10, 1024  ;;  %s3212_s25 = smov [#allocation6]  }
  0x1a   : > { %p3162_p6 = scmp.ne.s32.totalorder %s3306_s10, %s3161_s24  ;;  %s3166_s28 = sshll.u32 %s3212_s25, 4  ;;  %s3167_s28 = int_to_ptr.vmem [resolvable:$false] %s3166_s28 }
  0x1b   : > { %s3168_s29 = scalar_lea.vmem %s3167_s28, 2048  ;;  %p3169_p9 = scmp.lt.s32.totalorder %s3306_s10, %s3167_s28 }
  0x1c   : > { %p3164_p10 = pnand %p3162_p6, %p3148_p11  ;;  %p3170_p0 = scmp.lt.s32.totalorder %s3168_s29, %s3161_s24 }
  0x1e   : > { %p3165_p12 = pneg %p3164_p10  ;;  %p3171_p1 = por %p3170_p0, %p3169_p9 }
  0x20   : > { %p3172_p2 = pnand %p3171_p1, %p3165_p12 }
  0x22   : > { %3175 = shalt.err (!%p3172_p2)
}
  0x23   : > { %s3213_s30 = smov 64   ;;  %s3214_s6 = smov 4  }
  0x24   : > { %3080 = dma.hbm_to_vmem [thread:$0]  (!%p3308_p8), %s3304_s8, 1024, %s3306_s10, %s3313_s12, %s3213_s30, %s3213_s30, %s3214_s6  }
  0x25   : > { %p203_p11 = scmp.lt.s32.totalorder %s3210_s21, 3  ;;  %p4352_p13 = scmp.ge.s32.totalorder %s3210_s21, 1 }
  0x27   : > { %p204_p3 = pnand %p4352_p13, %p203_p11 }
  0x28   : > { %s209_s7 = sand.u32 (!%p204_p3), 1, %s3202_s19  }
  0x29   : > { %207 = sbr.rel (%p204_p3) target bundleno = 1110 (0x456), region = 40  ;;  %s2920_s9 = sshll.u32 (!%p204_p3), %s209_s7, 6 }
  0x2a   : > { %s210_s13 = scalar_lea.sflag (!%p204_p3), [#allocation7], %s209_s7  ;;  %s3345_s14 = scalar_lea.vmem (!%p204_p3), [#allocation6], %s2920_s9 }
  0x30   : > { %3193 = dma.done.wait (%p3295_p7), %s210_s13, 1024  }
  0x31   : > { %3195 = vsyncadd (%p3295_p7), %s210_s13, 4294966272  ;;  %vm311_vm0 = vcmask 27648   ;;  %vm313_vm1 = vcmask 24576   ;;  %vm1556_vm2 = vcmask 57344   ;;  %v3215_v0 = vmov 0   ;;  %s3216_s21 = smov 124  }
  0x32   : > { %314 = vst.msk [vmem:[#allocation2 + $0x4] sm:$0x1] %vm313_vm1, %v3215_v0  ;;  %317 = vst.msk [vmem:[#allocation2 + $0x4c] sm:$0x1] %vm313_vm1, %v3215_v0  ;;  %vm319_vm3 = vsmask.f32 256 }
  0x33   : > { %1557 = vst.msk [vmem:[#allocation3 + $0x4] sm:$0x1] %vm1556_vm2, %v3215_v0  ;;  %1560 = vst.msk [vmem:[#allocation3 + $0x4c] sm:$0x1] %vm1556_vm2, %v3215_v0  ;;  %vm351_vm5 = vsmask.f32 7938 }
  0x34   : > { %312 = vst.msk [vmem:[#allocation2] sm:$0xf] %vm311_vm0, %v3215_v0  ;;  %316 = vst.msk [vmem:[#allocation2 + $0x48] sm:$0xf] %vm311_vm0, %v3215_v0  ;;  %v248_v2 = vld [vmem:[%s3345_s14 + $0x10] sm:$0xf] }
  0x35   : > { %vm3364_vm4 = vmand %vm1556_vm2, %vm319_vm3  ;;  %v2925_v3 = vld [vmem:[%s3345_s14 + $0x14] sm:$0xf]  ;;  %v246_v4 = vld [vmem:[%s3345_s14] sm:$0xf]  ;;  %vm726_vm8 = vcmask 1042432   ;;  %vm727_vm9 = vcmask 1046532  }
  0x36   : > { %v3371_v5 = vmax.bf16 %v2925_v3, %v248_v2  ;;  %v2923_v6 = vld [vmem:[%s3345_s14 + $0x4] sm:$0xf]  ;;  %v249_v7 = vld [vmem:[%s3345_s14 + $0x18] sm:$0xf]  ;;  %v2926_v8 = vld [vmem:[%s3345_s14 + $0x1c] sm:$0xf] }
  0x37   : > { %v3376_v9 = vmax.bf16 %v2923_v6, %v246_v4  ;;  %v247_v10 = vld [vmem:[%s3345_s14 + $0x8] sm:$0xf]  ;;  %v2924_v11 = vld [vmem:[%s3345_s14 + $0xc] sm:$0xf]  ;;  %vm3381_vm6 = vmand %vm313_vm1, %vm319_vm3  ;;  %v3387_v13 = vmax.bf16 %v2926_v8, %v249_v7  ;;  %vm546_vm11 = vsmask.f32 3328 }
  0x38   : > { %283 = vrot.lane.b32.xlu1 %v3371_v5, %s3216_s21  ;;  %vm3391_vm7 = vmand %vm313_vm1, %vm351_vm5  ;;  %v3397_v15 = vmax.bf16 %v2924_v11, %v247_v10  ;;  %v250_v16 = vld [vmem:[%s3345_s14 + $0x20] sm:$0xf]  ;;  %v251_v17 = vld [vmem:[%s3345_s14 + $0x28] sm:$0xf]  ;;  %s3217_s27 = smov 24   ;;  %s3218_s8 = smov 8  }
  0x39   : > { %279 = vrot.lane.b32.xlu0 %v3376_v9, %s3216_s21  ;;  %v2928_v18 = vld [vmem:[%s3345_s14 + $0x2c] sm:$0xf]  ;;  %v2927_v19 = vld [vmem:[%s3345_s14 + $0x24] sm:$0xf]  ;;  %v330_v20 = vld [vmem:[#allocation2 + $0x18] sm:$0x1] }
  0x3a   : > { %v362_v21 = vld [vmem:[#allocation2 + $0x1c] sm:$0x1]  ;;  %v253_v22 = vld [vmem:[%s3345_s14 + $0x38] sm:$0xf]  ;;  %v331_v24 = vsel %vm3381_vm6, 0, %v330_v20  ;;  %v3411_v28 = vmax.bf16 %v2928_v18, %v251_v17  ;;  %v3420_v34 = vmax.bf16 %v2927_v19, %v250_v16  ;;  %vm3457_vm10 = vmor %vm726_vm8, %vm727_vm9  ;;  %s3219_s10 = smov 4  }
  0x3b   : > { %v2930_v23 = vld [vmem:[%s3345_s14 + $0x3c] sm:$0xf]  ;;  %v363_v25 = vsel %vm3391_vm7, 0, %v362_v21  ;;  %v324_v26 = vld [vmem:[#allocation2 + $0x8] sm:$0x1]  ;;  %s3220_s11 = smov 28   ;;  %vm3493_vm14 = vmand %vm311_vm0, %vm351_vm5 }
  0x3c   : > { %v356_v27 = vld [vmem:[#allocation2 + $0xc] sm:$0x1]  ;;  %285 = vrot.lane.b32.xlu1 %v3387_v13, %s3216_s21  ;;  %v252_v29 = vld [vmem:[%s3345_s14 + $0x30] sm:$0xf]  ;;  %332 = vst [vmem:[#allocation2 + $0x18] sm:$0x1] %v331_v24  ;;  %v3435_v46 = vmax.bf16 %v2930_v23, %v253_v22 }
  0x3d   : > { %364 = vst [vmem:[#allocation2 + $0x1c] sm:$0x1] %v363_v25  ;;  %v325_v30 = vsel %vm3381_vm6, 0, %v324_v26  ;;  %v357_v31 = vsel %vm3391_vm7, 0, %v356_v27  ;;  %v333_v32 = vld [vmem:[#allocation2 + $0x20] sm:$0x1]  ;;  %281 = vrot.lane.b32.xlu0 %v3397_v15, %s3216_s21 }
  0x3e   : > { %v365_v33 = vld [vmem:[#allocation2 + $0x24] sm:$0x1]  ;;  %326 = vst [vmem:[#allocation2 + $0x8] sm:$0x1] %v325_v30  ;;  %358 = vst [vmem:[#allocation2 + $0xc] sm:$0x1] %v357_v31 }
  0x3f   : > { %v334_v35 = vsel %vm3381_vm6, 0, %v333_v32  ;;  %v366_v36 = vsel %vm3391_vm7, 0, %v365_v33  ;;  %v327_v37 = vld [vmem:[#allocation2 + $0x10] sm:$0x1]  ;;  %v359_v38 = vld [vmem:[#allocation2 + $0x14] sm:$0x1] }
  0x40   : > { %v2929_v39 = vld [vmem:[%s3345_s14 + $0x34] sm:$0xf]  ;;  %335 = vst [vmem:[#allocation2 + $0x20] sm:$0x1] %v334_v35  ;;  %367 = vst [vmem:[#allocation2 + $0x24] sm:$0x1] %v366_v36  ;;  %289 = vrot.lane.b32.xlu1 %v3411_v28, %s3216_s21 }
  0x41   : > { %v328_v40 = vsel %vm3381_vm6, 0, %v327_v37  ;;  %v360_v41 = vsel %vm3391_vm7, 0, %v359_v38  ;;  %v353_v42 = vld [vmem:[#allocation2 + $0x4] sm:$0x1]  ;;  %v336_v44 = vld [vmem:[#allocation2 + $0x28] sm:$0x1]  ;;  %287 = vrot.lane.b32.xlu0 %v3420_v34, %s3216_s21  ;;  %v3443_v50 = vmax.bf16 %v2929_v39, %v252_v29 }
  0x42   : > { %329 = vst [vmem:[#allocation2 + $0x10] sm:$0x1] %v328_v40  ;;  %361 = vst [vmem:[#allocation2 + $0x14] sm:$0x1] %v360_v41  ;;  %v354_v43 = vsel %vm3391_vm7, 0, %v353_v42  ;;  %v337_v47 = vsel %vm3381_vm6, 0, %v336_v44 }
  0x43   : > { %v368_v45 = vld [vmem:[#allocation2 + $0x2c] sm:$0x1]  ;;  %355 = vst [vmem:[#allocation2 + $0x4] sm:$0x1] %v354_v43  ;;  %v348_v49 = vld [vmem:[#allocation2 + $0x48] sm:$0x1] }
  0x44   : > { %v369_v48 = vsel %vm3391_vm7, 0, %v368_v45  ;;  %338 = vst [vmem:[#allocation2 + $0x28] sm:$0x1] %v337_v47  ;;  %v349_v51 = vsel %vm3381_vm6, 0, %v348_v49  ;;  %v321_v52 = vld [vmem:[#allocation2] sm:$0x1]  ;;  %293 = vrot.lane.b32.xlu1 %v3435_v46, %s3216_s21 }
  0x45   : > { %370 = vst [vmem:[#allocation2 + $0x2c] sm:$0x1] %v369_v48  ;;  %350 = vst [vmem:[#allocation2 + $0x48] sm:$0x1] %v349_v51  ;;  %v322_v53 = vsel %vm3381_vm6, 0, %v321_v52  ;;  %291 = vrot.lane.b32.xlu0 %v3443_v50, %s3216_s21  ;;  %s3221_s12 = smov 12  }
  0x46   : > { %v339_v54 = vld [vmem:[#allocation2 + $0x30] sm:$0x1]  ;;  %v694_v55 = vld [vmem:[#allocation2] sm:$0xe]  ;;  %323 = vst [vmem:[#allocation2] sm:$0x1] %v322_v53 }
  0x47   : > { %v340_v56 = vsel %vm3381_vm6, 0, %v339_v54  ;;  %v371_v57 = vld [vmem:[#allocation2 + $0x34] sm:$0x1]  ;;  %v2931_v59 = vrot.slane %v694_v55, 9  ;;  %v380_v60 = vld [vmem:[#allocation2 + $0x4c] sm:$0x1] }
  0x48   : > { %341 = vst [vmem:[#allocation2 + $0x30] sm:$0x1] %v340_v56  ;;  %v372_v58 = vsel %vm3391_vm7, 0, %v371_v57  ;;  %v381_v63 = vsel %vm3391_vm7, 0, %v380_v60  ;;  %v345_v7 = vld [vmem:[#allocation2 + $0x40] sm:$0x1] }
  0x49   : > { %373 = vst [vmem:[#allocation2 + $0x34] sm:$0x1] %v372_v58  ;;  %382 = vst [vmem:[#allocation2 + $0x4c] sm:$0x1] %v381_v63  ;;  %vm547_vm12 = vsmask.f32 7440 }
  0x4a   : > { %v695_v61 = vld [vmem:[#allocation2 + $0x4] sm:$0x1]  ;;  %v346_v20 = vsel %vm3381_vm6, 0, %v345_v7  ;;  %v342_v24 = vld [vmem:[#allocation2 + $0x38] sm:$0x1]  ;;  %vm3477_vm13 = vmor %vm546_vm11, %vm547_vm12  ;;  %vm685_vm15 = vcmask 60448  }
  0x4b   : > { %v731_v2 = vrot.slane %v695_v61, 5  ;;  %v531_v3 = vld [vmem:[#allocation2 + $0x4] sm:$0x1]  ;;  %347 = vst [vmem:[#allocation2 + $0x40] sm:$0x1] %v346_v20  ;;  %v343_v29 = vsel %vm3381_vm6, 0, %v342_v24 }
  0x4c   : > { %v1109_v4 = vld [vmem:[#allocation2 + $0x48] sm:$0xf]  ;;  %v559_v19 = vshll.u32 %v531_v3, 16  ;;  %v377_v23 = vld [vmem:[#allocation2 + $0x44] sm:$0x1]  ;;  %vm785_vm1 = vcmask 93248  }
  0x4d   : > { %v1165_v6 = vld [vmem:[#allocation2 + $0x48] sm:$0xf]  ;;  %v732_v8 = vsel %vm3457_vm10, %v2931_v59, %v731_v2  ;;  %1132 = vrot.lane.b32.xlu1 %v1109_v4, %s3217_s27  ;;  %v530_v10 = vld [vmem:[#allocation2] sm:$0xf]  ;;  %v378_v27 = vsel %vm3391_vm7, 0, %v377_v23  ;;  %s3222_s15 = smov 20  }
  0x4e   : > { %v1266_v11 = vshrl.u32 %v1165_v6, 16  ;;  %v1269_v16 = vshll.u32 %v1165_v6, 16  ;;  %761 = vrot.lane.b32.xlu0 %v732_v8, %s3218_s8  ;;  %v550_v17 = vshrl.u32 %v530_v10, 16  ;;  %v553_v18 = vshll.u32 %v530_v10, 16  ;;  %379 = vst [vmem:[#allocation2 + $0x44] sm:$0x1] %v378_v27 }
  0x4f   : > { %344 = vst [vmem:[#allocation2 + $0x38] sm:$0x1] %v343_v29  ;;  %v374_v31 = vld [vmem:[#allocation2 + $0x3c] sm:$0x1]  ;;  %v561_v33 = vrot.slane %v559_v19, 5  ;;  %s3223_s16 = smov 32  }
  0x50   : > { %v1268_v21 = vrot.slane %v1266_v11, 4  ;;  %v1271_v22 = vrot.slane %v1269_v16, 5  ;;  %v552_v25 = vrot.slane %v550_v17, 4  ;;  %v555_v26 = vrot.slane %v553_v18, 5  ;;  %v1166_v35 = vld [vmem:[#allocation2 + $0x4c] sm:$0x1] }
  0x51   : > { %v375_v36 = vsel %vm3391_vm7, 0, %v374_v31  ;;  %v1275_v39 = vshll.u32 %v1166_v35, 16  ;;  %v514_v43 = vld [vmem:[#allocation2] sm:$0xf]  ;;  %v478_v54 = vld [vmem:[#allocation2 + $0x18] sm:$0xf] }
  0x52   : > { %v1272_v30 = vor.u32 %v1271_v22, %v1268_v21  ;;  %v556_v32 = vor.u32 %v555_v26, %v552_v25  ;;  %376 = vst [vmem:[#allocation2 + $0x3c] sm:$0x1] %v375_v36  ;;  %522 = vst.msk [vmem:[#allocation4] sm:$0xf] %vm311_vm0, %v514_v43  ;;  %v481_v59 = vld [vmem:[#allocation2 + $0x1c] sm:$0x1] }
  0x53   : > { %v1277_v41 = vrot.slane %v1275_v39, 5  ;;  %v469_v3 = vld [vmem:[#allocation2 + $0xc] sm:$0x1]  ;;  %v484_v18 = vld [vmem:[#allocation2 + $0x20] sm:$0xf]  ;;  %s3224_s17 = smov 16  }
  0x54   : > { %v1273_v38 = vrot.slane %v1272_v30, 4  ;;  %v557_v40 = vrot.slane %v556_v32, 4  ;;  %v487_v23 = vld [vmem:[#allocation2 + $0x24] sm:$0x1]  ;;  %v472_v24 = vld [vmem:[#allocation2 + $0x10] sm:$0xf] }
  0x55   : > { %v475_v30 = vld [vmem:[#allocation2 + $0x14] sm:$0x1]  ;;  %vm834_vm3 = vcmask 126048   ;;  %vm1092_vm7 = vcmask 191648   ;;  %vm1142_vm8 = vcmask 224448   ;;  %vm1303_vm9 = vcmask 257248  }
  0x56   : > { %v562_v42 = vsel %vm3477_vm13, %v557_v40, %v561_v33  ;;  %v1278_v14 = vsel %vm3477_vm13, %v1273_v38, %v1277_v41  ;;  %v490_v41 = vld [vmem:[#allocation2 + $0x28] sm:$0xf]  ;;  %vm1400_vm11 = vcmask 290048   ;;  %vm1464_vm12 = vcmask 293888   ;;  %s3225_s6 = smov 48   ;;  %s3226_s7 = smov 56  }
  0x57   : > { %661 = vrot.lane.b32.xlu0 %v562_v42, %s3219_s10  ;;  %1293 = vrot.lane.b32.xlu1 %v1278_v14, %s3220_s11  ;;  %s3227_s14 = smov 40   ;;  %s3228_s21 = smov 64  }
  0x58   : > { %p240_p7 = scmp.lt.s32.totalorder %s3278_s22, 1 }
  0x5a   : > { %s4374_s22 = smov (!%p240_p7, %s3278_s22), 1 }
  0xaa   : > { %v284_v44 = vpop.permute.xlu1 %283 }
  0xab   : > { %v305_v45 = vmax.bf16 %v284_v44, %v3371_v5  ;;  %v280_v47 = vpop.permute.xlu0 %279  ;;  %v466_v5 = vld [vmem:[#allocation2 + $0x8] sm:$0xf] }
  0xac   : > { %v303_v48 = vmax.bf16 %v280_v47, %v3376_v9  ;;  %v496_v47 = vld [vmem:[#allocation2 + $0x30] sm:$0xf] }
  0xad   : > { %v400_v49 = vshrl.u32 %v305_v45, 16  ;;  %v403_v51 = vshll.u32 %v305_v45, 16 }
  0xae   : > { %v384_v52 = vshrl.u32 %v303_v48, 16  ;;  %v286_v53 = vpop.permute.xlu1 %285  ;;  %v387_v61 = vshll.u32 %v303_v48, 16  ;;  %v499_v48 = vld [vmem:[#allocation2 + $0x34] sm:$0x1] }
  0xaf   : > { %v402_v55 = vrot.slane %v400_v49, 7  ;;  %v306_v56 = vmax.bf16 %v286_v53, %v3387_v13  ;;  %v282_v57 = vpop.permute.xlu0 %281 }
  0xb0   : > { %v386_v60 = vrot.slane %v384_v52, 7  ;;  %v304_v9 = vmax.bf16 %v282_v57, %v3397_v15 }
  0xb1   : > { %v405_v63 = vor.u32 %v403_v51, %v402_v55  ;;  %v406_v2 = vrot.slane %v402_v55, 4  ;;  %v408_v4 = vshrl.u32 %v306_v56, 16  ;;  %v411_v6 = vshll.u32 %v306_v56, 16  ;;  %v493_v51 = vld [vmem:[#allocation2 + $0x2c] sm:$0x1] }
  0xb2   : > { %v389_v7 = vor.u32 %v387_v61, %v386_v60  ;;  %v390_v13 = vrot.slane %v386_v60, 4  ;;  %v392_v8 = vshrl.u32 %v304_v9, 16  ;;  %v395_v10 = vshll.u32 %v304_v9, 16  ;;  %v290_v11 = vpop.permute.xlu1 %289  ;;  %v508_v61 = vld [vmem:[#allocation2 + $0x40] sm:$0xf] }
  0xb3   : > { %v479_v16 = vsel %vm3493_vm14, %v405_v63, %v478_v54  ;;  %v482_v17 = vsel %vm3381_vm6, %v406_v2, %v481_v59  ;;  %v410_v19 = vrot.slane %v408_v4, 7  ;;  %v288_v20 = vpop.permute.xlu0 %287  ;;  %v308_v15 = vmax.bf16 %v290_v11, %v3411_v28 }
  0xb4   : > { %480 = vst [vmem:[#allocation2 + $0x18] sm:$0xf] %v479_v16  ;;  %483 = vst [vmem:[#allocation2 + $0x1c] sm:$0x1] %v482_v17  ;;  %v467_v21 = vsel %vm3493_vm14, %v389_v7, %v466_v5  ;;  %v470_v22 = vsel %vm3381_vm6, %v390_v13, %v469_v3  ;;  %v394_v25 = vrot.slane %v392_v8, 7  ;;  %v307_v26 = vmax.bf16 %v288_v20, %v3420_v34 }
  0xb5   : > { %468 = vst [vmem:[#allocation2 + $0x8] sm:$0xf] %v467_v21  ;;  %471 = vst [vmem:[#allocation2 + $0xc] sm:$0x1] %v470_v22  ;;  %v413_v27 = vor.u32 %v411_v6, %v410_v19  ;;  %v414_v29 = vrot.slane %v410_v19, 4  ;;  %v424_v31 = vshrl.u32 %v308_v15, 16 }
  0xb6   : > { %v427_v28 = vshll.u32 %v308_v15, 16  ;;  %v397_v32 = vor.u32 %v395_v10, %v394_v25  ;;  %v398_v33 = vrot.slane %v394_v25, 4  ;;  %v416_v35 = vshrl.u32 %v307_v26, 16  ;;  %v294_v38 = vpop.permute.xlu1 %293  ;;  %v511_v3 = vld [vmem:[#allocation2 + $0x44] sm:$0x1] }
  0xb7   : > { %v419_v36 = vshll.u32 %v307_v26, 16  ;;  %v485_v39 = vsel %vm3493_vm14, %v413_v27, %v484_v18  ;;  %v488_v40 = vsel %vm3381_vm6, %v414_v29, %v487_v23  ;;  %v426_v34 = vrot.slane %v424_v31, 7  ;;  %v292_v14 = vpop.permute.xlu0 %291  ;;  %v502_v13 = vld [vmem:[#allocation2 + $0x38] sm:$0xf]  ;;  %v505_v8 = vld [vmem:[#allocation2 + $0x3c] sm:$0x1] }
  0xb8   : > { %v310_v42 = vmax.bf16 %v294_v38, %v3435_v46  ;;  %486 = vst [vmem:[#allocation2 + $0x20] sm:$0xf] %v485_v39  ;;  %489 = vst [vmem:[#allocation2 + $0x24] sm:$0x1] %v488_v40  ;;  %v473_v43 = vsel %vm3493_vm14, %v397_v32, %v472_v24  ;;  %v476_v44 = vsel %vm3381_vm6, %v398_v33, %v475_v30  ;;  %v418_v45 = vrot.slane %v416_v35, 7 }
  0xb9   : > { %v309_v49 = vmax.bf16 %v292_v14, %v3443_v50  ;;  %474 = vst [vmem:[#allocation2 + $0x10] sm:$0xf] %v473_v43  ;;  %477 = vst [vmem:[#allocation2 + $0x14] sm:$0x1] %v476_v44  ;;  %v429_v52 = vor.u32 %v427_v28, %v426_v34  ;;  %v430_v53 = vrot.slane %v426_v34, 4 }
  0xba   : > { %v440_v46 = vshrl.u32 %v310_v42, 16  ;;  %v443_v54 = vshll.u32 %v310_v42, 16  ;;  %v421_v55 = vor.u32 %v419_v36, %v418_v45  ;;  %v422_v56 = vrot.slane %v418_v45, 4 }
  0xbb   : > { %v432_v57 = vshrl.u32 %v309_v49, 16  ;;  %v435_v59 = vshll.u32 %v309_v49, 16  ;;  %v497_v5 = vsel %vm3493_vm14, %v429_v52, %v496_v47  ;;  %v500_v60 = vsel %vm3381_vm6, %v430_v53, %v499_v48  ;;  %v796_v20 = vld [vmem:[#allocation2 + $0x18] sm:$0xf]  ;;  %v701_v40 = vld [vmem:[#allocation2 + $0x1c] sm:$0x1] }
  0xbc   : > { %v442_v9 = vrot.slane %v440_v46, 7  ;;  %v491_v50 = vsel %vm3493_vm14, %v421_v55, %v490_v41  ;;  %v494_v63 = vsel %vm3381_vm6, %v422_v56, %v493_v51  ;;  %498 = vst [vmem:[#allocation2 + $0x30] sm:$0xf] %v497_v5  ;;  %501 = vst [vmem:[#allocation2 + $0x34] sm:$0x1] %v500_v60  ;;  %v743_v47 = vrot.slane %v701_v40, 5 }
  0xbd   : > { %v794_v2 = vld [vmem:[#allocation2 + $0x8] sm:$0xf]  ;;  %v434_v4 = vrot.slane %v432_v57, 7  ;;  %492 = vst [vmem:[#allocation2 + $0x28] sm:$0xf] %v491_v50 }
  0xbe   : > { %495 = vst [vmem:[#allocation2 + $0x2c] sm:$0x1] %v494_v63  ;;  %810 = vrot.lane.b32.xlu0 %v794_v2, %s3221_s12  ;;  %v445_v6 = vor.u32 %v443_v54, %v442_v9  ;;  %v446_v7 = vrot.slane %v442_v9, 4  ;;  %v1103_v24 = vld [vmem:[#allocation2 + $0x18] sm:$0xf] }
  0xbf   : > { %v437_v10 = vor.u32 %v435_v59, %v434_v4  ;;  %v438_v11 = vrot.slane %v434_v4, 4  ;;  %v797_v23 = vld [vmem:[#allocation2 + $0x20] sm:$0xf]  ;;  %v696_v30 = vld [vmem:[#allocation2 + $0x8] sm:$0xe] }
  0xc0   : > { %v509_v16 = vsel %vm3493_vm14, %v445_v6, %v508_v61  ;;  %v512_v17 = vsel %vm3381_vm6, %v446_v7, %v511_v3  ;;  %v795_v15 = vld [vmem:[#allocation2 + $0x10] sm:$0xf]  ;;  %v762_v21 = vpop.permute.xlu0 %761  ;;  %v1104_v12 = vld [vmem:[#allocation2 + $0x20] sm:$0xf]  ;;  %v697_v32 = vld [vmem:[#allocation2 + $0xc] sm:$0x1] }
  0xc1   : > { %510 = vst [vmem:[#allocation2 + $0x40] sm:$0xf] %v509_v16  ;;  %513 = vst [vmem:[#allocation2 + $0x44] sm:$0x1] %v512_v17  ;;  %v503_v18 = vsel %vm3493_vm14, %v437_v10, %v502_v13  ;;  %v506_v19 = vsel %vm3381_vm6, %v438_v11, %v505_v8  ;;  %812 = vrot.lane.b32.xlu1 %v795_v15, %s3221_s12  ;;  %v1102_v22 = vld [vmem:[#allocation2 + $0x10] sm:$0xf] }
  0xc2   : > { %504 = vst [vmem:[#allocation2 + $0x38] sm:$0xf] %v503_v18  ;;  %507 = vst [vmem:[#allocation2 + $0x3c] sm:$0x1] %v506_v19  ;;  %814 = vrot.lane.b32.xlu0 %v796_v20, %s3221_s12  ;;  %v698_v33 = vld [vmem:[#allocation2 + $0x10] sm:$0xe] }
  0xc3   : > { %v799_v29 = vld [vmem:[#allocation2 + $0x30] sm:$0xf]  ;;  %v699_v35 = vld [vmem:[#allocation2 + $0x14] sm:$0x1]  ;;  %v2932_v36 = vrot.slane %v696_v30, 9  ;;  %v735_v38 = vrot.slane %v697_v32, 5  ;;  %vm3893_vm14 = vmand %vm1556_vm2, %vm351_vm5 }
  0xc4   : > { %v1105_v25 = vld [vmem:[#allocation2 + $0x28] sm:$0xf]  ;;  %v1106_v28 = vld [vmem:[#allocation2 + $0x30] sm:$0xf]  ;;  %v700_v39 = vld [vmem:[#allocation2 + $0x18] sm:$0xe] }
  0xc5   : > { %816 = vrot.lane.b32.xlu1 %v797_v23, %s3221_s12  ;;  %v798_v26 = vld [vmem:[#allocation2 + $0x28] sm:$0xf]  ;;  %v2933_v42 = vrot.slane %v698_v33, 9  ;;  %v739_v14 = vrot.slane %v699_v35, 5  ;;  %v1005_v44 = vld [vmem:[#allocation2 + $0xc] sm:$0x1]  ;;  %v736_v48 = vsel %vm3457_vm10, %v2932_v36, %v735_v38 }
  0xc6   : > { %1118 = vrot.lane.b32.xlu0 %v1102_v22, %s3217_s27  ;;  %v1004_v43 = vld [vmem:[#allocation2 + $0x8] sm:$0xe]  ;;  %v2934_v45 = vrot.slane %v700_v39, 9  ;;  %v1038_v52 = vrot.slane %v1005_v44, 5  ;;  %v1006_v53 = vld [vmem:[#allocation2 + $0x10] sm:$0xe] }
  0xc7   : > { %v740_v49 = vsel %vm3457_vm10, %v2933_v42, %v739_v14  ;;  %v2939_v51 = vrot.slane %v1004_v43, 9  ;;  %v1007_v46 = vld [vmem:[#allocation2 + $0x14] sm:$0x1]  ;;  %v1008_v54 = vld [vmem:[#allocation2 + $0x18] sm:$0xe]  ;;  %v2940_v56 = vrot.slane %v1006_v53, 9 }
  0xc8   : > { %v801_v31 = vld [vmem:[#allocation2 + $0x40] sm:$0xf]  ;;  %v1009_v55 = vld [vmem:[#allocation2 + $0x1c] sm:$0x1]  ;;  %v1042_v57 = vrot.slane %v1007_v46, 5  ;;  %v744_v60 = vsel %vm3457_vm10, %v2934_v45, %v743_v47  ;;  %v2941_v9 = vrot.slane %v1008_v54, 9 }
  0xc9   : > { %v662_v58 = vpop.permute.xlu0 %661  ;;  %1120 = vrot.lane.b32.xlu1 %v1103_v24, %s3217_s27  ;;  %v800_v27 = vld [vmem:[#allocation2 + $0x38] sm:$0xf]  ;;  %v1108_v34 = vld [vmem:[#allocation2 + $0x40] sm:$0xf]  ;;  %v1011_v5 = vld [vmem:[#allocation2 + $0x24] sm:$0x1]  ;;  %v1039_v61 = vsel %vm3457_vm10, %v2939_v51, %v1038_v52 }
  0xca   : > { %686 = vst.msk [vmem:[#allocation4] sm:$0xf] %vm685_vm15, %v662_v58  ;;  %1122 = vrot.lane.b32.xlu0 %v1104_v12, %s3217_s27  ;;  %v1107_v41 = vld [vmem:[#allocation2 + $0x38] sm:$0xf]  ;;  %v1010_v59 = vld [vmem:[#allocation2 + $0x20] sm:$0xe]  ;;  %v1043_v10 = vsel %vm3457_vm10, %v2940_v56, %v1042_v57 }
  0xcb   : > { %786 = vst.msk [vmem:[#allocation4] sm:$0xf] %vm785_vm1, %v762_v21  ;;  %v1046_v50 = vrot.slane %v1009_v55, 5  ;;  %v1312_v63 = vld [vmem:[#allocation2 + $0x10] sm:$0xe]  ;;  %v2942_v3 = vrot.slane %v1010_v59, 9 }
  0xcc   : > { %v1313_v2 = vld [vmem:[#allocation2 + $0x14] sm:$0x1]  ;;  %v1050_v4 = vrot.slane %v1011_v5, 5  ;;  %v2947_v6 = vrot.slane %v1312_v63, 9  ;;  %v1314_v13 = vld [vmem:[#allocation2 + $0x18] sm:$0xe] }
  0xcd   : > { %1124 = vrot.lane.b32.xlu1 %v1105_v25, %s3217_s27  ;;  %v1346_v7 = vrot.slane %v1313_v2, 5  ;;  %v1315_v8 = vld [vmem:[#allocation2 + $0x1c] sm:$0x1]  ;;  %v1047_v11 = vsel %vm3457_vm10, %v2941_v9, %v1046_v50  ;;  %v1316_v16 = vld [vmem:[#allocation2 + $0x20] sm:$0xe]  ;;  %v2948_v15 = vrot.slane %v1314_v13, 9 }
  0xce   : > { %818 = vrot.lane.b32.xlu0 %v798_v26, %s3221_s12  ;;  %v1317_v17 = vld [vmem:[#allocation2 + $0x24] sm:$0x1]  ;;  %v1318_v18 = vld [vmem:[#allocation2 + $0x28] sm:$0xe]  ;;  %v1319_v19 = vld [vmem:[#allocation2 + $0x2c] sm:$0x1]  ;;  %v1051_v24 = vsel %vm3457_vm10, %v2942_v3, %v1050_v4 }
  0xcf   : > { %v702_v20 = vld [vmem:[#allocation2 + $0x20] sm:$0xe]  ;;  %v1350_v21 = vrot.slane %v1315_v8, 5  ;;  %v2949_v22 = vrot.slane %v1316_v16, 9  ;;  %v1354_v23 = vrot.slane %v1317_v17, 5  ;;  %v2950_v58 = vrot.slane %v1318_v18, 9 }
  0xd0   : > { %v703_v12 = vld [vmem:[#allocation2 + $0x24] sm:$0x1]  ;;  %v1347_v25 = vsel %vm3457_vm10, %v2947_v6, %v1346_v7  ;;  %v1358_v26 = vrot.slane %v1319_v19, 5  ;;  %v705_v30 = vld [vmem:[#allocation2 + $0x2c] sm:$0x1]  ;;  %vm995_vm6 = vcmask 158848  }
  0xd1   : > { %820 = vrot.lane.b32.xlu1 %v799_v29, %s3221_s12  ;;  %v704_v29 = vld [vmem:[#allocation2 + $0x28] sm:$0xe]  ;;  %v1013_v33 = vld [vmem:[#allocation2 + $0x2c] sm:$0x1]  ;;  %v708_v35 = vld [vmem:[#allocation2 + $0x38] sm:$0xe]  ;;  %v1351_v38 = vsel %vm3457_vm10, %v2948_v15, %v1350_v21  ;;  %v1355_v39 = vsel %vm3457_vm10, %v2949_v22, %v1354_v23 }
  0xd2   : > { %822 = vrot.lane.b32.xlu0 %v800_v27, %s3221_s12  ;;  %v2935_v27 = vrot.slane %v702_v20, 9  ;;  %v1012_v32 = vld [vmem:[#allocation2 + $0x28] sm:$0xe]  ;;  %v534_v36 = vld [vmem:[#allocation2 + $0x10] sm:$0xf]  ;;  %v747_v40 = vrot.slane %v703_v12, 5  ;;  %v1359_v59 = vsel %vm3457_vm10, %v2950_v58, %v1358_v26 }
  0xd3   : > { %v3579_v42 = vld [vmem:[#allocation2 + $0x38] sm:$0xe]  ;;  %v751_v14 = vrot.slane %v705_v30, 5  ;;  %v2943_v45 = vrot.slane %v1012_v32, 9  ;;  %v1054_v47 = vrot.slane %v1013_v33, 5  ;;  %v581_v51 = vshll.u32 %v534_v36, 16 }
  0xd4   : > { %v3583_v53 = vld [vmem:[#allocation2 + $0x3c] sm:$0x1]  ;;  %v2945_v46 = vrot.slane %v3579_v42, 9  ;;  %v843_v54 = vld [vmem:[#allocation2 + $0x8] sm:$0xf]  ;;  %v748_v5 = vsel %vm3457_vm10, %v2935_v27, %v747_v40 }
  0xd5   : > { %824 = vrot.lane.b32.xlu1 %v801_v31, %s3221_s12  ;;  %v706_v31 = vld [vmem:[#allocation2 + $0x30] sm:$0xe]  ;;  %v3588_v56 = vld [vmem:[#allocation2 + $0x34] sm:$0x1]  ;;  %v3600_v9 = vld [vmem:[#allocation2 + $0x44] sm:$0x1]  ;;  %v1055_v15 = vsel %vm3457_vm10, %v2943_v45, %v1054_v47 }
  0xd6   : > { %1126 = vrot.lane.b32.xlu0 %v1106_v28, %s3217_s27  ;;  %v707_v28 = vld [vmem:[#allocation2 + $0x34] sm:$0x1]  ;;  %v2937_v43 = vrot.slane %v706_v31, 9  ;;  %v3586_v55 = vld [vmem:[#allocation2 + $0x30] sm:$0xe]  ;;  %v1062_v50 = vrot.slane %v3583_v53, 5 }
  0xd7   : > { %v755_v44 = vrot.slane %v707_v28, 5  ;;  %v3590_v57 = vld [vmem:[#allocation2 + $0x30] sm:$0xe]  ;;  %v535_v63 = vld [vmem:[#allocation2 + $0x14] sm:$0x1]  ;;  %v583_v3 = vrot.slane %v581_v51, 5 }
  0xd8   : > { %v860_v4 = vshrl.u32 %v843_v54, 16  ;;  %v2944_v6 = vrot.slane %v3586_v55, 9  ;;  %v1058_v7 = vrot.slane %v3588_v56, 5  ;;  %v2951_v13 = vrot.slane %v3590_v57, 9  ;;  %v844_v8 = vld [vmem:[#allocation2 + $0xc] sm:$0x1] }
  0xd9   : > { %1128 = vrot.lane.b32.xlu1 %v1107_v41, %s3217_s27  ;;  %v2936_v41 = vrot.slane %v704_v29, 9  ;;  %v532_v18 = vld [vmem:[#allocation2 + $0x8] sm:$0xf]  ;;  %v847_v19 = vld [vmem:[#allocation2 + $0x18] sm:$0xf]  ;;  %v756_v20 = vsel %vm3457_vm10, %v2937_v43, %v755_v44  ;;  %v1066_v21 = vrot.slane %v3600_v9, 5 }
  0xda   : > { %1130 = vrot.lane.b32.xlu0 %v1108_v34, %s3217_s27  ;;  %v709_v34 = vld [vmem:[#allocation2 + $0x3c] sm:$0x1]  ;;  %v587_v22 = vshll.u32 %v535_v63, 16  ;;  %v536_v23 = vld [vmem:[#allocation2 + $0x18] sm:$0xf]  ;;  %v862_v27 = vrot.slane %v860_v4, 4  ;;  %v1059_v4 = vsel %vm3457_vm10, %v2944_v6, %v1058_v7 }
  0xdb   : > { %v759_v52 = vrot.slane %v709_v34, 5  ;;  %v1151_v58 = vld [vmem:[#allocation2 + $0x10] sm:$0xf]  ;;  %v1323_v26 = vld [vmem:[#allocation2 + $0x3c] sm:$0x1]  ;;  %v869_v29 = vshll.u32 %v844_v8, 16 }
  0xdc   : > { %v564_v31 = vshrl.u32 %v532_v18, 16  ;;  %v567_v28 = vshll.u32 %v532_v18, 16  ;;  %v888_v32 = vshrl.u32 %v847_v19, 16  ;;  %v845_v33 = vld [vmem:[#allocation2 + $0x10] sm:$0xf]  ;;  %v3621_v40 = vrot.slane %v587_v22, 5 }
  0xdd   : > { %763 = vrot.lane.b32.xlu1 %v736_v48, %s3218_s8  ;;  %v2938_v48 = vrot.slane %v708_v35, 9  ;;  %v891_v35 = vshll.u32 %v847_v19, 16  ;;  %v1366_v34 = vrot.slane %v1323_v26, 5  ;;  %v1171_v43 = vshll.u32 %v1151_v58, 16  ;;  %v516_v18 = vld [vmem:[#allocation2 + $0x10] sm:$0xf] }
  0xde   : > { %765 = vrot.lane.b32.xlu0 %v740_v49, %s3218_s8  ;;  %v578_v49 = vshrl.u32 %v534_v36, 16  ;;  %v592_v36 = vshrl.u32 %v536_v23, 16  ;;  %v3629_v45 = vrot.slane %v869_v29, 5  ;;  %v874_v47 = vshrl.u32 %v845_v33, 16  ;;  %524 = vst.msk [vmem:[#allocation4 + $0x8] sm:$0xf] %vm311_vm0, %v516_v18 }
  0xdf   : > { %v760_v12 = vsel %vm3457_vm10, %v2938_v48, %v759_v52  ;;  %v877_v48 = vshll.u32 %v845_v33, 16  ;;  %v566_v52 = vrot.slane %v564_v31, 4  ;;  %v569_v53 = vrot.slane %v567_v28, 5  ;;  %v515_v42 = vld [vmem:[#allocation2 + $0x8] sm:$0xf] }
  0xe0   : > { %v580_v2 = vrot.slane %v578_v49, 4  ;;  %v1155_v49 = vld [vmem:[#allocation2 + $0x20] sm:$0xf]  ;;  %v890_v55 = vrot.slane %v888_v32, 4  ;;  %v893_v56 = vrot.slane %v891_v35, 5  ;;  %v1173_v8 = vrot.slane %v1171_v43, 5 }
  0xe1   : > { %767 = vrot.lane.b32.xlu1 %v744_v60, %s3218_s8  ;;  %v3596_v60 = vld [vmem:[#allocation2 + $0x34] sm:$0x1]  ;;  %v1199_v22 = vshll.u32 %v1155_v49, 16  ;;  %523 = vst.msk [vmem:[#allocation4 + $0x4] sm:$0xf] %vm311_vm0, %v515_v42 }
  0xe2   : > { %1068 = vrot.lane.b32.xlu0 %v1039_v61, %s3222_s15  ;;  %v3598_v61 = vld [vmem:[#allocation2 + $0x40] sm:$0xe]  ;;  %v1362_v16 = vrot.slane %v3596_v60, 5  ;;  %v1152_v26 = vld [vmem:[#allocation2 + $0x14] sm:$0x1] }
  0xe3   : > { %v2946_v17 = vrot.slane %v3598_v61, 9  ;;  %v518_v60 = vld [vmem:[#allocation2 + $0x20] sm:$0xf]  ;;  %v520_v61 = vld [vmem:[#allocation2 + $0x30] sm:$0xf] }
  0xe4   : > { %526 = vst.msk [vmem:[#allocation4 + $0x10] sm:$0xf] %vm311_vm0, %v518_v60  ;;  %528 = vst.msk [vmem:[#allocation4 + $0x18] sm:$0xf] %vm311_vm0, %v520_v61  ;;  %v519_v28 = vld [vmem:[#allocation2 + $0x28] sm:$0xf] }
  0xe5   : > { %1070 = vrot.lane.b32.xlu1 %v1043_v10, %s3222_s15  ;;  %v863_v10 = vshll.u32 %v843_v54, 16  ;;  %v848_v54 = vld [vmem:[#allocation2 + $0x1c] sm:$0x1]  ;;  %v521_v32 = vld [vmem:[#allocation2 + $0x38] sm:$0xf] }
  0xe6   : > { %1072 = vrot.lane.b32.xlu0 %v1047_v11, %s3222_s15  ;;  %v752_v11 = vsel %vm3457_vm10, %v2936_v41, %v751_v14  ;;  %v3623_v14 = vld [vmem:[#allocation2 + $0xc] sm:$0x1]  ;;  %v897_v6 = vshll.u32 %v848_v54, 16  ;;  %527 = vst.msk [vmem:[#allocation4 + $0x14] sm:$0xf] %vm311_vm0, %v519_v28 }
  0xe7   : > { %v865_v30 = vrot.slane %v863_v10, 5  ;;  %v1196_v10 = vshrl.u32 %v1155_v49, 16  ;;  %v573_v19 = vshll.u32 %v3623_v14, 16  ;;  %529 = vst.msk [vmem:[#allocation4 + $0x1c] sm:$0xf] %vm311_vm0, %v521_v32 }
  0xe8   : > { %v538_v43 = vld [vmem:[#allocation2 + $0x20] sm:$0xf]  ;;  %v543_v60 = vld [vmem:[#allocation2 + $0x34] sm:$0x1]  ;;  %v855_v32 = vld [vmem:[#allocation2 + $0x38] sm:$0xf] }
  0xe9   : > { %1074 = vrot.lane.b32.xlu1 %v1051_v24, %s3222_s15  ;;  %v584_v24 = vor.u32 %v583_v3, %v580_v2  ;;  %v866_v51 = vor.u32 %v865_v30, %v862_v27  ;;  %v1063_v3 = vsel %vm3457_vm10, %v2945_v46, %v1062_v50  ;;  %v570_v50 = vor.u32 %v569_v53, %v566_v52  ;;  %v846_v27 = vld [vmem:[#allocation2 + $0x14] sm:$0x1]  ;;  %v1156_v30 = vld [vmem:[#allocation2 + $0x24] sm:$0x1] }
  0xea   : > { %1376 = vrot.lane.b32.xlu0 %v1347_v25, %s3223_s16  ;;  %v1322_v25 = vld [vmem:[#allocation2 + $0x38] sm:$0xe]  ;;  %v575_v35 = vrot.slane %v573_v19, 5  ;;  %v883_v14 = vshll.u32 %v846_v27, 16 }
  0xeb   : > { %v2952_v41 = vrot.slane %v1322_v25, 9  ;;  %v3627_v44 = vrot.slane %v584_v24, 4  ;;  %v3641_v46 = vrot.slane %v866_v51, 4  ;;  %v894_v25 = vor.u32 %v893_v56, %v890_v55  ;;  %v1153_v51 = vld [vmem:[#allocation2 + $0x18] sm:$0xf] }
  0xec   : > { %v571_v33 = vrot.slane %v570_v50, 4 }
  0xed   : > { %1378 = vrot.lane.b32.xlu1 %v1351_v38, %s3223_s16  ;;  %v595_v38 = vshll.u32 %v536_v23, 16  ;;  %v517_v23 = vld [vmem:[#allocation2 + $0x18] sm:$0xf]  ;;  %v1367_v24 = vsel %vm3457_vm10, %v2952_v41, %v1366_v34  ;;  %v590_v9 = vsel %vm3477_vm13, %v3627_v44, %v3621_v40  ;;  %v872_v40 = vsel %vm3477_vm13, %v3641_v46, %v3629_v45  ;;  %v539_v45 = vld [vmem:[#allocation2 + $0x24] sm:$0x1] }
  0xee   : > { %1380 = vrot.lane.b32.xlu0 %v1355_v39, %s3223_s16  ;;  %v1168_v39 = vshrl.u32 %v1151_v58, 16  ;;  %v1363_v58 = vsel %vm3457_vm10, %v2951_v13, %v1362_v16  ;;  %525 = vst.msk [vmem:[#allocation4 + $0xc] sm:$0xf] %vm311_vm0, %v517_v23  ;;  %v1198_v13 = vrot.slane %v1196_v10, 4  ;;  %v895_v41 = vrot.slane %v894_v25, 4 }
  0xef   : > { %v597_v63 = vrot.slane %v595_v38, 5  ;;  %v1177_v38 = vshll.u32 %v1152_v26, 16  ;;  %v576_v56 = vsel %vm3477_vm13, %v571_v33, %v575_v35  ;;  %v542_v10 = vld [vmem:[#allocation2 + $0x30] sm:$0xf]  ;;  %vm1477_vm0 = vcmask 1041408  }
  0xf0   : > { %v1170_v2 = vrot.slane %v1168_v39, 4  ;;  %v850_v39 = vld [vmem:[#allocation2 + $0x24] sm:$0x1]  ;;  %v637_v25 = vshll.u32 %v542_v10, 16 }
  0xf1   : > { %1382 = vrot.lane.b32.xlu1 %v1359_v59, %s3223_s16  ;;  %v537_v59 = vld [vmem:[#allocation2 + $0x1c] sm:$0x1]  ;;  %v911_v55 = vshll.u32 %v850_v39, 16  ;;  %v544_v39 = vld [vmem:[#allocation2 + $0x38] sm:$0xf] }
  0xf2   : > { %769 = vrot.lane.b32.xlu0 %v748_v5, %s3218_s8  ;;  %v594_v5 = vrot.slane %v592_v36, 4  ;;  %v601_v7 = vshll.u32 %v537_v59, 16  ;;  %v1174_v29 = vor.u32 %v1173_v8, %v1170_v2  ;;  %v899_v36 = vrot.slane %v897_v6, 5  ;;  %v851_v6 = vld [vmem:[#allocation2 + $0x28] sm:$0xf] }
  0xf3   : > { %v1179_v59 = vrot.slane %v1177_v38, 5  ;;  %v1185_v8 = vshll.u32 %v1153_v51, 16  ;;  %v3697_v50 = vrot.slane %v911_v55, 5  ;;  %v643_v38 = vshll.u32 %v543_v60, 16 }
  0xf4   : > { %v598_v57 = vor.u32 %v597_v63, %v594_v5  ;;  %v603_v34 = vrot.slane %v601_v7, 5  ;;  %v606_v5 = vshrl.u32 %v538_v43, 16  ;;  %v609_v63 = vshll.u32 %v538_v43, 16  ;;  %v540_v7 = vld [vmem:[#allocation2 + $0x28] sm:$0xf] }
  0xf5   : > { %771 = vrot.lane.b32.xlu1 %v752_v11, %s3218_s8  ;;  %v849_v11 = vld [vmem:[#allocation2 + $0x20] sm:$0xf]  ;;  %v900_v2 = vsel %vm3477_vm13, %v895_v41, %v899_v36  ;;  %v1187_v27 = vrot.slane %v1185_v8, 5  ;;  %v620_v61 = vshrl.u32 %v540_v7, 16  ;;  %v639_v36 = vrot.slane %v637_v25, 5 }
  0xf6   : > { %773 = vrot.lane.b32.xlu0 %v756_v20, %s3218_s8  ;;  %v876_v20 = vrot.slane %v874_v47, 4  ;;  %v902_v16 = vshrl.u32 %v849_v11, 16  ;;  %v905_v31 = vshll.u32 %v849_v11, 16  ;;  %v599_v44 = vrot.slane %v598_v57, 4 }
  0xf7   : > { %v3673_v47 = vrot.slane %v1174_v29, 4  ;;  %v608_v23 = vrot.slane %v606_v5, 4  ;;  %v947_v55 = vshll.u32 %v855_v32, 16  ;;  %v645_v5 = vrot.slane %v643_v38, 5 }
  0xf8   : > { %v904_v49 = vrot.slane %v902_v16, 4  ;;  %v907_v54 = vrot.slane %v905_v31, 5  ;;  %v604_v11 = vsel %vm3477_vm13, %v599_v44, %v603_v34  ;;  %v919_v16 = vshll.u32 %v851_v6, 16  ;;  %v852_v44 = vld [vmem:[#allocation2 + $0x2c] sm:$0x1] }
  0xf9   : > { %775 = vrot.lane.b32.xlu1 %v760_v12, %s3218_s8  ;;  %v1067_v12 = vsel %vm3457_vm10, %v2946_v17, %v1066_v21  ;;  %v1201_v21 = vrot.slane %v1199_v22, 5  ;;  %v1180_v18 = vsel %vm3477_vm13, %v3673_v47, %v1179_v59  ;;  %v3132_v25 = vld [vmem:[%s4345_s1 + $0x10] ss:$0 sps:$4 sm:$0x33]  }
  0xfa   : > { %1076 = vrot.lane.b32.xlu0 %v1055_v15, %s3222_s15  ;;  %v879_v15 = vrot.slane %v877_v48, 5  ;;  %v1205_v48 = vshll.u32 %v1156_v30, 16  ;;  %v908_v46 = vor.u32 %v907_v54, %v904_v49  ;;  %v1158_v30 = vld [vmem:[#allocation2 + $0x2c] sm:$0x1]  ;;  %v622_v49 = vrot.slane %v620_v61, 4 }
  0xfb   : > { %v1202_v53 = vor.u32 %v1201_v21, %v1198_v13  ;;  %v916_v13 = vshrl.u32 %v851_v6, 16  ;;  %v1219_v43 = vshll.u32 %v1158_v30, 16  ;;  %v944_v54 = vshrl.u32 %v855_v32, 16  ;;  %v545_v6 = vld [vmem:[#allocation2 + $0x3c] sm:$0x1] }
  0xfc   : > { %v880_v17 = vor.u32 %v879_v15, %v876_v20  ;;  %v3688_v19 = vrot.slane %v1205_v48, 5  ;;  %v615_v20 = vshll.u32 %v539_v45, 16  ;;  %v1157_v15 = vld [vmem:[#allocation2 + $0x28] sm:$0xf]  ;;  %v909_v21 = vrot.slane %v908_v46, 4 }
  0xfd   : > { %1078 = vrot.lane.b32.xlu1 %v1059_v4, %s3222_s15  ;;  %v1182_v4 = vshrl.u32 %v1153_v51, 16  ;;  %v3695_v42 = vrot.slane %v1202_v53, 4  ;;  %v1210_v57 = vshrl.u32 %v1157_v15, 16  ;;  %v1213_v29 = vshll.u32 %v1157_v15, 16  ;;  %v541_v53 = vld [vmem:[#allocation2 + $0x2c] sm:$0x1] }
  0xfe   : > { %1080 = vrot.lane.b32.xlu0 %v1063_v3, %s3222_s15  ;;  %v3677_v52 = vrot.slane %v880_v17, 4  ;;  %v885_v3 = vrot.slane %v883_v14, 5  ;;  %v3705_v31 = vrot.slane %v615_v20, 5  ;;  %v918_v47 = vrot.slane %v916_v13, 4  ;;  %v1163_v61 = vld [vmem:[#allocation2 + $0x40] sm:$0xf] }
  0xff   : > { %v1184_v26 = vrot.slane %v1182_v4, 4  ;;  %v1208_v17 = vsel %vm3477_vm13, %v3695_v42, %v3688_v19  ;;  %v1212_v34 = vrot.slane %v1210_v57, 4  ;;  %v1215_v14 = vrot.slane %v1213_v29, 5  ;;  %v853_v42 = vld [vmem:[#allocation2 + $0x30] sm:$0xf] }
 0x100   : > { %v886_v22 = vsel %vm3477_vm13, %v3677_v52, %v885_v3  ;;  %v921_v48 = vrot.slane %v919_v16, 5  ;;  %v648_v45 = vshrl.u32 %v544_v39, 16  ;;  %v3131_v3 = vld [vmem:[%s4345_s1 + $0x8] sm:$0xff]   ;;  %v629_v15 = vshll.u32 %v541_v53, 16 }
 0x101   : > { %1082 = vrot.lane.b32.xlu1 %v1067_v12, %s3222_s15  ;;  %v1154_v12 = vld [vmem:[#allocation2 + $0x1c] sm:$0x1]  ;;  %v1188_v41 = vor.u32 %v1187_v27, %v1184_v26  ;;  %v946_v46 = vrot.slane %v944_v54, 4  ;;  %v930_v60 = vshrl.u32 %v853_v42, 16  ;;  %v933_v57 = vshll.u32 %v853_v42, 16 }
 0x102   : > { %1384 = vrot.lane.b32.xlu0 %v1363_v58, %s3223_s16  ;;  %v611_v58 = vrot.slane %v609_v63, 5  ;;  %v1191_v28 = vshll.u32 %v1154_v12, 16  ;;  %v651_v63 = vshll.u32 %v544_v39, 16  ;;  %v922_v19 = vor.u32 %v921_v48, %v918_v47  ;;  %v854_v39 = vld [vmem:[#allocation2 + $0x34] sm:$0x1] }
 0x103   : > { %v1189_v4 = vrot.slane %v1188_v41, 4  ;;  %v631_v13 = vrot.slane %v629_v15, 5  ;;  %v1479_v38 = vsel %vm1477_vm0, %v3132_v25, 0  ;;  %v935_v41 = vrot.slane %v933_v57, 5  ;;  %v1161_v54 = vld [vmem:[#allocation2 + $0x38] sm:$0xf] }
 0x104   : > { %v612_v33 = vor.u32 %v611_v58, %v608_v23  ;;  %v1193_v52 = vrot.slane %v1191_v28, 5  ;;  %v653_v12 = vrot.slane %v651_v63, 5  ;;  %v857_v28 = vld [vmem:[#allocation2 + $0x40] sm:$0xf] }
 0x105   : > { %1386 = vrot.lane.b32.xlu1 %v1367_v24, %s3223_s16  ;;  %v634_v24 = vshrl.u32 %v542_v10, 16  ;;  %v1221_v10 = vrot.slane %v1219_v43, 5  ;;  %v958_v47 = vshrl.u32 %v857_v28, 16  ;;  %v961_v48 = vshll.u32 %v857_v28, 16  ;;  %v1326_v28 = vld [vmem:[#allocation2 + $0x48] sm:$0xe] }
 0x106   : > { %665 = vrot.lane.b32.xlu0 %v590_v9, %s3219_s10  ;;  %v623_v9 = vshll.u32 %v540_v7, 16  ;;  %v613_v59 = vrot.slane %v612_v33, 4  ;;  %v650_v7 = vrot.slane %v648_v45, 4  ;;  %v1194_v26 = vsel %vm3477_vm13, %v1189_v4, %v1193_v52  ;;  %v1160_v33 = vld [vmem:[#allocation2 + $0x34] sm:$0x1] }
 0x107   : > { %v636_v35 = vrot.slane %v634_v24, 4  ;;  %v1233_v53 = vshll.u32 %v1160_v33, 16 }
 0x108   : > { %v625_v51 = vrot.slane %v623_v9, 5  ;;  %v618_v58 = vsel %vm3477_vm13, %v613_v59, %v3705_v31  ;;  %v923_v9 = vrot.slane %v922_v19, 4  ;;  %v657_v31 = vshll.u32 %v545_v6, 16 }
 0x109   : > { %663 = vrot.lane.b32.xlu1 %v576_v56, %s3219_s10  ;;  %v914_v56 = vsel %vm3477_vm13, %v909_v21, %v3697_v50  ;;  %v640_v8 = vor.u32 %v639_v36, %v636_v35  ;;  %v949_v50 = vrot.slane %v947_v55, 5  ;;  %v654_v32 = vor.u32 %v653_v12, %v650_v7 }
 0x10a   : > { %971 = vrot.lane.b32.xlu0 %v872_v40, %s3224_s17  ;;  %v3130_v40 = vld [vmem:[%s4345_s1] sm:$0xff]   ;;  %v626_v20 = vor.u32 %v625_v51, %v622_v49  ;;  %v939_v59 = vshll.u32 %v854_v39, 16  ;;  %v1241_v19 = vshll.u32 %v1161_v54, 16  ;;  %v1235_v15 = vrot.slane %v1233_v53, 5 }
 0x10b   : > { %3041 = vmatprep.subr.bf16.mxu0 %v3130_v40  ;;  %v641_v27 = vrot.slane %v640_v8, 4  ;;  %v950_v21 = vor.u32 %v949_v50, %v946_v46  ;;  %v655_v45 = vrot.slane %v654_v32, 4  ;;  %v858_v8 = vld [vmem:[#allocation2 + $0x44] sm:$0x1]  ;;  %v1327_v32 = vld [vmem:[#allocation2 + $0x4c] sm:$0x1] }
 0x10c   : > { %3042 = vmatpush3.bf16.msra.mxu0 %v3130_v40  ;;  %v932_v40 = vrot.slane %v930_v60, 4  ;;  %v967_v7 = vshll.u32 %v858_v8, 16 }
 0x10d   : > { %667 = vrot.lane.b32.xlu1 %v604_v11, %s3219_s10  ;;  %v925_v11 = vshll.u32 %v852_v44, 16  ;;  %3043 = vmatprep.subr.bf16.mxu0 %v3131_v3  ;;  %v646_v43 = vsel %vm3477_vm13, %v641_v27, %v645_v5  ;;  %v951_v55 = vrot.slane %v950_v21, 4  ;;  %v3752_v27 = vpop.permute.xlu1 %1132 }
 0x10e   : > { %975 = vrot.lane.b32.xlu0 %v900_v2, %s3224_s17  ;;  %v1159_v2 = vld [vmem:[#allocation2 + $0x30] sm:$0xf]  ;;  %v936_v63 = vor.u32 %v935_v41, %v932_v40  ;;  %v2954_v40 = vrot.slane %v1326_v28, 9  ;;  %v1374_v41 = vrot.slane %v1327_v32, 5 }
 0x10f   : > { %v1224_v23 = vshrl.u32 %v1159_v2, 16  ;;  %v1227_v24 = vshll.u32 %v1159_v2, 16  ;;  %v927_v30 = vrot.slane %v925_v11, 5  ;;  %v1164_v2 = vld [vmem:[#allocation2 + $0x44] sm:$0x1]  ;;  %v963_v11 = vrot.slane %v961_v48, 5 }
 0x110   : > { %3044 = vmatpush3.bf16.msra.mxu0 %v3131_v3  ;;  %v1261_v42 = vshll.u32 %v1164_v2, 16 }
 0x111   : > { %973 = vrot.lane.b32.xlu1 %v886_v22, %s3224_s17  ;;  %v856_v22 = vld [vmem:[#allocation2 + $0x3c] sm:$0x1]  ;;  %3073 = vmatprep.subr.msk.bf16.mxu0 %vm1477_vm0, %v3132_v25  ;;  %v1226_v35 = vrot.slane %v1224_v23, 4  ;;  %v1229_v36 = vrot.slane %v1227_v24, 5  ;;  %v928_v49 = vsel %vm3477_vm13, %v923_v9, %v927_v30  ;;  %v937_v23 = vrot.slane %v936_v63, 4  ;;  %v3764_v39 = vpop.permute.xlu1 %1293 }
 0x112   : > { %1279 = vrot.lane.b32.xlu0 %v1180_v18, %s3220_s11  ;;  %v1216_v18 = vor.u32 %v1215_v14, %v1212_v34  ;;  %v953_v16 = vshll.u32 %v856_v22, 16  ;;  %v1252_v34 = vshrl.u32 %v1163_v61, 16  ;;  %v1255_v14 = vshll.u32 %v1163_v61, 16  ;;  %v1162_v25 = vld [vmem:[#allocation2 + $0x3c] sm:$0x1] }
 0x113   : > { %v1230_v5 = vor.u32 %v1229_v36, %v1226_v35  ;;  %v941_v22 = vrot.slane %v939_v59, 5  ;;  %v1243_v24 = vrot.slane %v1241_v19, 5  ;;  %v1263_v57 = vrot.slane %v1261_v42, 5  ;;  %v1325_v61 = vld [vmem:[#allocation2 + $0x44] sm:$0x1] }
 0x114   : > { %v1217_v29 = vrot.slane %v1216_v18, 4  ;;  %3046 = vmatpush3.bf16.msra.mxu0 %v1479_v38  ;;  %v955_v52 = vrot.slane %v953_v16, 5  ;;  %v1254_v3 = vrot.slane %v1252_v34, 4  ;;  %v1257_v4 = vrot.slane %v1255_v14, 5  ;;  %v1324_v16 = vld [vmem:[#allocation2 + $0x40] sm:$0xe] }
 0x115   : > { %977 = vrot.lane.b32.xlu1 %v914_v56, %s3224_s17  ;;  %v659_v56 = vrot.slane %v657_v31, 5  ;;  %v1238_v18 = vshrl.u32 %v1161_v54, 16  ;;  %v1231_v50 = vrot.slane %v1230_v5, 4  ;;  %v942_v30 = vsel %vm3477_vm13, %v937_v23, %v941_v22 }
 0x116   : > { %1283 = vrot.lane.b32.xlu0 %v1208_v17, %s3220_s11  ;;  %v627_v17 = vrot.slane %v626_v20, 4  ;;  %v1222_v44 = vsel %vm3477_vm13, %v1217_v29, %v1221_v10  ;;  %v960_v10 = vrot.slane %v958_v47, 4  ;;  %v956_v20 = vsel %vm3477_vm13, %v951_v55, %v955_v52 }
 0x117   : > { %v660_v46 = vsel %vm3477_vm13, %v655_v45, %v659_v56  ;;  %v1258_v6 = vor.u32 %v1257_v4, %v1254_v3  ;;  %v1240_v12 = vrot.slane %v1238_v18, 4  ;;  %v969_v29 = vrot.slane %v967_v7, 5 }
 0x118   : > { %v632_v51 = vsel %vm3477_vm13, %v627_v17, %v631_v13  ;;  %v1247_v17 = vshll.u32 %v1162_v25, 16  ;;  %v2953_v21 = vrot.slane %v1324_v16, 9  ;;  %v1370_v31 = vrot.slane %v1325_v61, 5 }
 0x119   : > { %1281 = vrot.lane.b32.xlu1 %v1194_v26, %s3220_s11  ;;  %v1236_v26 = vsel %vm3477_vm13, %v1231_v50, %v1235_v15  ;;  %v1259_v60 = vrot.slane %v1258_v6, 4  ;;  %v1244_v9 = vor.u32 %v1243_v24, %v1240_v12  ;;  %vm2359_vm0 = vcmask 388416  }
 0x11a   : > { %669 = vrot.lane.b32.xlu0 %v618_v58, %s3219_s10  ;;  %v964_v58 = vor.u32 %v963_v11, %v960_v10  ;;  %v1249_v38 = vrot.slane %v1247_v17, 5  ;;  %v1371_v14 = vsel %vm3457_vm10, %v2953_v21, %v1370_v31 }
 0x11b   : > { %v1264_v33 = vsel %vm3477_vm13, %v1259_v60, %v1263_v57  ;;  %v1245_v36 = vrot.slane %v1244_v9, 4 }
 0x11c   : > { %v965_v13 = vrot.slane %v964_v58, 4 }
 0x11d   : > { %1285 = vrot.lane.b32.xlu1 %v1222_v44, %s3220_s11  ;;  %v1375_v44 = vsel %vm3457_vm10, %v2954_v40, %v1374_v41 }
 0x11e   : > { %673 = vrot.lane.b32.xlu0 %v646_v43, %s3219_s10  ;;  %v970_v35 = vsel %vm3477_vm13, %v965_v13, %v969_v29  ;;  %v1250_v43 = vsel %vm3477_vm13, %v1245_v36, %v1249_v38 }
 0x121   : > { %671 = vrot.lane.b32.xlu1 %v632_v51, %s3219_s10 }
 0x122   : > { %979 = vrot.lane.b32.xlu0 %v928_v49, %s3224_s17 }
 0x125   : > { %675 = vrot.lane.b32.xlu1 %v660_v46, %s3219_s10 }
 0x126   : > { %983 = vrot.lane.b32.xlu0 %v956_v20, %s3224_s17 }
 0x129   : > { %981 = vrot.lane.b32.xlu1 %v942_v30, %s3224_s17 }
 0x12a   : > { %1287 = vrot.lane.b32.xlu0 %v1236_v26, %s3220_s11 }
 0x12d   : > { %985 = vrot.lane.b32.xlu1 %v970_v35, %s3224_s17 }
 0x12e   : > { %1291 = vrot.lane.b32.xlu0 %v1264_v33, %s3220_s11 }
 0x130   : > { %v811_v34 = vpop.permute.xlu0 %810 }
 0x131   : > { %835 = vst.msk [vmem:[#allocation4] sm:$0xf] %vm834_vm3, %v811_v34  ;;  %1289 = vrot.lane.b32.xlu1 %v1250_v43, %s3220_s11 }
 0x132   : > { %1388 = vrot.lane.b32.xlu0 %v1371_v14, %s3223_s16 }
 0x133   : > { %v813_v47 = vpop.permute.xlu1 %812 }
 0x134   : > { %v815_v48 = vpop.permute.xlu0 %814 }
 0x135   : > { %1390 = vrot.lane.b32.xlu1 %v1375_v44, %s3223_s16 }
 0x137   : > { %v817_v49 = vpop.permute.xlu1 %816 }
 0x138   : > { %v1119_v51 = vpop.permute.xlu0 %1118 }
 0x13b   : > { %v1121_v52 = vpop.permute.xlu1 %1120 }
 0x13c   : > { %v1123_v53 = vpop.permute.xlu0 %1122 }
 0x13f   : > { %v3776_v54 = vpop.permute.xlu1 %1124 }
 0x140   : > { %v3778_v55 = vpop.permute.xlu0 %818 }
 0x143   : > { %v3780_v45 = vpop.permute.xlu1 %820 }
 0x144   : > { %v3782_v56 = vpop.permute.xlu0 %822 }
 0x147   : > { %v3784_v59 = vpop.permute.xlu1 %824 }
 0x148   : > { %v3786_v5 = vpop.permute.xlu0 %1126 }
 0x14b   : > { %v3788_v63 = vpop.permute.xlu1 %1128 }
 0x14c   : > { %v3790_v2 = vpop.permute.xlu0 %1130 }
 0x14f   : > { %v764_v3 = vpop.permute.xlu1 %763 }
 0x150   : > { %v766_v4 = vpop.permute.xlu0 %765 }
 0x153   : > { %v768_v8 = vpop.permute.xlu1 %767 }
 0x154   : > { %v1069_v10 = vpop.permute.xlu0 %1068 }
 0x157   : > { %v1071_v11 = vpop.permute.xlu1 %1070 }
 0x158   : > { %v1073_v18 = vpop.permute.xlu0 %1072 }
 0x15b   : > { %v1075_v19 = vpop.permute.xlu1 %1074 }
 0x15c   : > { %v1377_v20 = vpop.permute.xlu0 %1376 }
 0x15f   : > { %v1379_v15 = vpop.permute.xlu1 %1378 }
 0x160   : > { %v1381_v22 = vpop.permute.xlu0 %1380 }
 0x163   : > { %v1383_v42 = vpop.permute.xlu1 %1382 }
 0x164   : > { %v770_v46 = vpop.permute.xlu0 %769 }
 0x167   : > { %v3792_v50 = vpop.permute.xlu1 %771 }
 0x168   : > { %v774_v6 = vpop.permute.xlu0 %773 }
 0x16b   : > { %v3794_v7 = vpop.permute.xlu1 %775 }
 0x16c   : > { %v3796_v23 = vpop.permute.xlu0 %1076 }
 0x16f   : > { %v3798_v58 = vpop.permute.xlu1 %1078 }
 0x170   : > { %v3800_v12 = vpop.permute.xlu0 %1080 }
 0x173   : > { %v3802_v24 = vpop.permute.xlu1 %1082 }
 0x174   : > { %v3804_v25 = vpop.permute.xlu0 %1384 }
 0x177   : > { %v3806_v26 = vpop.permute.xlu1 %1386 }
 0x178   : > { %v666_v60 = vpop.permute.xlu0 %665 }
 0x179   : > { %688 = vst.msk [vmem:[#allocation4 + $0x8] sm:$0xf] %vm685_vm15, %v666_v60  ;;  %v1584_v60 = vld [vmem:[#allocation3 + $0x38] sm:$0x1] }
 0x17a   : > { %788 = vst.msk [vmem:[#allocation4 + $0x8] sm:$0xf] %vm785_vm1, %v766_v4  ;;  %v1569_v4 = vld [vmem:[#allocation3 + $0x10] sm:$0x1] }
 0x17b   : > { %837 = vst.msk [vmem:[#allocation4 + $0x8] sm:$0xf] %vm834_vm3, %v815_v48  ;;  %v664_v57 = vpop.permute.xlu1 %663 }
 0x17c   : > { %v972_v29 = vpop.permute.xlu0 %971  ;;  %687 = vst.msk [vmem:[#allocation4 + $0x4] sm:$0xf] %vm685_vm15, %v664_v57 }
 0x17d   : > { %996 = vst.msk [vmem:[#allocation4] sm:$0xf] %vm995_vm6, %v972_v29 }
 0x17e   : > { %787 = vst.msk [vmem:[#allocation4 + $0x4] sm:$0xf] %vm785_vm1, %v764_v3 }
 0x17f   : > { %1093 = vst.msk [vmem:[#allocation4] sm:$0xf] %vm1092_vm7, %v1069_v10  ;;  %v668_v30 = vpop.permute.xlu1 %667  ;;  %v1570_v10 = vsel %vm3364_vm4, 0, %v1569_v4 }
 0x180   : > { %836 = vst.msk [vmem:[#allocation4 + $0x4] sm:$0xf] %vm834_vm3, %v813_v47  ;;  %v976_v13 = vpop.permute.xlu0 %975  ;;  %1571 = vst [vmem:[#allocation3 + $0x10] sm:$0x1] %v1570_v10 }
 0x181   : > { %1143 = vst.msk [vmem:[#allocation4] sm:$0xf] %vm1142_vm8, %v1119_v51 }
 0x182   : > { %689 = vst.msk [vmem:[#allocation4 + $0xc] sm:$0xf] %vm685_vm15, %v668_v30 }
 0x183   : > { %998 = vst.msk [vmem:[#allocation4 + $0x8] sm:$0xf] %vm995_vm6, %v976_v13  ;;  %v974_v16 = vpop.permute.xlu1 %973  ;;  %v1615_v13 = vld [vmem:[#allocation3 + $0x3c] sm:$0x1] }
 0x184   : > { %789 = vst.msk [vmem:[#allocation4 + $0xc] sm:$0xf] %vm785_vm1, %v768_v8  ;;  %v1280_v61 = vpop.permute.xlu0 %1279  ;;  %v1600_v8 = vld [vmem:[#allocation3 + $0x14] sm:$0x1] }
 0x185   : > { %1095 = vst.msk [vmem:[#allocation4 + $0x8] sm:$0xf] %vm1092_vm7, %v1073_v18 }
 0x186   : > { %838 = vst.msk [vmem:[#allocation4 + $0xc] sm:$0xf] %vm834_vm3, %v817_v49 }
 0x187   : > { %1145 = vst.msk [vmem:[#allocation4 + $0x8] sm:$0xf] %vm1142_vm8, %v1123_v53  ;;  %v978_v9 = vpop.permute.xlu1 %977  ;;  %v1603_v53 = vld [vmem:[#allocation3 + $0x1c] sm:$0x1] }
 0x188   : > { %997 = vst.msk [vmem:[#allocation4 + $0x4] sm:$0xf] %vm995_vm6, %v974_v16  ;;  %v1284_v17 = vpop.permute.xlu0 %1283  ;;  %999 = vst.msk [vmem:[#allocation4 + $0xc] sm:$0xf] %vm995_vm6, %v978_v9 }
 0x189   : > { %1304 = vst.msk [vmem:[#allocation4] sm:$0xf] %vm1303_vm9, %v1280_v61  ;;  %1306 = vst.msk [vmem:[#allocation4 + $0x8] sm:$0xf] %vm1303_vm9, %v1284_v17 }
 0x18a   : > { %1094 = vst.msk [vmem:[#allocation4 + $0x4] sm:$0xf] %vm1092_vm7, %v1071_v11  ;;  %1096 = vst.msk [vmem:[#allocation4 + $0xc] sm:$0xf] %vm1092_vm7, %v1075_v19  ;;  %v1601_v11 = vsel %vm3893_vm14, 0, %v1600_v8 }
 0x18b   : > { %1401 = vst.msk [vmem:[#allocation4] sm:$0xf] %vm1400_vm11, %v1377_v20  ;;  %1403 = vst.msk [vmem:[#allocation4 + $0x8] sm:$0xf] %vm1400_vm11, %v1381_v22  ;;  %v1282_v21 = vpop.permute.xlu1 %1281  ;;  %v1594_v19 = vld [vmem:[#allocation3 + $0x4] sm:$0x1] }
 0x18c   : > { %1144 = vst.msk [vmem:[#allocation4 + $0x4] sm:$0xf] %vm1142_vm8, %v1121_v52  ;;  %1146 = vst.msk [vmem:[#allocation4 + $0xc] sm:$0xf] %vm1142_vm8, %v3776_v54  ;;  %v670_v31 = vpop.permute.xlu0 %669 }
 0x18d   : > { %1305 = vst.msk [vmem:[#allocation4 + $0x4] sm:$0xf] %vm1303_vm9, %v1282_v21  ;;  %1602 = vst [vmem:[#allocation3 + $0x14] sm:$0x1] %v1601_v11  ;;  %v1585_v21 = vsel %vm3364_vm4, 0, %v1584_v60 }
 0x18e   : > { %690 = vst.msk [vmem:[#allocation4 + $0x10] sm:$0xf] %vm685_vm15, %v670_v31  ;;  %1586 = vst [vmem:[#allocation3 + $0x38] sm:$0x1] %v1585_v21 }
 0x18f   : > { %1402 = vst.msk [vmem:[#allocation4 + $0x4] sm:$0xf] %vm1400_vm11, %v1379_v15  ;;  %v1286_v28 = vpop.permute.xlu1 %1285  ;;  %v1595_v15 = vsel %vm3893_vm14, 0, %v1594_v19 }
 0x190   : > { %790 = vst.msk [vmem:[#allocation4 + $0x10] sm:$0xf] %vm785_vm1, %v770_v46  ;;  %v674_v32 = vpop.permute.xlu0 %673  ;;  %1596 = vst [vmem:[#allocation3 + $0x4] sm:$0x1] %v1595_v15  ;;  %v1621_v46 = vld [vmem:[#allocation3 + $0x4c] sm:$0x1] }
 0x191   : > { %839 = vst.msk [vmem:[#allocation4 + $0x10] sm:$0xf] %vm834_vm3, %v3778_v55  ;;  %v1604_v55 = vsel %vm3893_vm14, 0, %v1603_v53 }
 0x192   : > { %1307 = vst.msk [vmem:[#allocation4 + $0xc] sm:$0xf] %vm1303_vm9, %v1286_v28  ;;  %1605 = vst [vmem:[#allocation3 + $0x1c] sm:$0x1] %v1604_v55 }
 0x193   : > { %692 = vst.msk [vmem:[#allocation4 + $0x18] sm:$0xf] %vm685_vm15, %v674_v32  ;;  %v672_v33 = vpop.permute.xlu1 %671  ;;  %v1616_v32 = vsel %vm3893_vm14, 0, %v1615_v13 }
 0x194   : > { %1404 = vst.msk [vmem:[#allocation4 + $0xc] sm:$0xf] %vm1400_vm11, %v1383_v42  ;;  %v980_v35 = vpop.permute.xlu0 %979  ;;  %1617 = vst [vmem:[#allocation3 + $0x3c] sm:$0x1] %v1616_v32 }
 0x195   : > { %792 = vst.msk [vmem:[#allocation4 + $0x18] sm:$0xf] %vm785_vm1, %v774_v6 }
 0x196   : > { %841 = vst.msk [vmem:[#allocation4 + $0x18] sm:$0xf] %vm834_vm3, %v3782_v56  ;;  %v3133_v36 = vld [vmem:[#allocation4] sm:$0xff]   ;;  %v1597_v56 = vld [vmem:[#allocation3 + $0xc] sm:$0x1] }
 0x197   : > { %691 = vst.msk [vmem:[#allocation4 + $0x14] sm:$0xf] %vm685_vm15, %v672_v33  ;;  %3047 = vmatprep.mubr.msk.bf16.mxu0 %vm1464_vm12, %v3133_v36  ;;  %v676_v38 = vpop.permute.xlu1 %675  ;;  %v1965_v16 = vld [vmem:[#allocation3 + $0x4] sm:$0x1] }
 0x198   : > { %1000 = vst.msk [vmem:[#allocation4 + $0x10] sm:$0xf] %vm995_vm6, %v980_v35  ;;  %v984_v40 = vpop.permute.xlu0 %983 }
 0x199   : > { %791 = vst.msk [vmem:[#allocation4 + $0x14] sm:$0xf] %vm785_vm1, %v3792_v50  ;;  %v1622_v50 = vsel %vm3893_vm14, 0, %v1621_v46 }
 0x19a   : > { %1097 = vst.msk [vmem:[#allocation4 + $0x10] sm:$0xf] %vm1092_vm7, %v3796_v23  ;;  %1623 = vst [vmem:[#allocation3 + $0x4c] sm:$0x1] %v1622_v50 }
 0x19b   : > { %840 = vst.msk [vmem:[#allocation4 + $0x14] sm:$0xf] %vm834_vm3, %v3780_v45  ;;  %v3134_v41 = vld [vmem:[#allocation4 + $0x8] sm:$0xff]   ;;  %v982_v34 = vpop.permute.xlu1 %981  ;;  %v1566_v45 = vld [vmem:[#allocation3 + $0x8] sm:$0x1] }
 0x19c   : > { %1147 = vst.msk [vmem:[#allocation4 + $0x10] sm:$0xf] %vm1142_vm8, %v3786_v5  ;;  %3048 = vmatmul.mubr.msk.bf16.vlgmr.msra.gmra.mrb[0].mxu0 %vm1464_vm12, %v3134_v41  ;;  %v1288_v14 = vpop.permute.xlu0 %1287  ;;  %v1598_v5 = vsel %vm3893_vm14, 0, %v1597_v56  ;;  %v1612_v56 = vld [vmem:[#allocation3 + $0x34] sm:$0x1] }
 0x19d   : > { %693 = vst.msk [vmem:[#allocation4 + $0x1c] sm:$0xf] %vm685_vm15, %v676_v38  ;;  %vm1554_vm15 = vcmask 60416   ;;  %1599 = vst [vmem:[#allocation3 + $0xc] sm:$0x1] %v1598_v5  ;;  %v1613_v5 = vsel %vm3893_vm14, 0, %v1612_v56 }
 0x19e   : > { %1002 = vst.msk [vmem:[#allocation4 + $0x18] sm:$0xf] %vm995_vm6, %v984_v40  ;;  %1001 = vst.msk [vmem:[#allocation4 + $0x14] sm:$0xf] %vm995_vm6, %v982_v34  ;;  %v1998_v40 = vrot.slane %v1965_v16, 5 }
 0x19f   : > { %793 = vst.msk [vmem:[#allocation4 + $0x1c] sm:$0xf] %vm785_vm1, %v3794_v7  ;;  %v986_v43 = vpop.permute.xlu1 %985  ;;  %v1804_v7 = vld [vmem:[#allocation3 + $0x4] sm:$0x1]  ;;  %1614 = vst [vmem:[#allocation3 + $0x34] sm:$0x1] %v1613_v5 }
 0x1a0   : > { %1099 = vst.msk [vmem:[#allocation4 + $0x18] sm:$0xf] %vm1092_vm7, %v3800_v12  ;;  %1098 = vst.msk [vmem:[#allocation4 + $0x14] sm:$0xf] %vm1092_vm7, %v3798_v58  ;;  %v1292_v44 = vpop.permute.xlu0 %1291  ;;  %v1829_v12 = vshll.u32 %v1804_v7, 16  ;;  %vm2052_vm1 = vcmask 191616  }
 0x1a1   : > { %842 = vst.msk [vmem:[#allocation4 + $0x1c] sm:$0xf] %vm834_vm3, %v3784_v59  ;;  %v1567_v59 = vsel %vm3364_vm4, 0, %v1566_v45  ;;  %v1581_v45 = vld [vmem:[#allocation3 + $0x30] sm:$0x1]  ;;  %vm3963_vm2 = vmand %vm1554_vm15, %vm351_vm5  ;;  %vm1955_vm5 = vcmask 126016  }
 0x1a2   : > { %1149 = vst.msk [vmem:[#allocation4 + $0x18] sm:$0xf] %vm1142_vm8, %v3790_v2  ;;  %1148 = vst.msk [vmem:[#allocation4 + $0x14] sm:$0xf] %vm1142_vm8, %v3788_v63  ;;  %v1575_v63 = vld [vmem:[#allocation3 + $0x20] sm:$0x1] }
 0x1a3   : > { %1308 = vst.msk [vmem:[#allocation4 + $0x10] sm:$0xf] %vm1303_vm9, %v1288_v14  ;;  %1310 = vst.msk [vmem:[#allocation4 + $0x18] sm:$0xf] %vm1303_vm9, %v1292_v44  ;;  %v1290_v47 = vpop.permute.xlu1 %1289  ;;  %v1606_v2 = vld [vmem:[#allocation3 + $0x24] sm:$0x1] }
 0x1a4   : > { %1405 = vst.msk [vmem:[#allocation4 + $0x10] sm:$0xf] %vm1400_vm11, %v3804_v25  ;;  %v1389_v48 = vpop.permute.xlu0 %1388  ;;  %1568 = vst [vmem:[#allocation3 + $0x8] sm:$0x1] %v1567_v59  ;;  %v1576_v3 = vsel %vm3364_vm4, 0, %v1575_v63  ;;  %v1831_v28 = vrot.slane %v1829_v12, 5 }
 0x1a5   : > { %1003 = vst.msk [vmem:[#allocation4 + $0x1c] sm:$0xf] %vm995_vm6, %v986_v43  ;;  %1577 = vst [vmem:[#allocation3 + $0x20] sm:$0x1] %v1576_v3  ;;  %v1582_v59 = vsel %vm3364_vm4, 0, %v1581_v45  ;;  %vm2409_vm3 = vcmask 454016  }
 0x1a6   : > { %1100 = vst.msk [vmem:[#allocation4 + $0x1c] sm:$0xf] %vm1092_vm7, %v3802_v24  ;;  %1583 = vst [vmem:[#allocation3 + $0x30] sm:$0x1] %v1582_v59  ;;  %v3954_v63 = vld [vmem:[%s4346_s2] ss:$0 sm:$0xff] }
 0x1a7   : > { %1150 = vst.msk [vmem:[#allocation4 + $0x1c] sm:$0xf] %vm1142_vm8, %v3752_v27  ;;  %v1391_v49 = vpop.permute.xlu1 %1390  ;;  %v1742_v13 = vld [vmem:[#allocation3 + $0xc] sm:$0x1]  ;;  %vm2570_vm6 = vcmask 519616   ;;  %vm2667_vm7 = vcmask 585216  }
 0x1a8   : > { %1311 = vst.msk [vmem:[#allocation4 + $0x1c] sm:$0xf] %vm1303_vm9, %v3764_v39  ;;  %1309 = vst.msk [vmem:[#allocation4 + $0x14] sm:$0xf] %vm1303_vm9, %v1290_v47  ;;  %v1572_v39 = vld [vmem:[#allocation3 + $0x18] sm:$0x1] }
 0x1a9   : > { %1407 = vst.msk [vmem:[#allocation4 + $0x18] sm:$0xf] %vm1400_vm11, %v1389_v48  ;;  %1406 = vst.msk [vmem:[#allocation4 + $0x14] sm:$0xf] %vm1400_vm11, %v3806_v26  ;;  %v1573_v54 = vsel %vm3364_vm4, 0, %v1572_v39  ;;  %vm2747_vm8 = vcmask 588800  }
 0x1aa   : > { %1408 = vst.msk [vmem:[#allocation4 + $0x1c] sm:$0xf] %vm1400_vm11, %v1391_v49  ;;  %1574 = vst [vmem:[#allocation3 + $0x18] sm:$0x1] %v1573_v54  ;;  %v2433_v26 = vld [vmem:[#allocation3 + $0x4c] sm:$0x1] }
 0x1ab   : > { %1555 = vst.msk [vmem:[#allocation3] sm:$0xf] %vm1554_vm15, %v3215_v0  ;;  %1559 = vst.msk [vmem:[#allocation3 + $0x48] sm:$0xf] %vm1554_vm15, %v3215_v0  ;;  %v1607_v0 = vsel %vm3893_vm14, 0, %v1606_v2  ;;  %v2542_v17 = vshll.u32 %v2433_v26, 16 }
 0x1ac   : > { %1608 = vst [vmem:[#allocation3 + $0x24] sm:$0x1] %v1607_v0  ;;  %v1578_v47 = vld [vmem:[#allocation3 + $0x28] sm:$0x1]  ;;  %v1609_v48 = vld [vmem:[#allocation3 + $0x2c] sm:$0x1] }
 0x1ad   : > { %v2544_v34 = vrot.slane %v2542_v17, 5  ;;  %v1587_v39 = vld [vmem:[#allocation3 + $0x40] sm:$0x1]  ;;  %v1618_v54 = vld [vmem:[#allocation3 + $0x44] sm:$0x1]  ;;  %vm2837_vm9 = vcmask 64512  }
 0x1ae   : > { %v1588_v53 = vsel %vm3364_vm4, 0, %v1587_v39  ;;  %v1619_v55 = vsel %vm3893_vm14, 0, %v1618_v54  ;;  %v1739_v26 = vld [vmem:[#allocation3 + $0x8] sm:$0xf] }
 0x1af   : > { %1589 = vst [vmem:[#allocation3 + $0x40] sm:$0x1] %v1588_v53  ;;  %1620 = vst [vmem:[#allocation3 + $0x44] sm:$0x1] %v1619_v55 }
 0x1b0   : > { %v3135_v51 = vld [vmem:[#allocation4 + $0x10] sm:$0xff]  }
 0x1b1   : > { %3051 = vmatprep.mubr.msk.bf16.mxu0 %vm1464_vm12, %v3135_v51  ;;  %v3136_v52 = vld [vmem:[#allocation4 + $0x18] sm:$0xff]   ;;  %v1579_v51 = vsel %vm3364_vm4, 0, %v1578_v47  ;;  %v1751_v7 = vld [vmem:[#allocation3 + $0x18] sm:$0xf] }
 0x1b2   : > { %3052 = vmatmul.mubr.msk.bf16.gmra.mrb[4].mxu0 %vm1464_vm12, %v3136_v52  ;;  %v1563_v18 = vld [vmem:[#allocation3] sm:$0x1]  ;;  %v1590_v22 = vld [vmem:[#allocation3 + $0x48] sm:$0x1]  ;;  %v1964_v30 = vld [vmem:[#allocation3] sm:$0xe] }
 0x1b3   : > { %v1564_v20 = vsel %vm3364_vm4, 0, %v1563_v18  ;;  %v1591_v42 = vsel %vm3364_vm4, 0, %v1590_v22  ;;  %v2975_v38 = vrot.slane %v1964_v30, 9  ;;  %v1610_v52 = vsel %vm3893_vm14, 0, %v1609_v48  ;;  %1580 = vst [vmem:[#allocation3 + $0x28] sm:$0x1] %v1579_v51 }
 0x1b4   : > { %1565 = vst [vmem:[#allocation3] sm:$0x1] %v1564_v20  ;;  %1592 = vst [vmem:[#allocation3 + $0x48] sm:$0x1] %v1591_v42 }
 0x1b5   : > { %v1999_v44 = vsel %vm3457_vm10, %v2975_v38, %v1998_v40  ;;  %1611 = vst [vmem:[#allocation3 + $0x2c] sm:$0x1] %v1610_v52 }
 0x1bb   : > { %v1803_v6 = vld [vmem:[#allocation3] sm:$0xf]  ;;  %v2376_v24 = vld [vmem:[#allocation3 + $0x48] sm:$0xf] }
 0x1bc   : > { %v1820_v23 = vshrl.u32 %v1803_v6, 16  ;;  %v1823_v58 = vshll.u32 %v1803_v6, 16  ;;  %2399 = vrot.lane.b32.xlu1 %v2376_v24, %s3225_s6  ;;  %v2432_v25 = vld [vmem:[#allocation3 + $0x48] sm:$0xf]  ;;  %v1787_v2 = vld [vmem:[#allocation3] sm:$0xf] }
 0x1bd   : > { %v2533_v61 = vshrl.u32 %v2432_v25, 16  ;;  %v2536_v9 = vshll.u32 %v2432_v25, 16  ;;  %1795 = vst.msk [vmem:[#allocation5] sm:$0xf] %vm1554_vm15, %v1787_v2 }
 0x1be   : > { %v1822_v57 = vrot.slane %v1820_v23, 4  ;;  %v1825_v29 = vrot.slane %v1823_v58, 5  ;;  %v1754_v23 = vld [vmem:[#allocation3 + $0x1c] sm:$0x1] }
 0x1bf   : > { %v2535_v33 = vrot.slane %v2533_v61, 4  ;;  %v2538_v35 = vrot.slane %v2536_v9, 5 }
 0x1c0   : > { %v1826_v31 = vor.u32 %v1825_v29, %v1822_v57 }
 0x1c1   : > { %v2539_v41 = vor.u32 %v2538_v35, %v2535_v33  ;;  %v1760_v33 = vld [vmem:[#allocation3 + $0x24] sm:$0x1] }
 0x1c2   : > { %v1827_v36 = vrot.slane %v1826_v31, 4  ;;  %v1757_v31 = vld [vmem:[#allocation3 + $0x20] sm:$0xf] }
 0x1c3   : > { %v2540_v43 = vrot.slane %v2539_v41, 4 }
 0x1c4   : > { %v1832_v14 = vsel %vm3477_vm13, %v1827_v36, %v1831_v28 }
 0x1c5   : > { %1931 = vrot.lane.b32.xlu0 %v1832_v14, %s3218_s8  ;;  %v2545_v49 = vsel %vm3477_vm13, %v2540_v43, %v2544_v34  ;;  %v1745_v14 = vld [vmem:[#allocation3 + $0x10] sm:$0xf]  ;;  %v1748_v43 = vld [vmem:[#allocation3 + $0x14] sm:$0x1] }
 0x1c6   : > { %2560 = vrot.lane.b32.xlu1 %v2545_v49, %s3226_s7 }
 0x1c9   : > { %2028 = vrot.lane.b32.xlu0 %v1999_v44, %s3224_s17 }
 0x237   : > { %v1932_v59 = vpop.permute.xlu0 %1931 }
 0x238   : > { %1956 = vst.msk [vmem:[#allocation5] sm:$0xf] %vm1955_vm5, %v1932_v59 }
 0x26f   : > { %v3049_v3 = vpop.f32.mrb[0].mxu0 }
 0x270   : > { %v1524_v0 = vadd.f32 %v3049_v3, %v3954_v63  ;;  %v1515_v4 = vpop.f32.mrb[1].mxu0 }
 0x271   : > { %v1516_v8 = vadd.f32 %v3954_v63, %v1515_v4  ;;  %v3050_v10 = vpop.f32.mrb[2].mxu0 }
 0x272   : > { %v1548_v11 = vmax.f32 %v1524_v0, 0.0  ;;  %v1527_v27 = vadd.f32 %v3050_v10, %v3954_v63  ;;  %v1518_v18 = vpop.f32.mrb[3].mxu0 }
 0x273   : > { %v1546_v19 = vmax.f32 %v1516_v8, 0.0  ;;  %v1519_v20 = vadd.f32 %v3954_v63, %v1518_v18 }
 0x274   : > { %v3019_v15 = vpack.c.bf16 %v1548_v11, %v1548_v11  ;;  %v1549_v22 = vmax.f32 %v1527_v27, 0.0 }
 0x275   : > { %v3017_v42 = vpack.c.bf16 %v1546_v19, %v1546_v19  ;;  %v1547_v46 = vmax.f32 %v1519_v20, 0.0 }
 0x276   : > { %v1673_v50 = vshrl.u32 %v3019_v15, 16  ;;  %v3020_v6 = vpack.c.bf16 %v1549_v22, %v1549_v22  ;;  %v1676_v25 = vshll.u32 %v3019_v15, 16 }
 0x277   : > { %v1657_v58 = vshrl.u32 %v3017_v42, 16  ;;  %v3018_v12 = vpack.c.bf16 %v1547_v46, %v1547_v46  ;;  %v1660_v30 = vshll.u32 %v3017_v42, 16 }
 0x278   : > { %v1675_v24 = vrot.slane %v1673_v50, 7  ;;  %v1681_v60 = vshrl.u32 %v3020_v6, 16  ;;  %v1684_v21 = vshll.u32 %v3020_v6, 16 }
 0x279   : > { %v1659_v29 = vrot.slane %v1657_v58, 7  ;;  %v1665_v16 = vshrl.u32 %v3018_v12, 16  ;;  %v1668_v36 = vshll.u32 %v3018_v12, 16 }
 0x27a   : > { %v1678_v61 = vor.u32 %v1676_v25, %v1675_v24  ;;  %v1679_v9 = vrot.slane %v1675_v24, 4  ;;  %v1683_v17 = vrot.slane %v1681_v60, 7 }
 0x27b   : > { %v1662_v28 = vor.u32 %v1660_v30, %v1659_v29  ;;  %v1663_v32 = vrot.slane %v1659_v29, 4  ;;  %v1667_v35 = vrot.slane %v1665_v16, 7 }
 0x27c   : > { %v1752_v38 = vsel %vm3963_vm2, %v1678_v61, %v1751_v7  ;;  %v1755_v40 = vsel %vm3364_vm4, %v1679_v9, %v1754_v23  ;;  %v1686_v41 = vor.u32 %v1684_v21, %v1683_v17  ;;  %v1687_v34 = vrot.slane %v1683_v17, 4  ;;  %v2029_v7 = vpop.permute.xlu0 %2028 }
 0x27d   : > { %1753 = vst [vmem:[#allocation3 + $0x18] sm:$0xf] %v1752_v38  ;;  %1756 = vst [vmem:[#allocation3 + $0x1c] sm:$0x1] %v1755_v40  ;;  %v1740_v44 = vsel %vm3963_vm2, %v1662_v28, %v1739_v26  ;;  %v1743_v47 = vsel %vm3364_vm4, %v1663_v32, %v1742_v13  ;;  %v1670_v48 = vor.u32 %v1668_v36, %v1667_v35  ;;  %v1671_v49 = vrot.slane %v1667_v35, 4 }
 0x27e   : > { %1741 = vst [vmem:[#allocation3 + $0x8] sm:$0xf] %v1740_v44  ;;  %1744 = vst [vmem:[#allocation3 + $0xc] sm:$0x1] %v1743_v47  ;;  %v1758_v51 = vsel %vm3963_vm2, %v1686_v41, %v1757_v31  ;;  %v1761_v52 = vsel %vm3364_vm4, %v1687_v34, %v1760_v33  ;;  %v1775_v28 = vld [vmem:[#allocation3 + $0x38] sm:$0xf] }
 0x27f   : > { %1759 = vst [vmem:[#allocation3 + $0x20] sm:$0xf] %v1758_v51  ;;  %1762 = vst [vmem:[#allocation3 + $0x24] sm:$0x1] %v1761_v52  ;;  %v1746_v39 = vsel %vm3963_vm2, %v1670_v48, %v1745_v14  ;;  %v1749_v53 = vsel %vm3364_vm4, %v1671_v49, %v1748_v43  ;;  %v1778_v32 = vld [vmem:[#allocation3 + $0x3c] sm:$0x1] }
 0x280   : > { %1747 = vst [vmem:[#allocation3 + $0x10] sm:$0xf] %v1746_v39  ;;  %1750 = vst [vmem:[#allocation3 + $0x14] sm:$0x1] %v1749_v53  ;;  %v1763_v14 = vld [vmem:[#allocation3 + $0x28] sm:$0xf] }
 0x281   : > { %2053 = vst.msk [vmem:[#allocation5] sm:$0xf] %vm2052_vm1, %v2029_v7  ;;  %v1766_v43 = vld [vmem:[#allocation3 + $0x2c] sm:$0x1]  ;;  %v1781_v52 = vld [vmem:[#allocation3 + $0x40] sm:$0xf] }
 0x284   : > { %v2370_v54 = vld [vmem:[#allocation3 + $0x18] sm:$0xf]  ;;  %v1971_v56 = vld [vmem:[#allocation3 + $0x1c] sm:$0x1] }
 0x285   : > { %v2063_v55 = vld [vmem:[#allocation3 + $0x18] sm:$0xf]  ;;  %2387 = vrot.lane.b32.xlu1 %v2370_v54, %s3225_s6  ;;  %v3053_v5 = vpop.f32.mrb[4].mxu0  ;;  %v2061_v2 = vld [vmem:[#allocation3 + $0x8] sm:$0xf]  ;;  %v2010_v18 = vrot.slane %v1971_v56, 5 }
 0x286   : > { %v1970_v45 = vld [vmem:[#allocation3 + $0x18] sm:$0xe]  ;;  %2081 = vrot.lane.b32.xlu0 %v2063_v55, %s3217_s27  ;;  %v1540_v3 = vadd.f32 %v3053_v5, %v3954_v63  ;;  %v1531_v0 = vpop.f32.mrb[5].mxu0  ;;  %v2064_v4 = vld [vmem:[#allocation3 + $0x20] sm:$0xf] }
 0x287   : > { %v2978_v8 = vrot.slane %v1970_v45, 9  ;;  %v2275_v10 = vld [vmem:[#allocation3 + $0x18] sm:$0xe]  ;;  %v1532_v11 = vadd.f32 %v3954_v63, %v1531_v0  ;;  %v3054_v27 = vpop.f32.mrb[6].mxu0  ;;  %v2276_v19 = vld [vmem:[#allocation3 + $0x1c] sm:$0x1] }
 0x288   : > { %v2581_v20 = vld [vmem:[#allocation3 + $0x18] sm:$0xe]  ;;  %v1552_v15 = vmax.f32 %v1540_v3, 0.0  ;;  %v1543_v22 = vadd.f32 %v3054_v27, %v3954_v63  ;;  %v1534_v42 = vpop.f32.mrb[7].mxu0  ;;  %v2985_v46 = vrot.slane %v2275_v10, 9  ;;  %v2313_v50 = vrot.slane %v2276_v19, 5 }
 0x289   : > { %2083 = vrot.lane.b32.xlu1 %v2064_v4, %s3217_s27  ;;  %v2582_v6 = vld [vmem:[#allocation3 + $0x1c] sm:$0x1]  ;;  %v1550_v23 = vmax.f32 %v1532_v11, 0.0  ;;  %v1535_v58 = vadd.f32 %v3954_v63, %v1534_v42  ;;  %v2992_v12 = vrot.slane %v2581_v20, 9  ;;  %v3992_v25 = vld [vmem:[#allocation3 + $0x8] sm:$0xe]  ;;  %v2011_v16 = vsel %vm3457_vm10, %v2978_v8, %v2010_v18 }
 0x28a   : > { %2077 = vrot.lane.b32.xlu0 %v2061_v2, %s3217_s27  ;;  %v2617_v24 = vrot.slane %v2582_v6, 5  ;;  %v3023_v26 = vpack.c.bf16 %v1552_v15, %v1552_v15  ;;  %v1553_v60 = vmax.f32 %v1543_v22, 0.0  ;;  %v3995_v29 = vld [vmem:[#allocation3 + $0xc] sm:$0x1]  ;;  %v2371_v61 = vld [vmem:[#allocation3 + $0x20] sm:$0xf]  ;;  %v2314_v21 = vsel %vm3457_vm10, %v2985_v46, %v2313_v50 }
 0x28b   : > { %v3021_v30 = vpack.c.bf16 %v1550_v23, %v1550_v23  ;;  %v1551_v13 = vmax.f32 %v1535_v58, 0.0  ;;  %v3999_v9 = vld [vmem:[#allocation3 + $0x8] sm:$0xe]  ;;  %v2983_v31 = vrot.slane %v3992_v25, 9  ;;  %v2305_v38 = vrot.slane %v3995_v29, 5 }
 0x28c   : > { %v1705_v17 = vshrl.u32 %v3023_v26, 16  ;;  %v3024_v63 = vpack.c.bf16 %v1553_v60, %v1553_v60  ;;  %v2618_v36 = vsel %vm3457_vm10, %v2992_v12, %v2617_v24  ;;  %v1967_v40 = vld [vmem:[#allocation3 + $0xc] sm:$0x1]  ;;  %v1708_v34 = vshll.u32 %v3023_v26, 16  ;;  %v2062_v53 = vld [vmem:[#allocation3 + $0x10] sm:$0xf] }
 0x28d   : > { %2034 = vrot.lane.b32.xlu1 %v2011_v16, %s3224_s17  ;;  %v1689_v33 = vshrl.u32 %v3021_v30, 16  ;;  %v3022_v35 = vpack.c.bf16 %v1551_v13, %v1551_v13  ;;  %v2976_v47 = vrot.slane %v3999_v9, 9  ;;  %v1692_v49 = vshll.u32 %v3021_v30, 16  ;;  %v1784_v56 = vld [vmem:[#allocation3 + $0x44] sm:$0x1] }
 0x28e   : > { %2389 = vrot.lane.b32.xlu0 %v2371_v61, %s3225_s6  ;;  %v1707_v41 = vrot.slane %v1705_v17, 7  ;;  %v1713_v44 = vshrl.u32 %v3024_v63, 16  ;;  %v1716_v51 = vshll.u32 %v3024_v63, 16  ;;  %v2002_v59 = vrot.slane %v1967_v40, 5  ;;  %v1769_v4 = vld [vmem:[#allocation3 + $0x30] sm:$0xf] }
 0x28f   : > { %v1691_v48 = vrot.slane %v1689_v33, 7  ;;  %v1697_v39 = vshrl.u32 %v3022_v35, 16  ;;  %v1700_v0 = vshll.u32 %v3022_v35, 16  ;;  %v1772_v18 = vld [vmem:[#allocation3 + $0x34] sm:$0x1]  ;;  %v2306_v13 = vsel %vm3457_vm10, %v2983_v31, %v2305_v38 }
 0x290   : > { %v1710_v54 = vor.u32 %v1708_v34, %v1707_v41  ;;  %v1711_v55 = vrot.slane %v1707_v41, 4  ;;  %v1715_v45 = vrot.slane %v1713_v44, 7  ;;  %v2369_v19 = vld [vmem:[#allocation3 + $0x10] sm:$0xf]  ;;  %v2583_v46 = vld [vmem:[#allocation3 + $0x20] sm:$0xe]  ;;  %v2003_v16 = vsel %vm3457_vm10, %v2976_v47, %v2002_v59 }
 0x291   : > { %2079 = vrot.lane.b32.xlu1 %v2062_v53, %s3217_s27  ;;  %v1694_v5 = vor.u32 %v1692_v49, %v1691_v48  ;;  %v1695_v2 = vrot.slane %v1691_v48, 4  ;;  %v1699_v3 = vrot.slane %v1697_v39, 7  ;;  %v2584_v50 = vld [vmem:[#allocation3 + $0x24] sm:$0x1]  ;;  %v2277_v23 = vld [vmem:[#allocation3 + $0x20] sm:$0xe] }
 0x292   : > { %2339 = vrot.lane.b32.xlu0 %v2314_v21, %s3227_s14  ;;  %v1776_v8 = vsel %vm3963_vm2, %v1710_v54, %v1775_v28  ;;  %v1779_v10 = vsel %vm3364_vm4, %v1711_v55, %v1778_v32  ;;  %v1718_v11 = vor.u32 %v1716_v51, %v1715_v45  ;;  %v1719_v27 = vrot.slane %v1715_v45, 4  ;;  %v2278_v58 = vld [vmem:[#allocation3 + $0x24] sm:$0x1]  ;;  %v1809_v26 = vld [vmem:[#allocation3 + $0x18] sm:$0xf] }
 0x293   : > { %1777 = vst [vmem:[#allocation3 + $0x38] sm:$0xf] %v1776_v8  ;;  %1780 = vst [vmem:[#allocation3 + $0x3c] sm:$0x1] %v1779_v10  ;;  %v1764_v20 = vsel %vm3963_vm2, %v1694_v5, %v1763_v14  ;;  %v1767_v15 = vsel %vm3364_vm4, %v1695_v2, %v1766_v43  ;;  %v1702_v22 = vor.u32 %v1700_v0, %v1699_v3  ;;  %v1703_v42 = vrot.slane %v1699_v3, 4 }
 0x294   : > { %1765 = vst [vmem:[#allocation3 + $0x28] sm:$0xf] %v1764_v20  ;;  %1768 = vst [vmem:[#allocation3 + $0x2c] sm:$0x1] %v1767_v15  ;;  %v1782_v6 = vsel %vm3963_vm2, %v1718_v11, %v1781_v52  ;;  %v1785_v7 = vsel %vm3364_vm4, %v1719_v27, %v1784_v56  ;;  %v2993_v60 = vrot.slane %v2583_v46, 9  ;;  %v2621_v29 = vrot.slane %v2584_v50, 5 }
 0x295   : > { %2645 = vrot.lane.b32.xlu1 %v2618_v36, %s3228_s21  ;;  %1783 = vst [vmem:[#allocation3 + $0x40] sm:$0xf] %v1782_v6  ;;  %1786 = vst [vmem:[#allocation3 + $0x44] sm:$0x1] %v1785_v7  ;;  %v1770_v12 = vsel %vm3963_vm2, %v1702_v22, %v1769_v4  ;;  %v1773_v24 = vsel %vm3364_vm4, %v1703_v42, %v1772_v18  ;;  %v1972_v30 = vld [vmem:[#allocation3 + $0x20] sm:$0xe] }
 0x296   : > { %2385 = vrot.lane.b32.xlu0 %v2369_v19, %s3225_s6  ;;  %1771 = vst [vmem:[#allocation3 + $0x30] sm:$0xf] %v1770_v12  ;;  %1774 = vst [vmem:[#allocation3 + $0x34] sm:$0x1] %v1773_v24  ;;  %v2986_v61 = vrot.slane %v2277_v23, 9  ;;  %v2317_v57 = vrot.slane %v2278_v58, 5  ;;  %v2622_v25 = vsel %vm3457_vm10, %v2993_v60, %v2621_v29 }
 0x297   : > { %v1973_v9 = vld [vmem:[#allocation3 + $0x24] sm:$0x1]  ;;  %v2273_v17 = vld [vmem:[#allocation3 + $0x10] sm:$0xe]  ;;  %v2274_v1 = vld [vmem:[#allocation3 + $0x14] sm:$0x1] }
 0x298   : > { %v1862_v63 = vshrl.u32 %v1809_v26, 16  ;;  %v1865_v21 = vshll.u32 %v1809_v26, 16  ;;  %v1968_v28 = vld [vmem:[#allocation3 + $0x10] sm:$0xe]  ;;  %v2979_v32 = vrot.slane %v1972_v30, 9  ;;  %v2014_v31 = vrot.slane %v1973_v9, 5 }
 0x299   : > { %2030 = vrot.lane.b32.xlu1 %v2003_v16, %s3224_s17  ;;  %v2984_v33 = vrot.slane %v2273_v17, 9  ;;  %v1969_v35 = vld [vmem:[#allocation3 + $0x14] sm:$0x1]  ;;  %v2318_v36 = vsel %vm3457_vm10, %v2986_v61, %v2317_v57  ;;  %v2309_v38 = vrot.slane %v2274_v1, 5  ;;  %v2114_v34 = vld [vmem:[#allocation3 + $0x18] sm:$0xf] }
 0x29a   : > { %2335 = vrot.lane.b32.xlu0 %v2306_v13, %s3227_s14  ;;  %v1864_v40 = vrot.slane %v1862_v63, 4  ;;  %v1867_v41 = vrot.slane %v1865_v21, 5  ;;  %v2420_v14 = vld [vmem:[#allocation3 + $0x18] sm:$0xf]  ;;  %v2977_v43 = vrot.slane %v1968_v28, 9  ;;  %v2015_v48 = vsel %vm3457_vm10, %v2979_v32, %v2014_v31 }
 0x29b   : > { %v2579_v44 = vld [vmem:[#allocation3 + $0x10] sm:$0xe]  ;;  %v2580_v47 = vld [vmem:[#allocation3 + $0x14] sm:$0x1]  ;;  %v2006_v49 = vrot.slane %v1969_v35, 5  ;;  %v2155_v52 = vshrl.u32 %v2114_v34, 16  ;;  %v2310_v53 = vsel %vm3457_vm10, %v2984_v33, %v2309_v38 }
 0x29c   : > { %v1810_v51 = vld [vmem:[#allocation3 + $0x1c] sm:$0x1]  ;;  %v2158_v39 = vshll.u32 %v2114_v34, 16  ;;  %v1868_v54 = vor.u32 %v1867_v41, %v1864_v40  ;;  %v2449_v55 = vshrl.u32 %v2420_v14, 16  ;;  %v2452_v45 = vshll.u32 %v2420_v14, 16 }
 0x29d   : > { %2341 = vrot.lane.b32.xlu1 %v2318_v36, %s3227_s14  ;;  %v1805_v56 = vld [vmem:[#allocation3 + $0x8] sm:$0xf]  ;;  %v2991_v59 = vrot.slane %v2579_v44, 9  ;;  %v2613_v5 = vrot.slane %v2580_v47, 5  ;;  %v1871_v2 = vshll.u32 %v1810_v51, 16  ;;  %v2007_v3 = vsel %vm3457_vm10, %v2977_v43, %v2006_v49 }
 0x29e   : > { %2647 = vrot.lane.b32.xlu0 %v2622_v25, %s3228_s21  ;;  %v2157_v0 = vrot.slane %v2155_v52, 4  ;;  %v2160_v4 = vrot.slane %v2158_v39, 5  ;;  %v1834_v8 = vshrl.u32 %v1805_v56, 16  ;;  %v2110_v10 = vld [vmem:[#allocation3 + $0x8] sm:$0xf]  ;;  %v1869_v27 = vrot.slane %v1868_v54, 4 }
 0x29f   : > { %v2374_v11 = vld [vmem:[#allocation3 + $0x38] sm:$0xf]  ;;  %v2451_v18 = vrot.slane %v2449_v55, 4  ;;  %v2454_v19 = vrot.slane %v2452_v45, 5  ;;  %v1837_v20 = vshll.u32 %v1805_v56, 16  ;;  %v1873_v15 = vrot.slane %v1871_v2, 5 }
 0x2a0   : > { %v2127_v22 = vshrl.u32 %v2110_v10, 16  ;;  %v2130_v42 = vshll.u32 %v2110_v10, 16  ;;  %v2614_v46 = vsel %vm3457_vm10, %v2991_v59, %v2613_v5  ;;  %v2115_v50 = vld [vmem:[#allocation3 + $0x1c] sm:$0x1]  ;;  %v2161_v6 = vor.u32 %v2160_v4, %v2157_v0  ;;  %v2116_v26 = vld [vmem:[#allocation3 + $0x20] sm:$0xf] }
 0x2a1   : > { %2337 = vrot.lane.b32.xlu1 %v2310_v53, %s3227_s14  ;;  %v2421_v7 = vld [vmem:[#allocation3 + $0x1c] sm:$0x1]  ;;  %v1874_v23 = vsel %vm3477_vm13, %v1869_v27, %v1873_v15  ;;  %v2455_v58 = vor.u32 %v2454_v19, %v2451_v18  ;;  %v1836_v12 = vrot.slane %v1834_v8, 4  ;;  %v1839_v24 = vrot.slane %v1837_v20, 5  ;;  %v2067_v16 = vld [vmem:[#allocation3 + $0x38] sm:$0xf] }
 0x2a2   : > { %2036 = vrot.lane.b32.xlu0 %v2015_v48, %s3224_s17  ;;  %v2164_v60 = vshll.u32 %v2115_v50, 16  ;;  %v2458_v29 = vshll.u32 %v2421_v7, 16  ;;  %v2129_v30 = vrot.slane %v2127_v22, 4  ;;  %v2132_v13 = vrot.slane %v2130_v42, 5  ;;  %v1806_v61 = vld [vmem:[#allocation3 + $0xc] sm:$0x1] }
 0x2a3   : > { %v2169_v57 = vshrl.u32 %v2116_v26, 16  ;;  %v2172_v9 = vshll.u32 %v2116_v26, 16  ;;  %v2372_v17 = vld [vmem:[#allocation3 + $0x28] sm:$0xf]  ;;  %v2162_v1 = vrot.slane %v2161_v6, 4  ;;  %v2456_v63 = vrot.slane %v2455_v58, 4 }
 0x2a4   : > { %v1840_v21 = vor.u32 %v1839_v24, %v1836_v12  ;;  %v2422_v28 = vld [vmem:[#allocation3 + $0x20] sm:$0xf]  ;;  %v2166_v25 = vrot.slane %v2164_v60, 5  ;;  %v2460_v32 = vrot.slane %v2458_v29, 5  ;;  %v1843_v31 = vshll.u32 %v1806_v61, 16 }
 0x2a5   : > { %2395 = vrot.lane.b32.xlu1 %v2374_v11, %s3225_s6  ;;  %v2111_v33 = vld [vmem:[#allocation3 + $0xc] sm:$0x1]  ;;  %v2133_v35 = vor.u32 %v2132_v13, %v2129_v30  ;;  %v2171_v36 = vrot.slane %v2169_v57, 4  ;;  %v2174_v38 = vrot.slane %v2172_v9, 5  ;;  %v2463_v40 = vshrl.u32 %v2422_v28, 16 }
 0x2a6   : > { %2032 = vrot.lane.b32.xlu0 %v2007_v3, %s3224_s17  ;;  %v2466_v41 = vshll.u32 %v2422_v28, 16  ;;  %v2167_v34 = vsel %vm3477_vm13, %v2162_v1, %v2166_v25  ;;  %v2461_v14 = vsel %vm3477_vm13, %v2456_v63, %v2460_v32  ;;  %v1841_v43 = vrot.slane %v1840_v21, 4  ;;  %v1811_v47 = vld [vmem:[#allocation3 + $0x20] sm:$0xf]  ;;  %v2117_v51 = vld [vmem:[#allocation3 + $0x24] sm:$0x1] }
 0x2a7   : > { %v2136_v44 = vshll.u32 %v2111_v33, 16  ;;  %v1845_v48 = vrot.slane %v1843_v31, 5  ;;  %v2134_v49 = vrot.slane %v2133_v35, 4  ;;  %v2175_v52 = vor.u32 %v2174_v38, %v2171_v36  ;;  %v2065_v55 = vld [vmem:[#allocation3 + $0x28] sm:$0xf] }
 0x2a8   : > { %v2465_v39 = vrot.slane %v2463_v40, 4  ;;  %v2468_v53 = vrot.slane %v2466_v41, 5  ;;  %v1876_v45 = vshrl.u32 %v1811_v47, 16  ;;  %v1879_v56 = vshll.u32 %v1811_v47, 16  ;;  %v2112_v5 = vld [vmem:[#allocation3 + $0x10] sm:$0xf] }
 0x2a9   : > { %1937 = vrot.lane.b32.xlu1 %v1874_v23, %s3218_s8  ;;  %v1846_v54 = vsel %vm3477_vm13, %v1841_v43, %v1845_v48  ;;  %v2138_v59 = vrot.slane %v2136_v44, 5  ;;  %v2178_v2 = vshll.u32 %v2117_v51, 16  ;;  %v2423_v3 = vld [vmem:[#allocation3 + $0x24] sm:$0x1]  ;;  %v2068_v0 = vld [vmem:[#allocation3 + $0x40] sm:$0xf] }
 0x2aa   : > { %2643 = vrot.lane.b32.xlu0 %v2614_v46, %s3228_s21  ;;  %v2176_v8 = vrot.slane %v2175_v52, 4  ;;  %v1978_v10 = vld [vmem:[#allocation3 + $0x38] sm:$0xe]  ;;  %v2469_v11 = vor.u32 %v2468_v53, %v2465_v39  ;;  %v1979_v27 = vld [vmem:[#allocation3 + $0x3c] sm:$0x1]  ;;  %v1878_v18 = vrot.slane %v1876_v45, 4 }
 0x2ab   : > { %v2139_v4 = vsel %vm3477_vm13, %v2134_v49, %v2138_v59  ;;  %v1881_v19 = vrot.slane %v1879_v56, 5  ;;  %v2141_v20 = vshrl.u32 %v2112_v5, 16  ;;  %v2144_v15 = vshll.u32 %v2112_v5, 16  ;;  %v1812_v7 = vld [vmem:[#allocation3 + $0x24] sm:$0x1] }
 0x2ac   : > { %v2472_v22 = vshll.u32 %v2423_v3, 16  ;;  %v2180_v42 = vrot.slane %v2178_v2, 5  ;;  %v2982_v46 = vrot.slane %v1978_v10, 9  ;;  %v2026_v50 = vrot.slane %v1979_v27, 5  ;;  %v2375_v58 = vld [vmem:[#allocation3 + $0x40] sm:$0xf] }
 0x2ad   : > { %2391 = vrot.lane.b32.xlu1 %v2372_v17, %s3225_s6  ;;  %v2470_v6 = vrot.slane %v2469_v11, 4  ;;  %v1882_v12 = vor.u32 %v1881_v19, %v1878_v18  ;;  %v2143_v24 = vrot.slane %v2141_v20, 4  ;;  %v2146_v26 = vrot.slane %v2144_v15, 5  ;;  %v1807_v29 = vld [vmem:[#allocation3 + $0x10] sm:$0xf] }
 0x2ae   : > { %2089 = vrot.lane.b32.xlu0 %v2067_v16, %s3217_s27  ;;  %v2181_v23 = vsel %vm3477_vm13, %v2176_v8, %v2180_v42  ;;  %v2474_v60 = vrot.slane %v2472_v22, 5  ;;  %v1885_v30 = vshll.u32 %v1812_v7, 16  ;;  %v2027_v13 = vsel %vm3457_vm10, %v2982_v46, %v2026_v50  ;;  %v2113_v61 = vld [vmem:[#allocation3 + $0x14] sm:$0x1]  ;;  %v2283_v57 = vld [vmem:[#allocation3 + $0x38] sm:$0xe] }
 0x2af   : > { %v2418_v9 = vld [vmem:[#allocation3 + $0x10] sm:$0xf]  ;;  %v1883_v17 = vrot.slane %v1882_v12, 4  ;;  %v2147_v1 = vor.u32 %v2146_v26, %v2143_v24  ;;  %v2284_v63 = vld [vmem:[#allocation3 + $0x3c] sm:$0x1]  ;;  %v1848_v21 = vshrl.u32 %v1807_v29, 16 }
 0x2b0   : > { %v2475_v16 = vsel %vm3477_vm13, %v2470_v6, %v2474_v60  ;;  %v1851_v28 = vshll.u32 %v1807_v29, 16  ;;  %v1887_v25 = vrot.slane %v1885_v30, 5  ;;  %v2150_v32 = vshll.u32 %v2113_v61, 16  ;;  %v2066_v35 = vld [vmem:[#allocation3 + $0x30] sm:$0xf] }
 0x2b1   : > { %2548 = vrot.lane.b32.xlu1 %v2461_v14, %s3226_s7  ;;  %v2435_v31 = vshrl.u32 %v2418_v9, 16  ;;  %v2438_v33 = vshll.u32 %v2418_v9, 16  ;;  %v2989_v36 = vrot.slane %v2283_v57, 9  ;;  %v2329_v38 = vrot.slane %v2284_v63, 5  ;;  %v2585_v40 = vld [vmem:[#allocation3 + $0x28] sm:$0xe] }
 0x2b2   : > { %2242 = vrot.lane.b32.xlu0 %v2167_v34, %s3223_s16  ;;  %v1888_v41 = vsel %vm3477_vm13, %v1883_v17, %v1887_v25  ;;  %v2148_v34 = vrot.slane %v2147_v1, 4  ;;  %v2586_v14 = vld [vmem:[#allocation3 + $0x2c] sm:$0x1]  ;;  %v1850_v43 = vrot.slane %v1848_v21, 4  ;;  %v1853_v44 = vrot.slane %v1851_v28, 5  ;;  %v3137_v42 = vld [vmem:[%s4347_s3] sm:$0xff]  }
 0x2b3   : > { %v1808_v47 = vld [vmem:[#allocation3 + $0x14] sm:$0x1]  ;;  %v2152_v48 = vrot.slane %v2150_v32, 5  ;;  %v2437_v51 = vrot.slane %v2435_v31, 4  ;;  %v2440_v52 = vrot.slane %v2438_v33, 5  ;;  %v2994_v39 = vrot.slane %v2585_v40, 9  ;;  %3055 = vmatprep.subr.bf16.mxu1 %v3137_v42 }
 0x2b4   : > { %v2419_v49 = vld [vmem:[#allocation3 + $0x14] sm:$0x1]  ;;  %v2625_v53 = vrot.slane %v2586_v14, 5  ;;  %v1854_v45 = vor.u32 %v1853_v44, %v1850_v43  ;;  %v1857_v56 = vshll.u32 %v1808_v47, 16  ;;  %v1974_v59 = vld [vmem:[#allocation3 + $0x28] sm:$0xe]  ;;  %3056 = vmatpush3.bf16.msra.mxu1 %v3137_v42 }
 0x2b5   : > { %1933 = vrot.lane.b32.xlu1 %v1846_v54, %s3218_s8  ;;  %v2153_v54 = vsel %vm3477_vm13, %v2148_v34, %v2152_v48  ;;  %v1817_v5 = vld [vmem:[#allocation3 + $0x38] sm:$0xf]  ;;  %v1975_v2 = vld [vmem:[#allocation3 + $0x2c] sm:$0x1]  ;;  %v2444_v3 = vshll.u32 %v2419_v49, 16  ;;  %v2441_v8 = vor.u32 %v2440_v52, %v2437_v51  ;;  %v2980_v19 = vrot.slane %v1974_v59, 9 }
 0x2b6   : > { %2085 = vrot.lane.b32.xlu0 %v2065_v55, %s3217_s27  ;;  %v2330_v55 = vsel %vm3457_vm10, %v2989_v36, %v2329_v38  ;;  %v2286_v10 = vld [vmem:[#allocation3 + $0x44] sm:$0x1]  ;;  %v2279_v11 = vld [vmem:[#allocation3 + $0x28] sm:$0xe]  ;;  %v2280_v27 = vld [vmem:[#allocation3 + $0x2c] sm:$0x1]  ;;  %v2626_v18 = vsel %vm3457_vm10, %v2994_v39, %v2625_v53 }
 0x2b7   : > { %v4098_v20 = vld [vmem:[#allocation3 + $0x30] sm:$0xe]  ;;  %v1918_v15 = vshrl.u32 %v1817_v5, 16  ;;  %v1921_v22 = vshll.u32 %v1817_v5, 16  ;;  %v1855_v46 = vrot.slane %v1854_v45, 4  ;;  %v1859_v50 = vrot.slane %v1857_v56, 5 }
 0x2b8   : > { %v2018_v6 = vrot.slane %v1975_v2, 5  ;;  %v2333_v12 = vrot.slane %v2286_v10, 5  ;;  %v2987_v24 = vrot.slane %v2279_v11, 9  ;;  %v2321_v26 = vrot.slane %v2280_v27, 5  ;;  %v4105_v60 = vld [vmem:[#allocation3 + $0x34] sm:$0x1] }
 0x2b9   : > { %2091 = vrot.lane.b32.xlu1 %v2068_v0, %s3217_s27  ;;  %v2285_v0 = vld [vmem:[#allocation3 + $0x40] sm:$0xe]  ;;  %v2122_v29 = vld [vmem:[#allocation3 + $0x38] sm:$0xf]  ;;  %v2442_v30 = vrot.slane %v2441_v8, 4  ;;  %v4110_v9 = vrot.slane %v1918_v15, 4  ;;  %v1860_v28 = vsel %vm3477_vm13, %v1855_v46, %v1859_v50 }
 0x2ba   : > { %2238 = vrot.lane.b32.xlu0 %v2139_v4, %s3223_s16  ;;  %v2373_v4 = vld [vmem:[#allocation3 + $0x30] sm:$0xf]  ;;  %v2990_v7 = vrot.slane %v2285_v0, 9  ;;  %v2424_v61 = vld [vmem:[#allocation3 + $0x28] sm:$0xf]  ;;  %v4112_v17 = vrot.slane %v1921_v22, 5  ;;  %v2019_v25 = vsel %vm3457_vm10, %v2980_v19, %v2018_v6  ;;  %v2322_v39 = vsel %vm3457_vm10, %v2987_v24, %v2321_v26 }
 0x2bb   : > { %v1790_v57 = vld [vmem:[#allocation3 + $0x18] sm:$0xf]  ;;  %v1788_v21 = vld [vmem:[#allocation3 + $0x8] sm:$0xf]  ;;  %v2211_v32 = vshrl.u32 %v2122_v29, 16  ;;  %v2214_v31 = vshll.u32 %v2122_v29, 16 }
 0x2bc   : > { %1798 = vst.msk [vmem:[#allocation5 + $0xc] sm:$0xf] %vm1554_vm15, %v1790_v57  ;;  %1796 = vst.msk [vmem:[#allocation5 + $0x4] sm:$0xf] %vm1554_vm15, %v1788_v21  ;;  %v1791_v33 = vld [vmem:[#allocation3 + $0x20] sm:$0xf]  ;;  %v2334_v14 = vsel %vm3457_vm10, %v2990_v7, %v2333_v12  ;;  %v1924_v53 = vor.u32 %v4112_v17, %v4110_v9 }
 0x2bd   : > { %2244 = vrot.lane.b32.xlu1 %v2181_v23, %s3223_s16  ;;  %v2428_v23 = vld [vmem:[#allocation3 + $0x38] sm:$0xf]  ;;  %v4122_v36 = vld [vmem:[#allocation3 + $0x30] sm:$0xe]  ;;  %v4124_v38 = vld [vmem:[#allocation3 + $0x34] sm:$0x1] }
 0x2be   : > { %2397 = vrot.lane.b32.xlu0 %v2375_v58, %s3225_s6  ;;  %v2446_v58 = vrot.slane %v2444_v3, 5  ;;  %v2505_v1 = vshrl.u32 %v2428_v23, 16  ;;  %v2508_v63 = vshll.u32 %v2428_v23, 16  ;;  %v2477_v40 = vshrl.u32 %v2424_v61, 16  ;;  %1799 = vst.msk [vmem:[#allocation5 + $0x10] sm:$0xf] %vm1554_vm15, %v1791_v33 }
 0x2bf   : > { %v1794_v34 = vld [vmem:[#allocation3 + $0x38] sm:$0xf]  ;;  %v2325_v43 = vrot.slane %v4105_v60, 5  ;;  %v4131_v44 = vld [vmem:[#allocation3 + $0x30] sm:$0xe]  ;;  %v3140_v45 = vld [vmem:[%s4347_s3 + $0x10] sm:$0xff]  }
 0x2c0   : > { %v2429_v47 = vld [vmem:[#allocation3 + $0x3c] sm:$0x1]  ;;  %v2118_v48 = vld [vmem:[#allocation3 + $0x28] sm:$0xf]  ;;  %1802 = vst.msk [vmem:[#allocation5 + $0x1c] sm:$0xf] %vm1554_vm15, %v1794_v34  ;;  %v2447_v52 = vsel %vm3477_vm13, %v2442_v30, %v2446_v58 }
 0x2c1   : > { %2042 = vrot.lane.b32.xlu1 %v2027_v13, %s3224_s17  ;;  %v2988_v13 = vrot.slane %v4098_v20, 9  ;;  %v3138_v49 = vld [vmem:[%s4347_s3 + $0x8] sm:$0xff]   ;;  %v1792_v51 = vld [vmem:[#allocation3 + $0x28] sm:$0xf]  ;;  %v1793_v56 = vld [vmem:[#allocation3 + $0x30] sm:$0xf] }
 0x2c2   : > { %2550 = vrot.lane.b32.xlu0 %v2475_v16, %s3226_s7  ;;  %v4108_v16 = vld [vmem:[#allocation3 + $0x3c] sm:$0x1]  ;;  %1800 = vst.msk [vmem:[#allocation5 + $0x14] sm:$0xf] %vm1554_vm15, %v1792_v51  ;;  %v2507_v59 = vrot.slane %v2505_v1, 4  ;;  %v2510_v5 = vrot.slane %v2508_v63, 5  ;;  %3057 = vmatprep.subr.bf16.mxu1 %v3138_v49 }
 0x2c3   : > { %v2123_v2 = vld [vmem:[#allocation3 + $0x3c] sm:$0x1]  ;;  %v2213_v3 = vrot.slane %v2211_v32, 4  ;;  %v2216_v0 = vrot.slane %v2214_v31, 5  ;;  %1801 = vst.msk [vmem:[#allocation5 + $0x18] sm:$0xf] %vm1554_vm15, %v1793_v56  ;;  %3058 = vmatpush3.bf16.msra.mxu1 %v3138_v49  ;;  %v2326_v42 = vsel %vm3457_vm10, %v2988_v13, %v2325_v43 }
 0x2c4   : > { %v2479_v8 = vrot.slane %v2477_v40, 4  ;;  %v2183_v11 = vshrl.u32 %v2118_v48, 16  ;;  %v2186_v27 = vshll.u32 %v2118_v48, 16  ;;  %v2022_v19 = vrot.slane %v4124_v38, 5  ;;  %v2430_v7 = vld [vmem:[#allocation3 + $0x40] sm:$0xf]  ;;  %3059 = vmatprep.subr.bf16.mxu1 %v3140_v45 }
 0x2c5   : > { %2087 = vrot.lane.b32.xlu1 %v2066_v35, %s3217_s27  ;;  %v1789_v35 = vld [vmem:[#allocation3 + $0x10] sm:$0xf]  ;;  %v2995_v46 = vrot.slane %v4131_v44, 9  ;;  %v2514_v50 = vshll.u32 %v2429_v47, 16  ;;  %v2220_v6 = vshll.u32 %v2123_v2, 16  ;;  %v1925_v23 = vrot.slane %v1924_v53, 4 }
 0x2c6   : > { %1939 = vrot.lane.b32.xlu0 %v1888_v41, %s3218_s8  ;;  %v2480_v41 = vshll.u32 %v2424_v61, 16  ;;  %1797 = vst.msk [vmem:[#allocation5 + $0x8] sm:$0xf] %vm1554_vm15, %v1789_v35  ;;  %v2511_v24 = vor.u32 %v2510_v5, %v2507_v59  ;;  %v2124_v26 = vld [vmem:[#allocation3 + $0x40] sm:$0xf]  ;;  %v2217_v60 = vor.u32 %v2216_v0, %v2213_v3  ;;  %v2185_v30 = vrot.slane %v2183_v11, 4 }
 0x2c7   : > { %v2425_v20 = vld [vmem:[#allocation3 + $0x2c] sm:$0x1]  ;;  %v2188_v13 = vrot.slane %v2186_v27, 5  ;;  %v2519_v9 = vshrl.u32 %v2430_v7, 16  ;;  %v2522_v17 = vshll.u32 %v2430_v7, 16  ;;  %3060 = vmatpush3.bf16.msra.mxu1 %v3140_v45  ;;  %v2516_v1 = vrot.slane %v2514_v50, 5 }
 0x2c8   : > { %v2482_v10 = vrot.slane %v2480_v41, 5  ;;  %v2222_v63 = vrot.slane %v2220_v6, 5  ;;  %v2225_v21 = vshrl.u32 %v2124_v26, 16  ;;  %v2512_v31 = vrot.slane %v2511_v24, 4  ;;  %v2119_v35 = vld [vmem:[#allocation3 + $0x2c] sm:$0x1] }
 0x2c9   : > { %2240 = vrot.lane.b32.xlu1 %v2153_v54, %s3223_s16  ;;  %v1927_v54 = vshll.u32 %v4108_v16, 16  ;;  %v3141_v16 = vld [vmem:[%s4347_s3 + $0x18] sm:$0xff]   ;;  %v2486_v33 = vshll.u32 %v2425_v20, 16  ;;  %v2218_v40 = vrot.slane %v2217_v60, 4  ;;  %v2189_v34 = vor.u32 %v2188_v13, %v2185_v30  ;;  %v2120_v43 = vld [vmem:[#allocation3 + $0x30] sm:$0xf] }
 0x2ca   : > { %2347 = vrot.lane.b32.xlu0 %v2330_v55, %s3227_s14  ;;  %v1813_v55 = vld [vmem:[#allocation3 + $0x28] sm:$0xf]  ;;  %v2483_v29 = vor.u32 %v2482_v10, %v2479_v8  ;;  %3061 = vmatprep.subr.bf16.mxu1 %v3141_v16  ;;  %v2521_v47 = vrot.slane %v2519_v9, 4  ;;  %v2524_v48 = vrot.slane %v2522_v17, 5  ;;  %v3142_v49 = vld [vmem:[%s4347_s3 + $0x20] ss:$0 sps:$4 sm:$0xff]  }
 0x2cb   : > { %v1890_v15 = vshrl.u32 %v1813_v55, 16  ;;  %v1893_v22 = vshll.u32 %v1813_v55, 16  ;;  %v1929_v58 = vrot.slane %v1927_v54, 5  ;;  %3062 = vmatpush3.bf16.msra.mxu1 %v3141_v16  ;;  %vm2760_vm4 = vcmask 1043456   ;;  %v2426_v3 = vld [vmem:[#allocation3 + $0x30] sm:$0xf] }
 0x2cc   : > { %v2484_v41 = vrot.slane %v2483_v29, 4  ;;  %v2227_v51 = vrot.slane %v2225_v21, 4  ;;  %v2517_v54 = vsel %vm3477_vm13, %v2512_v31, %v2516_v1  ;;  %v2488_v55 = vrot.slane %v2486_v33, 5  ;;  %3074 = vmatprep.subr.msk.bf16.mxu1 %vm2760_vm4, %v3142_v49  ;;  %v2431_v10 = vld [vmem:[#allocation3 + $0x44] sm:$0x1] }
 0x2cd   : > { %2649 = vrot.lane.b32.xlu1 %v2626_v18, %s3228_s21  ;;  %v2981_v18 = vrot.slane %v4122_v36, 9  ;;  %v1892_v61 = vrot.slane %v1890_v15, 4  ;;  %v1895_v57 = vrot.slane %v1893_v22, 5  ;;  %v1930_v32 = vsel %vm3477_vm13, %v1925_v23, %v1929_v58  ;;  %v1815_v36 = vld [vmem:[#allocation3 + $0x30] sm:$0xf] }
 0x2ce   : > { %2393 = vrot.lane.b32.xlu0 %v2373_v4, %s3225_s6  ;;  %v2588_v4 = vld [vmem:[#allocation3 + $0x34] sm:$0x1]  ;;  %v1907_v53 = vshll.u32 %v1815_v36, 16  ;;  %v2197_v45 = vshrl.u32 %v2120_v43, 16  ;;  %v2200_v56 = vshll.u32 %v2120_v43, 16  ;;  %v2223_v59 = vsel %vm3477_vm13, %v2218_v40, %v2222_v63 }
 0x2cf   : > { %v2629_v12 = vrot.slane %v2588_v4, 5  ;;  %v1896_v44 = vor.u32 %v1895_v57, %v1892_v61  ;;  %v2192_v5 = vshll.u32 %v2119_v35, 16  ;;  %v2489_v0 = vsel %vm3477_vm13, %v2484_v41, %v2488_v55  ;;  %v2125_v27 = vld [vmem:[#allocation3 + $0x44] sm:$0x1]  ;;  %v1816_v29 = vld [vmem:[#allocation3 + $0x34] sm:$0x1] }
 0x2d0   : > { %v2190_v4 = vrot.slane %v2189_v34, 4  ;;  %v2525_v11 = vor.u32 %v2524_v48, %v2521_v47  ;;  %v1909_v15 = vrot.slane %v1907_v53, 5  ;;  %v2762_v22 = vsel %vm2760_vm4, %v3142_v49, 0  ;;  %v2121_v30 = vld [vmem:[#allocation3 + $0x34] sm:$0x1] }
 0x2d1   : > { %2038 = vrot.lane.b32.xlu1 %v2019_v25, %s3224_s17  ;;  %v2023_v25 = vsel %vm3457_vm10, %v2981_v18, %v2022_v19  ;;  %v2630_v38 = vsel %vm3457_vm10, %v2995_v46, %v2629_v12  ;;  %v1897_v8 = vrot.slane %v1896_v44, 4  ;;  %v2202_v46 = vrot.slane %v2200_v56, 5  ;;  %3064 = vmatpush3.bf16.msra.mxu1 %v2762_v22  ;;  %v2593_v43 = vld [vmem:[#allocation3 + $0x48] sm:$0xe]  ;;  %v2594_v44 = vld [vmem:[#allocation3 + $0x4c] sm:$0x1] }
 0x2d2   : > { %1935 = vrot.lane.b32.xlu0 %v1860_v28, %s3218_s8  ;;  %v2228_v28 = vshll.u32 %v2124_v26, 16  ;;  %v2491_v50 = vshrl.u32 %v2426_v3, 16  ;;  %v2494_v6 = vshll.u32 %v2426_v3, 16  ;;  %v2194_v7 = vrot.slane %v2192_v5, 5  ;;  %v2592_v53 = vld [vmem:[#allocation3 + $0x44] sm:$0x1] }
 0x2d3   : > { %v2528_v58 = vshll.u32 %v2431_v10, 16  ;;  %v2234_v12 = vshll.u32 %v2125_v27, 16  ;;  %v2526_v60 = vrot.slane %v2525_v11, 4  ;;  %v1913_v1 = vshll.u32 %v1816_v29, 16 }
 0x2d4   : > { %v2195_v24 = vsel %vm3477_vm13, %v2190_v4, %v2194_v7  ;;  %v2493_v61 = vrot.slane %v2491_v50, 4  ;;  %v2496_v57 = vrot.slane %v2494_v6, 5  ;;  %v2206_v63 = vshll.u32 %v2121_v30, 16 }
 0x2d5   : > { %2349 = vrot.lane.b32.xlu1 %v2334_v14, %s3227_s14  ;;  %v1814_v14 = vld [vmem:[#allocation3 + $0x2c] sm:$0x1]  ;;  %v2530_v9 = vrot.slane %v2528_v58, 5  ;;  %v2236_v17 = vrot.slane %v2234_v12, 5  ;;  %v1915_v40 = vrot.slane %v1913_v1, 5  ;;  %v2998_v55 = vrot.slane %v2593_v43, 9 }
 0x2d6   : > { %2546 = vrot.lane.b32.xlu0 %v2447_v52, %s3226_s7  ;;  %v2230_v52 = vrot.slane %v2228_v28, 5  ;;  %v1899_v2 = vshll.u32 %v1814_v14, 16  ;;  %v4194_v28 = vpop.permute.xlu1 %2399  ;;  %v2497_v35 = vor.u32 %v2496_v57, %v2493_v61  ;;  %v2208_v41 = vrot.slane %v2206_v63, 5 }
 0x2d7   : > { %v2531_v21 = vsel %vm3477_vm13, %v2526_v60, %v2530_v9 }
 0x2d8   : > { %v2231_v18 = vor.u32 %v2230_v52, %v2227_v51  ;;  %v1901_v23 = vrot.slane %v1899_v2, 5  ;;  %v2498_v49 = vrot.slane %v2497_v35, 4  ;;  %v2637_v2 = vrot.slane %v2592_v53, 5 }
 0x2d9   : > { %2345 = vrot.lane.b32.xlu1 %v2326_v42, %s3227_s14  ;;  %v2199_v42 = vrot.slane %v2197_v45, 4  ;;  %v2641_v45 = vrot.slane %v2594_v44, 5 }
 0x2da   : > { %2343 = vrot.lane.b32.xlu0 %v2322_v39, %s3227_s14  ;;  %v1904_v39 = vshrl.u32 %v1815_v36, 16  ;;  %v1902_v26 = vsel %vm3477_vm13, %v1897_v8, %v1901_v23  ;;  %v2232_v20 = vrot.slane %v2231_v18, 4  ;;  %v2589_v36 = vld [vmem:[#allocation3 + $0x38] sm:$0xe]  ;;  %v4206_v52 = vpop.permute.xlu1 %2560 }
 0x2db   : > { %v2203_v16 = vor.u32 %v2202_v46, %v2199_v42  ;;  %v2996_v14 = vrot.slane %v2589_v36, 9  ;;  %v2642_v3 = vsel %vm3457_vm10, %v2998_v55, %v2641_v45 }
 0x2dc   : > { %v1906_v19 = vrot.slane %v1904_v39, 4  ;;  %v2591_v39 = vld [vmem:[#allocation3 + $0x40] sm:$0xe] }
 0x2dd   : > { %1945 = vrot.lane.b32.xlu1 %v1930_v32, %s3218_s8  ;;  %v2237_v32 = vsel %vm3477_vm13, %v2232_v20, %v2236_v17  ;;  %v2204_v33 = vrot.slane %v2203_v16, 4  ;;  %v2997_v5 = vrot.slane %v2591_v39, 9 }
 0x2de   : > { %2040 = vrot.lane.b32.xlu0 %v2023_v25, %s3224_s17  ;;  %v1910_v13 = vor.u32 %v1909_v15, %v1906_v19  ;;  %v2427_v25 = vld [vmem:[#allocation3 + $0x34] sm:$0x1]  ;;  %s3016_s17 = sshll.u32 %s4374_s22, 6 }
 0x2df   : > { %v2500_v34 = vshll.u32 %v2427_v25, 16  ;;  %v2209_v48 = vsel %vm3477_vm13, %v2204_v33, %v2208_v41  ;;  %v2638_v37 = vsel %vm3457_vm10, %v2997_v5, %v2637_v2 }
 0x2e0   : > { %v1911_v31 = vrot.slane %v1910_v13, 4 }
 0x2e1   : > { %2556 = vrot.lane.b32.xlu1 %v2517_v54, %s3226_s7  ;;  %v2502_v54 = vrot.slane %v2500_v34, 5 }
 0x2e2   : > { %2651 = vrot.lane.b32.xlu0 %v2630_v38, %s3228_s21  ;;  %v2590_v38 = vld [vmem:[#allocation3 + $0x3c] sm:$0x1]  ;;  %v1916_v47 = vsel %vm3477_vm13, %v1911_v31, %v1915_v40 }
 0x2e3   : > { %v2633_v51 = vrot.slane %v2590_v38, 5  ;;  %v2503_v56 = vsel %vm3477_vm13, %v2498_v49, %v2502_v54  ;;  %vm2101_vm13 = vcmask 257216  }
 0x2e5   : > { %2552 = vrot.lane.b32.xlu1 %v2489_v0, %s3226_s7 }
 0x2e6   : > { %2250 = vrot.lane.b32.xlu0 %v2223_v59, %s3223_s16  ;;  %v2634_v59 = vsel %vm3457_vm10, %v2996_v14, %v2633_v51  ;;  %vm2262_vm10 = vcmask 322816  }
 0x2e9   : > { %1941 = vrot.lane.b32.xlu1 %v1902_v26, %s3218_s8 }
 0x2ea   : > { %2246 = vrot.lane.b32.xlu0 %v2195_v24, %s3223_s16 }
 0x2ed   : > { %2252 = vrot.lane.b32.xlu1 %v2237_v32, %s3223_s16 }
 0x2ee   : > { %2558 = vrot.lane.b32.xlu0 %v2531_v21, %s3226_s7 }
 0x2f1   : > { %2248 = vrot.lane.b32.xlu1 %v2209_v48, %s3223_s16 }
 0x2f2   : > { %1943 = vrot.lane.b32.xlu0 %v1916_v47, %s3218_s8 }
 0x2f5   : > { %2653 = vrot.lane.b32.xlu1 %v2634_v59, %s3228_s21 }
 0x2f6   : > { %2554 = vrot.lane.b32.xlu0 %v2503_v56, %s3226_s7  ;;  %s244_s7 = scalar_lea.vmem %s4349_s5, %s3016_s17 }
 0x2f7   : > { %v4216_v0 = vpop.permute.xlu1 %2387 }
 0x2f8   : > { %v4218_v4 = vpop.permute.xlu0 %2081 }
 0x2f9   : > { %2657 = vrot.lane.b32.xlu1 %v2642_v3, %s3228_s21 }
 0x2fa   : > { %2655 = vrot.lane.b32.xlu0 %v2638_v37, %s3228_s21 }
 0x2fb   : > { %v2084_v8 = vpop.permute.xlu1 %2083 }
 0x2fc   : > { %v2078_v10 = vpop.permute.xlu0 %2077 }
 0x2fd   : > { %2102 = vst.msk [vmem:[#allocation5] sm:$0xf] %vm2101_vm13, %v2078_v10 }
 0x2ff   : > { %v2035_v11 = vpop.permute.xlu1 %2034 }
 0x300   : > { %v4225_v27 = vpop.permute.xlu0 %2389 }
 0x303   : > { %v2080_v18 = vpop.permute.xlu1 %2079 }
 0x304   : > { %v4227_v19 = vpop.permute.xlu0 %2339 }
 0x307   : > { %v2646_v15 = vpop.permute.xlu1 %2645 }
 0x308   : > { %v2386_v22 = vpop.permute.xlu0 %2385 }
 0x30b   : > { %v2031_v42 = vpop.permute.xlu1 %2030 }
 0x30c   : > { %v2336_v62 = vpop.permute.xlu0 %2335 }
 0x30f   : > { %v2342_v46 = vpop.permute.xlu1 %2341 }
 0x310   : > { %v4229_v50 = vpop.permute.xlu0 %2647 }
 0x313   : > { %v2338_v6 = vpop.permute.xlu1 %2337 }
 0x314   : > { %v2037_v7 = vpop.permute.xlu0 %2036 }
 0x317   : > { %v4231_v23 = vpop.permute.xlu1 %2395 }
 0x318   : > { %v2033_v58 = vpop.permute.xlu0 %2032 }
 0x31b   : > { %v1938_v12 = vpop.permute.xlu1 %1937 }
 0x31c   : > { %v2644_v24 = vpop.permute.xlu0 %2643  ;;  %1959 = vst.msk [vmem:[#allocation5 + $0xc] sm:$0xf] %vm1955_vm5, %v1938_v12 }
 0x31d   : > { %2056 = vst.msk [vmem:[#allocation5 + $0xc] sm:$0xf] %vm2052_vm1, %v2035_v11 }
 0x31e   : > { %2105 = vst.msk [vmem:[#allocation5 + $0xc] sm:$0xf] %vm2101_vm13, %v2084_v8 }
 0x31f   : > { %v2392_v26 = vpop.permute.xlu1 %2391 }
 0x320   : > { %v4236_v60 = vpop.permute.xlu0 %2089 }
 0x323   : > { %v2549_v20 = vpop.permute.xlu1 %2548 }
 0x324   : > { %v2243_v29 = vpop.permute.xlu0 %2242 }
 0x327   : > { %v1934_v30 = vpop.permute.xlu1 %1933 }
 0x328   : > { %v2086_v13 = vpop.permute.xlu0 %2085  ;;  %1957 = vst.msk [vmem:[#allocation5 + $0x4] sm:$0xf] %vm1955_vm5, %v1934_v30 }
 0x329   : > { %2054 = vst.msk [vmem:[#allocation5 + $0x4] sm:$0xf] %vm2052_vm1, %v2031_v42 }
 0x32a   : > { %2103 = vst.msk [vmem:[#allocation5 + $0x4] sm:$0xf] %vm2101_vm13, %v2080_v18 }
 0x32b   : > { %v2092_v16 = vpop.permute.xlu1 %2091 }
 0x32c   : > { %v2239_v61 = vpop.permute.xlu0 %2238 }
 0x32d   : > { %2263 = vst.msk [vmem:[#allocation5] sm:$0xf] %vm2262_vm10, %v2239_v61 }
 0x32e   : > { %2360 = vst.msk [vmem:[#allocation5] sm:$0xf] %vm2359_vm0, %v2336_v62 }
 0x32f   : > { %2410 = vst.msk [vmem:[#allocation5] sm:$0xf] %vm2409_vm3, %v2386_v22  ;;  %v2245_v57 = vpop.permute.xlu1 %2244 }
 0x330   : > { %v4244_v9 = vpop.permute.xlu0 %2397  ;;  %2266 = vst.msk [vmem:[#allocation5 + $0xc] sm:$0xf] %vm2262_vm10, %v2245_v57 }
 0x331   : > { %2363 = vst.msk [vmem:[#allocation5 + $0xc] sm:$0xf] %vm2359_vm0, %v2342_v46 }
 0x332   : > { %2413 = vst.msk [vmem:[#allocation5 + $0xc] sm:$0xf] %vm2409_vm3, %v2392_v26 }
 0x333   : > { %v2043_v17 = vpop.permute.xlu1 %2042 }
 0x334   : > { %v2551_v1 = vpop.permute.xlu0 %2550 }
 0x337   : > { %v2088_v63 = vpop.permute.xlu1 %2087 }
 0x338   : > { %v1940_v21 = vpop.permute.xlu0 %1939 }
 0x339   : > { %1960 = vst.msk [vmem:[#allocation5 + $0x10] sm:$0xf] %vm1955_vm5, %v1940_v21 }
 0x33a   : > { %2057 = vst.msk [vmem:[#allocation5 + $0x10] sm:$0xf] %vm2052_vm1, %v2037_v7 }
 0x33b   : > { %2106 = vst.msk [vmem:[#allocation5 + $0x10] sm:$0xf] %vm2101_vm13, %v2086_v13  ;;  %v2241_v25 = vpop.permute.xlu1 %2240 }
 0x33c   : > { %v4252_v32 = vpop.permute.xlu0 %2347  ;;  %2264 = vst.msk [vmem:[#allocation5 + $0x4] sm:$0xf] %vm2262_vm10, %v2241_v25 }
 0x33d   : > { %2361 = vst.msk [vmem:[#allocation5 + $0x4] sm:$0xf] %vm2359_vm0, %v2338_v6 }
 0x33e   : > { %2411 = vst.msk [vmem:[#allocation5 + $0x4] sm:$0xf] %vm2409_vm3, %v4216_v0 }
 0x33f   : > { %2572 = vst.msk [vmem:[#allocation5 + $0x4] sm:$0xf] %vm2570_vm6, %v2549_v20  ;;  %v2650_v31 = vpop.permute.xlu1 %2649 }
 0x340   : > { %v2394_v33 = vpop.permute.xlu0 %2393  ;;  %2669 = vst.msk [vmem:[#allocation5 + $0x4] sm:$0xf] %vm2667_vm7, %v2646_v15 }
 0x343   : > { %v2039_v35 = vpop.permute.xlu1 %2038 }
 0x344   : > { %v1936_v36 = vpop.permute.xlu0 %1935 }
 0x345   : > { %1958 = vst.msk [vmem:[#allocation5 + $0x8] sm:$0xf] %vm1955_vm5, %v1936_v36 }
 0x346   : > { %2055 = vst.msk [vmem:[#allocation5 + $0x8] sm:$0xf] %vm2052_vm1, %v2033_v58 }
 0x347   : > { %2104 = vst.msk [vmem:[#allocation5 + $0x8] sm:$0xf] %vm2101_vm13, %v4218_v4  ;;  %v2350_v38 = vpop.permute.xlu1 %2349  ;;  %v2999_v4 = vld [vmem:[%s4348_s4] ss:$0 sm:$0xff] }
 0x348   : > { %2265 = vst.msk [vmem:[#allocation5 + $0x8] sm:$0xf] %vm2262_vm10, %v2243_v29  ;;  %v2547_v40 = vpop.permute.xlu0 %2546 }
 0x349   : > { %2362 = vst.msk [vmem:[#allocation5 + $0x8] sm:$0xf] %vm2359_vm0, %v4227_v19 }
 0x34a   : > { %2571 = vst.msk [vmem:[#allocation5] sm:$0xf] %vm2570_vm6, %v2547_v40 }
 0x34b   : > { %2412 = vst.msk [vmem:[#allocation5 + $0x8] sm:$0xf] %vm2409_vm3, %v4225_v27  ;;  %v2346_v41 = vpop.permute.xlu1 %2345 }
 0x34c   : > { %2668 = vst.msk [vmem:[#allocation5] sm:$0xf] %vm2667_vm7, %v2644_v24  ;;  %v2344_v34 = vpop.permute.xlu0 %2343 }
 0x34d   : > { %2573 = vst.msk [vmem:[#allocation5 + $0x8] sm:$0xf] %vm2570_vm6, %v2551_v1 }
 0x34e   : > { %2670 = vst.msk [vmem:[#allocation5 + $0x8] sm:$0xf] %vm2667_vm7, %v4229_v50 }
 0x34f   : > { %v1946_v14 = vpop.permute.xlu1 %1945 }
 0x350   : > { %v2041_v43 = vpop.permute.xlu0 %2040  ;;  %1963 = vst.msk [vmem:[#allocation5 + $0x1c] sm:$0xf] %vm1955_vm5, %v1946_v14 }
 0x351   : > { %2060 = vst.msk [vmem:[#allocation5 + $0x1c] sm:$0xf] %vm2052_vm1, %v2043_v17 }
 0x352   : > { %2109 = vst.msk [vmem:[#allocation5 + $0x1c] sm:$0xf] %vm2101_vm13, %v2092_v16 }
 0x353   : > { %v3139_v44 = vld [vmem:[#allocation5] sm:$0xff]   ;;  %v2557_v47 = vpop.permute.xlu1 %2556 }
 0x354   : > { %3065 = vmatprep.mubr.msk.bf16.mxu1 %vm2747_vm8, %v3139_v44  ;;  %v2652_v48 = vpop.permute.xlu0 %2651 }
 0x357   : > { %v2553_v49 = vpop.permute.xlu1 %2552 }
 0x358   : > { %v2251_v51 = vpop.permute.xlu0 %2250  ;;  %2574 = vst.msk [vmem:[#allocation5 + $0xc] sm:$0xf] %vm2570_vm6, %v2553_v49 }
 0x359   : > { %2671 = vst.msk [vmem:[#allocation5 + $0xc] sm:$0xf] %vm2667_vm7, %v2650_v31 }
 0x35b   : > { %v1942_v39 = vpop.permute.xlu1 %1941 }
 0x35c   : > { %v2247_v53 = vpop.permute.xlu0 %2246  ;;  %1961 = vst.msk [vmem:[#allocation5 + $0x14] sm:$0xf] %vm1955_vm5, %v1942_v39 }
 0x35d   : > { %2267 = vst.msk [vmem:[#allocation5 + $0x10] sm:$0xf] %vm2262_vm10, %v2247_v53 }
 0x35e   : > { %2058 = vst.msk [vmem:[#allocation5 + $0x14] sm:$0xf] %vm2052_vm1, %v2039_v35 }
 0x35f   : > { %2364 = vst.msk [vmem:[#allocation5 + $0x10] sm:$0xf] %vm2359_vm0, %v2344_v34  ;;  %v2253_v54 = vpop.permute.xlu1 %2252 }
 0x360   : > { %2107 = vst.msk [vmem:[#allocation5 + $0x14] sm:$0xf] %vm2101_vm13, %v2088_v63  ;;  %v2559_v55 = vpop.permute.xlu0 %2558  ;;  %v3143_v45 = vld [vmem:[#allocation5 + $0x8] sm:$0xff]  }
 0x361   : > { %2414 = vst.msk [vmem:[#allocation5 + $0x10] sm:$0xf] %vm2409_vm3, %v2394_v33  ;;  %3066 = vmatmul.mubr.msk.bf16.vlgmr.msra.gmra.mrb[0].mxu1 %vm2747_vm8, %v3143_v45 }
 0x362   : > { %2270 = vst.msk [vmem:[#allocation5 + $0x1c] sm:$0xf] %vm2262_vm10, %v2253_v54 }
 0x363   : > { %2367 = vst.msk [vmem:[#allocation5 + $0x1c] sm:$0xf] %vm2359_vm0, %v2350_v38  ;;  %v2249_v56 = vpop.permute.xlu1 %2248 }
 0x364   : > { %2417 = vst.msk [vmem:[#allocation5 + $0x1c] sm:$0xf] %vm2409_vm3, %v4194_v28  ;;  %v1944_v59 = vpop.permute.xlu0 %1943 }
 0x365   : > { %2578 = vst.msk [vmem:[#allocation5 + $0x1c] sm:$0xf] %vm2570_vm6, %v4206_v52 }
 0x366   : > { %2268 = vst.msk [vmem:[#allocation5 + $0x14] sm:$0xf] %vm2262_vm10, %v2249_v56 }
 0x367   : > { %1962 = vst.msk [vmem:[#allocation5 + $0x18] sm:$0xf] %vm1955_vm5, %v1944_v59  ;;  %v2654_v28 = vpop.permute.xlu1 %2653 }
 0x368   : > { %2365 = vst.msk [vmem:[#allocation5 + $0x14] sm:$0xf] %vm2359_vm0, %v2346_v41  ;;  %v2555_v52 = vpop.permute.xlu0 %2554 }
 0x369   : > { %2059 = vst.msk [vmem:[#allocation5 + $0x18] sm:$0xf] %vm2052_vm1, %v2041_v43 }
 0x36a   : > { %2415 = vst.msk [vmem:[#allocation5 + $0x14] sm:$0xf] %vm2409_vm3, %v4231_v23 }
 0x36b   : > { %2108 = vst.msk [vmem:[#allocation5 + $0x18] sm:$0xf] %vm2101_vm13, %v4236_v60  ;;  %v2658_v5 = vpop.permute.xlu1 %2657 }
 0x36c   : > { %2576 = vst.msk [vmem:[#allocation5 + $0x14] sm:$0xf] %vm2570_vm6, %v2557_v47  ;;  %2575 = vst.msk [vmem:[#allocation5 + $0x10] sm:$0xf] %vm2570_vm6, %v2555_v52  ;;  %v2656_v2 = vpop.permute.xlu0 %2655 }
 0x36d   : > { %2269 = vst.msk [vmem:[#allocation5 + $0x18] sm:$0xf] %vm2262_vm10, %v2251_v51 }
 0x36e   : > { %2366 = vst.msk [vmem:[#allocation5 + $0x18] sm:$0xf] %vm2359_vm0, %v4252_v32 }
 0x36f   : > { %2673 = vst.msk [vmem:[#allocation5 + $0x14] sm:$0xf] %vm2667_vm7, %v2654_v28  ;;  %2672 = vst.msk [vmem:[#allocation5 + $0x10] sm:$0xf] %vm2667_vm7, %v2652_v48 }
 0x370   : > { %2416 = vst.msk [vmem:[#allocation5 + $0x18] sm:$0xf] %vm2409_vm3, %v4244_v9 }
 0x371   : > { %2577 = vst.msk [vmem:[#allocation5 + $0x18] sm:$0xf] %vm2570_vm6, %v2559_v55 }
 0x372   : > { %2675 = vst.msk [vmem:[#allocation5 + $0x1c] sm:$0xf] %vm2667_vm7, %v2658_v5  ;;  %2674 = vst.msk [vmem:[#allocation5 + $0x18] sm:$0xf] %vm2667_vm7, %v2656_v2 }
 0x376   : > { %v3144_v3 = vld [vmem:[#allocation5 + $0x10] sm:$0xff]  }
 0x377   : > { %3069 = vmatprep.mubr.msk.bf16.mxu1 %vm2747_vm8, %v3144_v3 }
 0x379   : > { %v3145_v0 = vld [vmem:[#allocation5 + $0x18] sm:$0xff]  }
 0x37a   : > { %3070 = vmatmul.mubr.msk.bf16.gmra.mrb[4].mxu1 %vm2747_vm8, %v3145_v0 }
 0x434   : > { %v3067_v37 = vpop.f32.mrb[0].mxu1 }
 0x435   : > { %v2807_v8 = vadd.f32 %v3067_v37, %v2999_v4  ;;  %v2798_v10 = vpop.f32.mrb[1].mxu1 }
 0x436   : > { %v2799_v11 = vadd.f32 %v2999_v4, %v2798_v10  ;;  %v3068_v27 = vpop.f32.mrb[2].mxu1 }
 0x437   : > { %v2831_v18 = vmax.f32 %v2807_v8, 0.0  ;;  %v2810_v19 = vadd.f32 %v3068_v27, %v2999_v4  ;;  %v2801_v15 = vpop.f32.mrb[3].mxu1 }
 0x438   : > { %v2829_v22 = vmax.f32 %v2799_v11, 0.0  ;;  %v2802_v42 = vadd.f32 %v2999_v4, %v2801_v15 }
 0x439   : > { %2840 = vst.msk [vmem:[%s244_s7 + $0x10] sm:$0xff] %vm2837_vm9, %v2831_v18  ;;  %v2832_v62 = vmax.f32 %v2810_v19, 0.0 }
 0x43a   : > { %2838 = vst.msk [vmem:[%s244_s7] sm:$0xff] %vm2837_vm9, %v2829_v22  ;;  %v2830_v46 = vmax.f32 %v2802_v42, 0.0 }
 0x43b   : > { %2841 = vst.msk [vmem:[%s244_s7 + $0x18] sm:$0xff] %vm2837_vm9, %v2832_v62 }
 0x43c   : > { %2839 = vst.msk [vmem:[%s244_s7 + $0x8] sm:$0xff] %vm2837_vm9, %v2830_v46 }
 0x44d   : > { %v3071_v50 = vpop.f32.mrb[4].mxu1 }
 0x44e   : > { %v2823_v6 = vadd.f32 %v3071_v50, %v2999_v4  ;;  %v2814_v7 = vpop.f32.mrb[5].mxu1 }
 0x44f   : > { %v2815_v23 = vadd.f32 %v2999_v4, %v2814_v7  ;;  %v3072_v58 = vpop.f32.mrb[6].mxu1 }
 0x450   : > { %v2835_v12 = vmax.f32 %v2823_v6, 0.0  ;;  %v2826_v24 = vadd.f32 %v3072_v58, %v2999_v4  ;;  %v2817_v26 = vpop.f32.mrb[7].mxu1 }
 0x451   : > { %v2833_v60 = vmax.f32 %v2815_v23, 0.0  ;;  %v2818_v20 = vadd.f32 %v2999_v4, %v2817_v26 }
 0x452   : > { %2844 = vst.msk [vmem:[%s244_s7 + $0x30] sm:$0xff] %vm2837_vm9, %v2835_v12  ;;  %v2836_v29 = vmax.f32 %v2826_v24, 0.0 }
 0x453   : > { %2842 = vst.msk [vmem:[%s244_s7 + $0x20] sm:$0xff] %vm2837_vm9, %v2833_v60  ;;  %v2834_v30 = vmax.f32 %v2818_v20, 0.0 }
 0x454   : > { %2845 = vst.msk [vmem:[%s244_s7 + $0x38] sm:$0xff] %vm2837_vm9, %v2836_v29 }
 0x455   : > { %2843 = vst.msk [vmem:[%s244_s7 + $0x28] sm:$0xff] %vm2837_vm9, %v2834_v30 }
 0x456 PF: > { %p15_p8 = scmp.ge.s32.totalorder %s3281_s23, 4   ;;  %s4369_s18 = smov %s3202_s19 }
 0x457   : > { %s4370_s19 = smov %s3206_s20  ;;  %s4371_s20 = smov %s3291_s26 }
 0x458   : > { %s4372_s21 = smov %s3281_s23  ;;  %17 = sbr.rel (!%p15_p8) target bundleno = 3 (0x3), region = 87 }
 0x45f   :  { %2867 = vsyncpa [#allocation7], 1 }
 0x460   :  { %2869 = vsyncpa [#allocation7 + $0x1], 1 }

</bundles_post_ra>
